<compile_context>
chip_gen: v7x
topology: tpu7x:2x2x1
jax: 0.10.0
libtpu: 0.0.40
codegen_flags: <defaults>
</compile_context>

<pallas_src>
import functools

import jax
import jax.numpy as jnp
from jax.experimental import pallas as pl
from jax.experimental.pallas import tpu as pltpu


def _round_up(x, m):
    return ((x + m - 1) // m) * m


def _num_grid_splits():
    """2 grid steps (one per TensorCore) on v7x, 1 on single-TC chips."""
    try:
        kind = jax.devices()[0].device_kind.lower()
    except Exception:
        return 1
    return 2 if "v7" in kind else 1


# ----------------------------------------------------------------------------
# Conv matmul kernel, channel-major orientation:
#     out(Cout, M) = relu(Wmat(Cout, K) @ patches(K, M) + b(Cout, 1))
# M = B*Ho*Wo lives on the lane axis -> wide, unmasked vector stores even for
# the Cout = 16/32/64 layers (lane-dense-store recommendation, realized
# without any in-kernel value reshape).
# ----------------------------------------------------------------------------
def _conv_matmul_kernel(pm_ref, w_ref, b_ref, o_ref):
    acc = jnp.dot(w_ref[...], pm_ref[...], preferred_element_type=jnp.float32)
    acc = jnp.maximum(acc + b_ref[...], 0.0)
    o_ref[...] = acc.astype(o_ref.dtype)


def conv2d_relu_cm(x_cm, w_mat, bias, stride, *, num_splits=1):
    """3x3 conv (padding=1) + ReLU in channel-major layout.

    x_cm:  (Cin, B, H, W)  bf16 activations
    w_mat: (Cout, 9*Cin)   bf16, column order (kh, kw, cin)
    bias:  (Cout,)         f32
    returns (Cout, B, Ho, Wo) bf16
    """
    Cin, B, H, W = x_cm.shape
    Cout, K = w_mat.shape
    assert K == 9 * Cin
    kh = kw = 3
    pad = 1
    Ho = (H + 2 * pad - kh) // stride + 1
    Wo = (W + 2 * pad - kw) // stride + 1
    M = B * Ho * Wo

    # im2col in channel-major layout: pure pad / strided-slice / concat
    # (no transposes), done in XLA.
    xp = jnp.pad(x_cm, ((0, 0), (0, 0), (pad, pad), (pad, pad)))
    patches = []
    for i in range(kh):
        for j in range(kw):
            patches.append(
                xp[:, :,
                   i:i + (Ho - 1) * stride + 1:stride,
                   j:j + (Wo - 1) * stride + 1:stride])
    pm = jnp.concatenate(patches, axis=0).reshape(K, M)

    # Grid: single step on 1-TC chips; on v7x, 2 lane-dimension blocks
    # (multiples of 128, partial last block is fine) so both cores get work.
    if num_splits > 1:
        tm = min(M, _round_up(pl.cdiv(M, num_splits), 128))
    else:
        tm = M
    assert tm == M or tm % 128 == 0, (tm, M)
    grid = pl.cdiv(M, tm)

    b2 = bias.reshape(Cout, 1).astype(jnp.float32)

    y = pl.pallas_call(
        _conv_matmul_kernel,
        out_shape=jax.ShapeDtypeStruct((Cout, M), jnp.bfloat16),
        grid_spec=pltpu.PrefetchScalarGridSpec(
            num_scalar_prefetch=0,
            grid=(grid,),
            in_specs=[
                pl.BlockSpec((K, tm), lambda i: (0, i)),      # patch columns
                pl.BlockSpec((Cout, K), lambda i: (0, 0)),    # whole weight
                pl.BlockSpec((Cout, 1), lambda i: (0, 0)),    # bias column
            ],
            out_specs=pl.BlockSpec((Cout, tm), lambda i: (0, i)),
        ),
        compiler_params=pltpu.CompilerParams(
            dimension_semantics=("parallel",),
            vmem_limit_bytes=32 * 1024 * 1024,
        ),
    )(pm, w_mat, b2)
    return y.reshape(Cout, B, Ho, Wo)


# ----------------------------------------------------------------------------
# Fused mu / logvar Linear (single concatenated weight) + reparameterization.
# ----------------------------------------------------------------------------
def _head_kernel(x_ref, w_ref, b_ref, eps_ref, mu_ref, lv_ref, z_ref, *, zdim):
    out = jnp.dot(x_ref[...], w_ref[...], preferred_element_type=jnp.float32)
    out = out + b_ref[...]
    mu = out[:, :zdim]
    lv = out[:, zdim:]
    mu_ref[...] = mu
    lv_ref[...] = lv
    # z = mu + exp(0.5*logvar) * eps   (eps is (1, Z): one vector, broadcast
    # over the batch — exactly torch.randn(z_dim) in the reference forward)
    z_ref[...] = mu + jnp.exp(0.5 * lv) * eps_ref[...]


def linear_heads(feat, w_cat, b_cat, eps_row):
    B, F = feat.shape
    Z2 = w_cat.shape[1]
    Z = Z2 // 2
    out_shape = (
        jax.ShapeDtypeStruct((B, Z), jnp.float32),  # mu
        jax.ShapeDtypeStruct((B, Z), jnp.float32),  # logvar
        jax.ShapeDtypeStruct((B, Z), jnp.float32),  # z
    )
    mu, lv, z = pl.pallas_call(
        functools.partial(_head_kernel, zdim=Z),
        out_shape=out_shape,
        grid_spec=pltpu.PrefetchScalarGridSpec(
            num_scalar_prefetch=0,
            grid=(1,),
            in_specs=[
                pl.BlockSpec((B, F), lambda i: (0, 0)),     # activations
                pl.BlockSpec((F, Z2), lambda i: (0, 0)),    # [w_mu | w_lv]
                pl.BlockSpec((1, Z2), lambda i: (0, 0)),    # [b_mu | b_lv]
                pl.BlockSpec((1, Z), lambda i: (0, 0)),     # eps row
            ],
            out_specs=[
                pl.BlockSpec((B, Z), lambda i: (0, 0)),
                pl.BlockSpec((B, Z), lambda i: (0, 0)),
                pl.BlockSpec((B, Z), lambda i: (0, 0)),
            ],
        ),
        compiler_params=pltpu.CompilerParams(
            dimension_semantics=("arbitrary",),
            vmem_limit_bytes=32 * 1024 * 1024,
        ),
    )(
        feat.astype(jnp.bfloat16),
        w_cat,
        b_cat.reshape(1, Z2).astype(jnp.float32),
        eps_row.astype(jnp.float32),
    )
    return mu, lv, z


# ----------------------------------------------------------------------------
# Full Encoder forward
# ----------------------------------------------------------------------------
def encoder_forward(params, x_nchw, eps_row):
    # PyTorch NCHW -> channel-major (C, B, H, W); bf16 activations, f32 MXU acc.
    x = jnp.transpose(x_nchw, (1, 0, 2, 3)).astype(jnp.bfloat16)
    splits = _num_grid_splits()
    strides = (2, 2, 2, 2, 1)
    for (w_mat, bias), s in zip(params["convs"], strides):
        x = conv2d_relu_cm(x, w_mat, bias, s, num_splits=splits)
        # TODO(synk): nn.Dropout(0.2) treated as identity (eval semantics)

    C, B, H, W = x.shape
    # PyTorch x.view(-1, C*H*W): per-sample flatten in (C, H, W) order.
    feat = jnp.transpose(x, (1, 0, 2, 3)).reshape(B, C * H * W)

    mu, logvar, z = linear_heads(feat, params["head_w"], params["head_b"], eps_row)
    return z, mu, logvar


# ----------------------------------------------------------------------------
# Deterministic synthetic parameters, stored in the layouts the kernels use.
# To load real PyTorch weights:
#   conv OIHW (Cout, Cin, 3, 3) -> transpose(0, 2, 3, 1).reshape(Cout, 9*Cin)
#   Linear W  (Z, F)            -> .T, then concat mu/logvar along axis 1
# ----------------------------------------------------------------------------
def init_params(key, features, z_dim):
    chans = [3, features, features * 2, features * 4, features * 8, features * 4]
    keys = jax.random.split(key, len(chans) + 1)
    convs = []
    for li in range(len(chans) - 1):
        cin, cout = chans[li], chans[li + 1]
        w = 0.05 * jax.random.normal(keys[li], (cout, 3, 3, cin), jnp.float32)
        convs.append((w.reshape(cout, 9 * cin).astype(jnp.bfloat16),
                      jnp.zeros((cout,), jnp.float32)))
    in_feat = features * 4 * 7 * 7
    w_mu = 0.02 * jax.random.normal(keys[-2], (in_feat, z_dim), jnp.float32)
    w_lv = 0.02 * jax.random.normal(keys[-1], (in_feat, z_dim), jnp.float32)
    return {
        "convs": convs,
        "head_w": jnp.concatenate([w_mu, w_lv], axis=1).astype(jnp.bfloat16),
        "head_b": jnp.zeros((2 * z_dim,), jnp.float32),
    }


if __name__ == "__main__":
    # Spatial must be 112 so that four stride-2 convs reduce it to 7x7
    # (the Linear expects features*4*7*7 inputs).  Small channel/z config.
    features = 16
    z_dim = 32
    batch = 2

    root = jax.random.PRNGKey(0)
    k_param, k_x, k_eps = jax.random.split(root, 3)

    params = init_params(k_param, features, z_dim)
    x = jax.random.normal(k_x, (batch, 3, 112, 112), jnp.float32)
    # torch.randn(z_dim): one noise vector shared across the batch,
    # exactly as in the reference Encoder.forward.
    eps_row = jax.random.normal(k_eps, (1, z_dim), jnp.float32)

    fwd = jax.jit(encoder_forward)
    z, mu, logvar = fwd(params, x, eps_row)
    jax.block_until_ready((z, mu, logvar))

    assert z.shape == (batch, z_dim)
    assert mu.shape == (batch, z_dim)
    assert logvar.shape == (batch, z_dim)
    print("KERNEL_OK")
</pallas_src>

<mosaic_0001>
module attributes {stable_mosaic.version = 11 : i64} {
  func.func @_conv_matmul_kernel(%arg0: i32, %arg1: memref<27x6272xbf16, #tpu.memory_space<vmem>>, %arg2: memref<16x27xbf16, #tpu.memory_space<vmem>>, %arg3: memref<16x1xf32, #tpu.memory_space<vmem>>, %arg4: memref<16x6272xbf16, #tpu.memory_space<vmem>>) attributes {dimension_semantics = [#tpu.dimension_semantics<parallel>], iteration_bounds = array<i64: 1>, scalar_prefetch = 0 : i64, scratch_operands = 0 : i64, tpu.core_type = #tpu.core_type<tc>, window_params = [{transform_indices = @transform_0, window_bounds = array<i64: 27, 6272>}, {pipeline_mode = #tpu.pipeline_mode<synchronous>, transform_indices = @transform_1, window_bounds = array<i64: 16, 27>}, {pipeline_mode = #tpu.pipeline_mode<synchronous>, transform_indices = @transform_2, window_bounds = array<i64: 16, 1>}, {transform_indices = @transform_3, window_bounds = array<i64: 16, 6272>}]} {
    %c0 = arith.constant 0 : index
    %c0_0 = arith.constant 0 : index
    %0 = vector.load %arg2[%c0, %c0_0] : memref<16x27xbf16, #tpu.memory_space<vmem>>, vector<16x27xbf16>
    %c0_1 = arith.constant 0 : index
    %c0_2 = arith.constant 0 : index
    %1 = vector.load %arg1[%c0_1, %c0_2] : memref<27x6272xbf16, #tpu.memory_space<vmem>>, vector<27x6272xbf16>
    %cst = arith.constant dense<0.000000e+00> : vector<16x6272xf32>
    %2 = tpu.matmul %0, %1, %cst {dimension_numbers = #tpu.dot_dimension_numbers<[1], [0], [0], [1], [0, 0, 1, 1], [], []>} : vector<16x27xbf16>, vector<27x6272xbf16>, vector<16x6272xf32> -> vector<16x6272xf32>
    %c0_3 = arith.constant 0 : index
    %c0_4 = arith.constant 0 : index
    %3 = vector.load %arg3[%c0_3, %c0_4] : memref<16x1xf32, #tpu.memory_space<vmem>>, vector<16x1xf32>
    %4 = vector.broadcast %3 : vector<16x1xf32> to vector<16x6272xf32>
    %5 = arith.addf %2, %4 : vector<16x6272xf32>
    %cst_5 = arith.constant 0.000000e+00 : f32
    %6 = vector.broadcast %cst_5 : f32 to vector<16x6272xf32>
    %7 = arith.maximumf %5, %6 : vector<16x6272xf32>
    %8 = arith.truncf %7 : vector<16x6272xf32> to vector<16x6272xbf16>
    %c0_6 = arith.constant 0 : index
    %c0_7 = arith.constant 0 : index
    %9 = vector.load %arg4[%c0_6, %c0_7] : memref<16x6272xbf16, #tpu.memory_space<vmem>>, vector<16x6272xbf16>
    tpu.vector_store %arg4[%c0_6, %c0_7], %8 {strides = array<i32>} : memref<16x6272xbf16, #tpu.memory_space<vmem>>, vector<16x6272xbf16>,
    return
  }
  func.func @transform_0(%arg0: i32) -> (i32, i32) {
    %c0_i32 = arith.constant 0 : i32
    %c0_i32_0 = arith.constant 0 : i32
    return %c0_i32, %arg0 : i32, i32
  }
  func.func @transform_1(%arg0: i32) -> (i32, i32) {
    %c0_i32 = arith.constant 0 : i32
    %c0_i32_0 = arith.constant 0 : i32
    %c0_i32_1 = arith.constant 0 : i32
    return %c0_i32, %c0_i32_0 : i32, i32
  }
  func.func @transform_2(%arg0: i32) -> (i32, i32) {
    %c0_i32 = arith.constant 0 : i32
    %c0_i32_0 = arith.constant 0 : i32
    %c0_i32_1 = arith.constant 0 : i32
    return %c0_i32, %c0_i32_0 : i32, i32
  }
  func.func @transform_3(%arg0: i32) -> (i32, i32) {
    %c0_i32 = arith.constant 0 : i32
    %c0_i32_0 = arith.constant 0 : i32
    return %c0_i32, %arg0 : i32, i32
  }
}

module attributes {stable_mosaic.version = 11 : i64} {
  func.func @_conv_matmul_kernel(%arg0: i32, %arg1: memref<144x1568xbf16, #tpu.memory_space<vmem>>, %arg2: memref<32x144xbf16, #tpu.memory_space<vmem>>, %arg3: memref<32x1xf32, #tpu.memory_space<vmem>>, %arg4: memref<32x1568xbf16, #tpu.memory_space<vmem>>) attributes {dimension_semantics = [#tpu.dimension_semantics<parallel>], iteration_bounds = array<i64: 1>, scalar_prefetch = 0 : i64, scratch_operands = 0 : i64, tpu.core_type = #tpu.core_type<tc>, window_params = [{transform_indices = @transform_0, window_bounds = array<i64: 144, 1568>}, {pipeline_mode = #tpu.pipeline_mode<synchronous>, transform_indices = @transform_1, window_bounds = array<i64: 32, 144>}, {pipeline_mode = #tpu.pipeline_mode<synchronous>, transform_indices = @transform_2, window_bounds = array<i64: 32, 1>}, {transform_indices = @transform_3, window_bounds = array<i64: 32, 1568>}]} {
    %c0 = arith.constant 0 : index
    %c0_0 = arith.constant 0 : index
    %0 = vector.load %arg2[%c0, %c0_0] : memref<32x144xbf16, #tpu.memory_space<vmem>>, vector<32x144xbf16>
    %c0_1 = arith.constant 0 : index
    %c0_2 = arith.constant 0 : index
    %1 = vector.load %arg1[%c0_1, %c0_2] : memref<144x1568xbf16, #tpu.memory_space<vmem>>, vector<144x1568xbf16>
    %cst = arith.constant dense<0.000000e+00> : vector<32x1568xf32>
    %2 = tpu.matmul %0, %1, %cst {dimension_numbers = #tpu.dot_dimension_numbers<[1], [0], [0], [1], [0, 0, 1, 1], [], []>} : vector<32x144xbf16>, vector<144x1568xbf16>, vector<32x1568xf32> -> vector<32x1568xf32>
    %c0_3 = arith.constant 0 : index
    %c0_4 = arith.constant 0 : index
    %3 = vector.load %arg3[%c0_3, %c0_4] : memref<32x1xf32, #tpu.memory_space<vmem>>, vector<32x1xf32>
    %4 = vector.broadcast %3 : vector<32x1xf32> to vector<32x1568xf32>
    %5 = arith.addf %2, %4 : vector<32x1568xf32>
    %cst_5 = arith.constant 0.000000e+00 : f32
    %6 = vector.broadcast %cst_5 : f32 to vector<32x1568xf32>
    %7 = arith.maximumf %5, %6 : vector<32x1568xf32>
    %8 = arith.truncf %7 : vector<32x1568xf32> to vector<32x1568xbf16>
    %c0_6 = arith.constant 0 : index
    %c0_7 = arith.constant 0 : index
    %9 = vector.load %arg4[%c0_6, %c0_7] : memref<32x1568xbf16, #tpu.memory_space<vmem>>, vector<32x1568xbf16>
    tpu.vector_store %arg4[%c0_6, %c0_7], %8 {strides = array<i32>} : memref<32x1568xbf16, #tpu.memory_space<vmem>>, vector<32x1568xbf16>,
    return
  }
  func.func @transform_0(%arg0: i32) -> (i32, i32) {
    %c0_i32 = arith.constant 0 : i32
    %c0_i32_0 = arith.constant 0 : i32
    return %c0_i32, %arg0 : i32, i32
  }
  func.func @transform_1(%arg0: i32) -> (i32, i32) {
    %c0_i32 = arith.constant 0 : i32
    %c0_i32_0 = arith.constant 0 : i32
    %c0_i32_1 = arith.constant 0 : i32
    return %c0_i32, %c0_i32_0 : i32, i32
  }
  func.func @transform_2(%arg0: i32) -> (i32, i32) {
    %c0_i32 = arith.constant 0 : i32
    %c0_i32_0 = arith.constant 0 : i32
    %c0_i32_1 = arith.constant 0 : i32
    return %c0_i32, %c0_i32_0 : i32, i32
  }
  func.func @transform_3(%arg0: i32) -> (i32, i32) {
    %c0_i32 = arith.constant 0 : i32
    %c0_i32_0 = arith.constant 0 : i32
    return %c0_i32, %arg0 : i32, i32
  }
}

module attributes {stable_mosaic.version = 11 : i64} {
  func.func @_conv_matmul_kernel(%arg0: i32, %arg1: memref<288x392xbf16, #tpu.memory_space<vmem>>, %arg2: memref<64x288xbf16, #tpu.memory_space<vmem>>, %arg3: memref<64x1xf32, #tpu.memory_space<vmem>>, %arg4: memref<64x392xbf16, #tpu.memory_space<vmem>>) attributes {dimension_semantics = [#tpu.dimension_semantics<parallel>], iteration_bounds = array<i64: 1>, scalar_prefetch = 0 : i64, scratch_operands = 0 : i64, tpu.core_type = #tpu.core_type<tc>, window_params = [{transform_indices = @transform_0, window_bounds = array<i64: 288, 392>}, {pipeline_mode = #tpu.pipeline_mode<synchronous>, transform_indices = @transform_1, window_bounds = array<i64: 64, 288>}, {pipeline_mode = #tpu.pipeline_mode<synchronous>, transform_indices = @transform_2, window_bounds = array<i64: 64, 1>}, {transform_indices = @transform_3, window_bounds = array<i64: 64, 392>}]} {
    %c0 = arith.constant 0 : index
    %c0_0 = arith.constant 0 : index
    %0 = vector.load %arg2[%c0, %c0_0] : memref<64x288xbf16, #tpu.memory_space<vmem>>, vector<64x288xbf16>
    %c0_1 = arith.constant 0 : index
    %c0_2 = arith.constant 0 : index
    %1 = vector.load %arg1[%c0_1, %c0_2] : memref<288x392xbf16, #tpu.memory_space<vmem>>, vector<288x392xbf16>
    %cst = arith.constant dense<0.000000e+00> : vector<64x392xf32>
    %2 = tpu.matmul %0, %1, %cst {dimension_numbers = #tpu.dot_dimension_numbers<[1], [0], [0], [1], [0, 0, 1, 1], [], []>} : vector<64x288xbf16>, vector<288x392xbf16>, vector<64x392xf32> -> vector<64x392xf32>
    %c0_3 = arith.constant 0 : index
    %c0_4 = arith.constant 0 : index
    %3 = vector.load %arg3[%c0_3, %c0_4] : memref<64x1xf32, #tpu.memory_space<vmem>>, vector<64x1xf32>
    %4 = vector.broadcast %3 : vector<64x1xf32> to vector<64x392xf32>
    %5 = arith.addf %2, %4 : vector<64x392xf32>
    %cst_5 = arith.constant 0.000000e+00 : f32
    %6 = vector.broadcast %cst_5 : f32 to vector<64x392xf32>
    %7 = arith.maximumf %5, %6 : vector<64x392xf32>
    %8 = arith.truncf %7 : vector<64x392xf32> to vector<64x392xbf16>
    %c0_6 = arith.constant 0 : index
    %c0_7 = arith.constant 0 : index
    %9 = vector.load %arg4[%c0_6, %c0_7] : memref<64x392xbf16, #tpu.memory_space<vmem>>, vector<64x392xbf16>
    tpu.vector_store %arg4[%c0_6, %c0_7], %8 {strides = array<i32>} : memref<64x392xbf16, #tpu.memory_space<vmem>>, vector<64x392xbf16>,
    return
  }
  func.func @transform_0(%arg0: i32) -> (i32, i32) {
    %c0_i32 = arith.constant 0 : i32
    %c0_i32_0 = arith.constant 0 : i32
    return %c0_i32, %arg0 : i32, i32
  }
  func.func @transform_1(%arg0: i32) -> (i32, i32) {
    %c0_i32 = arith.constant 0 : i32
    %c0_i32_0 = arith.constant 0 : i32
    %c0_i32_1 = arith.constant 0 : i32
    return %c0_i32, %c0_i32_0 : i32, i32
  }
  func.func @transform_2(%arg0: i32) -> (i32, i32) {
    %c0_i32 = arith.constant 0 : i32
    %c0_i32_0 = arith.constant 0 : i32
    %c0_i32_1 = arith.constant 0 : i32
    return %c0_i32, %c0_i32_0 : i32, i32
  }
  func.func @transform_3(%arg0: i32) -> (i32, i32) {
    %c0_i32 = arith.constant 0 : i32
    %c0_i32_0 = arith.constant 0 : i32
    return %c0_i32, %arg0 : i32, i32
  }
}

module attributes {stable_mosaic.version = 11 : i64} {
  func.func @_conv_matmul_kernel(%arg0: i32, %arg1: memref<576x98xbf16, #tpu.memory_space<vmem>>, %arg2: memref<128x576xbf16, #tpu.memory_space<vmem>>, %arg3: memref<128x1xf32, #tpu.memory_space<vmem>>, %arg4: memref<128x98xbf16, #tpu.memory_space<vmem>>) attributes {dimension_semantics = [#tpu.dimension_semantics<parallel>], iteration_bounds = array<i64: 1>, scalar_prefetch = 0 : i64, scratch_operands = 0 : i64, tpu.core_type = #tpu.core_type<tc>, window_params = [{transform_indices = @transform_0, window_bounds = array<i64: 576, 98>}, {pipeline_mode = #tpu.pipeline_mode<synchronous>, transform_indices = @transform_1, window_bounds = array<i64: 128, 576>}, {pipeline_mode = #tpu.pipeline_mode<synchronous>, transform_indices = @transform_2, window_bounds = array<i64: 128, 1>}, {transform_indices = @transform_3, window_bounds = array<i64: 128, 98>}]} {
    %c0 = arith.constant 0 : index
    %c0_0 = arith.constant 0 : index
    %0 = vector.load %arg2[%c0, %c0_0] : memref<128x576xbf16, #tpu.memory_space<vmem>>, vector<128x576xbf16>
    %c0_1 = arith.constant 0 : index
    %c0_2 = arith.constant 0 : index
    %1 = vector.load %arg1[%c0_1, %c0_2] : memref<576x98xbf16, #tpu.memory_space<vmem>>, vector<576x98xbf16>
    %cst = arith.constant dense<0.000000e+00> : vector<128x98xf32>
    %2 = tpu.matmul %0, %1, %cst {dimension_numbers = #tpu.dot_dimension_numbers<[1], [0], [0], [1], [0, 0, 1, 1], [], []>} : vector<128x576xbf16>, vector<576x98xbf16>, vector<128x98xf32> -> vector<128x98xf32>
    %c0_3 = arith.constant 0 : index
    %c0_4 = arith.constant 0 : index
    %3 = vector.load %arg3[%c0_3, %c0_4] : memref<128x1xf32, #tpu.memory_space<vmem>>, vector<128x1xf32>
    %4 = vector.broadcast %3 : vector<128x1xf32> to vector<128x98xf32>
    %5 = arith.addf %2, %4 : vector<128x98xf32>
    %cst_5 = arith.constant 0.000000e+00 : f32
    %6 = vector.broadcast %cst_5 : f32 to vector<128x98xf32>
    %7 = arith.maximumf %5, %6 : vector<128x98xf32>
    %8 = arith.truncf %7 : vector<128x98xf32> to vector<128x98xbf16>
    %c0_6 = arith.constant 0 : index
    %c0_7 = arith.constant 0 : index
    %9 = vector.load %arg4[%c0_6, %c0_7] : memref<128x98xbf16, #tpu.memory_space<vmem>>, vector<128x98xbf16>
    tpu.vector_store %arg4[%c0_6, %c0_7], %8 {strides = array<i32>} : memref<128x98xbf16, #tpu.memory_space<vmem>>, vector<128x98xbf16>,
    return
  }
  func.func @transform_0(%arg0: i32) -> (i32, i32) {
    %c0_i32 = arith.constant 0 : i32
    %c0_i32_0 = arith.constant 0 : i32
    return %c0_i32, %arg0 : i32, i32
  }
  func.func @transform_1(%arg0: i32) -> (i32, i32) {
    %c0_i32 = arith.constant 0 : i32
    %c0_i32_0 = arith.constant 0 : i32
    %c0_i32_1 = arith.constant 0 : i32
    return %c0_i32, %c0_i32_0 : i32, i32
  }
  func.func @transform_2(%arg0: i32) -> (i32, i32) {
    %c0_i32 = arith.constant 0 : i32
    %c0_i32_0 = arith.constant 0 : i32
    %c0_i32_1 = arith.constant 0 : i32
    return %c0_i32, %c0_i32_0 : i32, i32
  }
  func.func @transform_3(%arg0: i32) -> (i32, i32) {
    %c0_i32 = arith.constant 0 : i32
    %c0_i32_0 = arith.constant 0 : i32
    return %c0_i32, %arg0 : i32, i32
  }
}

module attributes {stable_mosaic.version = 11 : i64} {
  func.func @_conv_matmul_kernel(%arg0: i32, %arg1: memref<1152x98xbf16, #tpu.memory_space<vmem>>, %arg2: memref<64x1152xbf16, #tpu.memory_space<vmem>>, %arg3: memref<64x1xf32, #tpu.memory_space<vmem>>, %arg4: memref<64x98xbf16, #tpu.memory_space<vmem>>) attributes {dimension_semantics = [#tpu.dimension_semantics<parallel>], iteration_bounds = array<i64: 1>, scalar_prefetch = 0 : i64, scratch_operands = 0 : i64, tpu.core_type = #tpu.core_type<tc>, window_params = [{transform_indices = @transform_0, window_bounds = array<i64: 1152, 98>}, {pipeline_mode = #tpu.pipeline_mode<synchronous>, transform_indices = @transform_1, window_bounds = array<i64: 64, 1152>}, {pipeline_mode = #tpu.pipeline_mode<synchronous>, transform_indices = @transform_2, window_bounds = array<i64: 64, 1>}, {transform_indices = @transform_3, window_bounds = array<i64: 64, 98>}]} {
    %c0 = arith.constant 0 : index
    %c0_0 = arith.constant 0 : index
    %0 = vector.load %arg2[%c0, %c0_0] : memref<64x1152xbf16, #tpu.memory_space<vmem>>, vector<64x1152xbf16>
    %c0_1 = arith.constant 0 : index
    %c0_2 = arith.constant 0 : index
    %1 = vector.load %arg1[%c0_1, %c0_2] : memref<1152x98xbf16, #tpu.memory_space<vmem>>, vector<1152x98xbf16>
    %cst = arith.constant dense<0.000000e+00> : vector<64x98xf32>
    %2 = tpu.matmul %0, %1, %cst {dimension_numbers = #tpu.dot_dimension_numbers<[1], [0], [0], [1], [0, 0, 1, 1], [], []>} : vector<64x1152xbf16>, vector<1152x98xbf16>, vector<64x98xf32> -> vector<64x98xf32>
    %c0_3 = arith.constant 0 : index
    %c0_4 = arith.constant 0 : index
    %3 = vector.load %arg3[%c0_3, %c0_4] : memref<64x1xf32, #tpu.memory_space<vmem>>, vector<64x1xf32>
    %4 = vector.broadcast %3 : vector<64x1xf32> to vector<64x98xf32>
    %5 = arith.addf %2, %4 : vector<64x98xf32>
    %cst_5 = arith.constant 0.000000e+00 : f32
    %6 = vector.broadcast %cst_5 : f32 to vector<64x98xf32>
    %7 = arith.maximumf %5, %6 : vector<64x98xf32>
    %8 = arith.truncf %7 : vector<64x98xf32> to vector<64x98xbf16>
    %c0_6 = arith.constant 0 : index
    %c0_7 = arith.constant 0 : index
    %9 = vector.load %arg4[%c0_6, %c0_7] : memref<64x98xbf16, #tpu.memory_space<vmem>>, vector<64x98xbf16>
    tpu.vector_store %arg4[%c0_6, %c0_7], %8 {strides = array<i32>} : memref<64x98xbf16, #tpu.memory_space<vmem>>, vector<64x98xbf16>,
    return
  }
  func.func @transform_0(%arg0: i32) -> (i32, i32) {
    %c0_i32 = arith.constant 0 : i32
    %c0_i32_0 = arith.constant 0 : i32
    return %c0_i32, %arg0 : i32, i32
  }
  func.func @transform_1(%arg0: i32) -> (i32, i32) {
    %c0_i32 = arith.constant 0 : i32
    %c0_i32_0 = arith.constant 0 : i32
    %c0_i32_1 = arith.constant 0 : i32
    return %c0_i32, %c0_i32_0 : i32, i32
  }
  func.func @transform_2(%arg0: i32) -> (i32, i32) {
    %c0_i32 = arith.constant 0 : i32
    %c0_i32_0 = arith.constant 0 : i32
    %c0_i32_1 = arith.constant 0 : i32
    return %c0_i32, %c0_i32_0 : i32, i32
  }
  func.func @transform_3(%arg0: i32) -> (i32, i32) {
    %c0_i32 = arith.constant 0 : i32
    %c0_i32_0 = arith.constant 0 : i32
    return %c0_i32, %arg0 : i32, i32
  }
}

module attributes {stable_mosaic.version = 11 : i64} {
  func.func @_head_kernel(%arg0: i32, %arg1: memref<2x3136xbf16, #tpu.memory_space<vmem>>, %arg2: memref<3136x64xbf16, #tpu.memory_space<vmem>>, %arg3: memref<1x64xf32, #tpu.memory_space<vmem>>, %arg4: memref<1x32xf32, #tpu.memory_space<vmem>>, %arg5: memref<2x32xf32, #tpu.memory_space<vmem>>, %arg6: memref<2x32xf32, #tpu.memory_space<vmem>>, %arg7: memref<2x32xf32, #tpu.memory_space<vmem>>) attributes {dimension_semantics = [#tpu.dimension_semantics<arbitrary>], iteration_bounds = array<i64: 1>, scalar_prefetch = 0 : i64, scratch_operands = 0 : i64, tpu.core_type = #tpu.core_type<tc>, window_params = [{pipeline_mode = #tpu.pipeline_mode<synchronous>, transform_indices = @transform_0, window_bounds = array<i64: 2, 3136>}, {pipeline_mode = #tpu.pipeline_mode<synchronous>, transform_indices = @transform_1, window_bounds = array<i64: 3136, 64>}, {pipeline_mode = #tpu.pipeline_mode<synchronous>, transform_indices = @transform_2, window_bounds = array<i64: 1, 64>}, {pipeline_mode = #tpu.pipeline_mode<synchronous>, transform_indices = @transform_3, window_bounds = array<i64: 1, 32>}, {pipeline_mode = #tpu.pipeline_mode<synchronous>, transform_indices = @transform_4, window_bounds = array<i64: 2, 32>}, {pipeline_mode = #tpu.pipeline_mode<synchronous>, transform_indices = @transform_5, window_bounds = array<i64: 2, 32>}, {pipeline_mode = #tpu.pipeline_mode<synchronous>, transform_indices = @transform_6, window_bounds = array<i64: 2, 32>}]} {
    %c0 = arith.constant 0 : index
    %c0_0 = arith.constant 0 : index
    %0 = vector.load %arg1[%c0, %c0_0] : memref<2x3136xbf16, #tpu.memory_space<vmem>>, vector<2x3136xbf16>
    %c0_1 = arith.constant 0 : index
    %c0_2 = arith.constant 0 : index
    %1 = vector.load %arg2[%c0_1, %c0_2] : memref<3136x64xbf16, #tpu.memory_space<vmem>>, vector<3136x64xbf16>
    %cst = arith.constant dense<0.000000e+00> : vector<2x64xf32>
    %2 = tpu.matmul %0, %1, %cst {dimension_numbers = #tpu.dot_dimension_numbers<[1], [0], [0], [1], [0, 0, 1, 1], [], []>} : vector<2x3136xbf16>, vector<3136x64xbf16>, vector<2x64xf32> -> vector<2x64xf32>
    %c0_3 = arith.constant 0 : index
    %c0_4 = arith.constant 0 : index
    %3 = vector.load %arg3[%c0_3, %c0_4] : memref<1x64xf32, #tpu.memory_space<vmem>>, vector<1x64xf32>
    %4 = vector.broadcast %3 : vector<1x64xf32> to vector<2x64xf32>
    %5 = arith.addf %2, %4 : vector<2x64xf32>
    %6 = vector.extract_strided_slice %5 {offsets = [0, 0], sizes = [2, 32], strides = [1, 1]} : vector<2x64xf32> to vector<2x32xf32>
    %7 = vector.extract_strided_slice %5 {offsets = [0, 32], sizes = [2, 32], strides = [1, 1]} : vector<2x64xf32> to vector<2x32xf32>
    %c0_5 = arith.constant 0 : index
    %c0_6 = arith.constant 0 : index
    %8 = vector.load %arg5[%c0_5, %c0_6] : memref<2x32xf32, #tpu.memory_space<vmem>>, vector<2x32xf32>
    tpu.vector_store %arg5[%c0_5, %c0_6], %6 {strides = array<i32>} : memref<2x32xf32, #tpu.memory_space<vmem>>, vector<2x32xf32>,
    %c0_7 = arith.constant 0 : index
    %c0_8 = arith.constant 0 : index
    %9 = vector.load %arg6[%c0_7, %c0_8] : memref<2x32xf32, #tpu.memory_space<vmem>>, vector<2x32xf32>
    tpu.vector_store %arg6[%c0_7, %c0_8], %7 {strides = array<i32>} : memref<2x32xf32, #tpu.memory_space<vmem>>, vector<2x32xf32>,
    %cst_9 = arith.constant 5.000000e-01 : f32
    %10 = vector.broadcast %cst_9 : f32 to vector<2x32xf32>
    %11 = arith.mulf %10, %7 : vector<2x32xf32>
    %12 = math.exp %11 : vector<2x32xf32>
    %c0_10 = arith.constant 0 : index
    %c0_11 = arith.constant 0 : index
    %13 = vector.load %arg4[%c0_10, %c0_11] : memref<1x32xf32, #tpu.memory_space<vmem>>, vector<1x32xf32>
    %14 = vector.broadcast %13 : vector<1x32xf32> to vector<2x32xf32>
    %15 = arith.mulf %12, %14 : vector<2x32xf32>
    %16 = arith.addf %6, %15 : vector<2x32xf32>
    %c0_12 = arith.constant 0 : index
    %c0_13 = arith.constant 0 : index
    %17 = vector.load %arg7[%c0_12, %c0_13] : memref<2x32xf32, #tpu.memory_space<vmem>>, vector<2x32xf32>
    tpu.vector_store %arg7[%c0_12, %c0_13], %16 {strides = array<i32>} : memref<2x32xf32, #tpu.memory_space<vmem>>, vector<2x32xf32>,
    return
  }
  func.func @transform_0(%arg0: i32) -> (i32, i32) {
    %c0_i32 = arith.constant 0 : i32
    %c0_i32_0 = arith.constant 0 : i32
    %c0_i32_1 = arith.constant 0 : i32
    return %c0_i32, %c0_i32_0 : i32, i32
  }
  func.func @transform_1(%arg0: i32) -> (i32, i32) {
    %c0_i32 = arith.constant 0 : i32
    %c0_i32_0 = arith.constant 0 : i32
    %c0_i32_1 = arith.constant 0 : i32
    return %c0_i32, %c0_i32_0 : i32, i32
  }
  func.func @transform_2(%arg0: i32) -> (i32, i32) {
    %c0_i32 = arith.constant 0 : i32
    %c0_i32_0 = arith.constant 0 : i32
    %c0_i32_1 = arith.constant 0 : i32
    return %c0_i32, %c0_i32_0 : i32, i32
  }
  func.func @transform_3(%arg0: i32) -> (i32, i32) {
    %c0_i32 = arith.constant 0 : i32
    %c0_i32_0 = arith.constant 0 : i32
    %c0_i32_1 = arith.constant 0 : i32
    return %c0_i32, %c0_i32_0 : i32, i32
  }
  func.func @transform_4(%arg0: i32) -> (i32, i32) {
    %c0_i32 = arith.constant 0 : i32
    %c0_i32_0 = arith.constant 0 : i32
    %c0_i32_1 = arith.constant 0 : i32
    return %c0_i32, %c0_i32_0 : i32, i32
  }
  func.func @transform_5(%arg0: i32) -> (i32, i32) {
    %c0_i32 = arith.constant 0 : i32
    %c0_i32_0 = arith.constant 0 : i32
    %c0_i32_1 = arith.constant 0 : i32
    return %c0_i32, %c0_i32_0 : i32, i32
  }
  func.func @transform_6(%arg0: i32) -> (i32, i32) {
    %c0_i32 = arith.constant 0 : i32
    %c0_i32_0 = arith.constant 0 : i32
    %c0_i32_1 = arith.constant 0 : i32
    return %c0_i32, %c0_i32_0 : i32, i32
  }
}

</mosaic_0001>

<bundles_post_ra>
// kernel: encoder_forward.6
= control target key start
LH: loop header
LB: loop body
LE: loop exit
PB: predicated region body
PF: predicated region fallthrough
CT: control target
= control target key end

     0   :  { %vm581_vm0 = vcmask 1044480   ;;  %vm582_vm1 = vcmask 1045504   ;;  %v2640_v1 = vmov 65535   ;;  %v2641_v3 = vmov 0   ;;  %s3347_s0 = inlined_call_operand.vmem [shape: bf16[27,6272], index: 0, kind: input, shape index: {}]   ;;  %s3348_s1 = inlined_call_operand.vmem [shape: bf16[16,27], index: 1, kind: input, shape index: {}]   ;;  %s3349_s2 = inlined_call_operand.vmem [shape: f32[16,1], index: 2, kind: input, shape index: {}]   ;;  %s3350_s3 = inlined_call_operand.vmem [shape: bf16[16,6272], index: 3, kind: output, shape index: {}]  }
   0x1   :  { %v2493_v0 = vld [vmem:[%s3347_s0 + $0x4] ss:$196 sps:$4 sm:$0xff]   ;;  %v583_v2 = vsel %vm581_vm0, 4294967295, %v2640_v1  ;;  %764 = vmatprep.mubr.bf16.mxu0 %v2641_v3  ;;  %807 = vmatprep.mubr.bf16.mxu1 %v2641_v3  ;;  %v2496_v6 = vld [vmem:[%s3347_s0 + $0x18c] ss:$196 sps:$4 sm:$0x3f]  }
   0x2   :  { %v2495_v4 = vld [vmem:[%s3347_s0] ss:$196 sps:$4 sm:$0xff]   ;;  %v2672_v5 = vsel %vm582_vm1, %v583_v2, 0  ;;  %2492 = vset.pattern.permute.xlu0 %v2641_v3  ;;  %732 = vmatprep.subr.bf16.mxu0 %v2493_v0  ;;  %v2498_v7 = vld [vmem:[%s3347_s0 + $0xc] ss:$196 sps:$4 sm:$0xff]   ;;  %vm577_vm2 = vcmask 220160  }
   0x3   :  { %733 = vmatpush1.bf16.msra.mxu0 %v2495_v4  ;;  %v2500_v8 = vld [vmem:[%s3347_s0 + $0x188] ss:$196 sps:$4 sm:$0x3f]   ;;  %v589_v9 = vand.u32 %v2496_v6, %v2672_v5  ;;  %v2691_v11 = vld [vmem:[%s3348_s1] sm:$0xff]   ;;  %775 = vmatprep.subr.bf16.mxu1 %v2498_v7  ;;  %v2505_v14 = vld [vmem:[%s3347_s0 + $0x10] ss:$196 sps:$4 sm:$0xff]  }
   0x4   :  { %v2501_v10 = vld [vmem:[%s3347_s0 + $0x8] ss:$196 sps:$4 sm:$0xff]   ;;  %v586_v12 = vand.u32 %v2500_v8, %v2672_v5  ;;  %v2503_v13 = vld [vmem:[%s3347_s0 + $0x194] ss:$196 sps:$4 sm:$0x3f]   ;;  %vm2643_vm3 = vmmov 0  }
   0x5   :  { %734 = vmatprep.subr.bf16.mxu0 %v589_v9  ;;  %776 = vmatpush1.bf16.msra.mxu1 %v2501_v10  ;;  %v595_v15 = vand.u32 %v2503_v13, %v2672_v5  ;;  %v2507_v16 = vld [vmem:[%s3347_s0 + $0x14] ss:$196 sps:$4 sm:$0xff]   ;;  %v2511_v20 = vld [vmem:[%s3347_s0 + $0x19c] ss:$196 sps:$4 sm:$0x3f]  }
   0x6   :  { %v2508_v17 = vld [vmem:[%s3347_s0 + $0x190] ss:$196 sps:$4 sm:$0x3f]   ;;  %v2509_v18 = vld [vmem:[%s3347_s0 + $0x198] ss:$196 sps:$4 sm:$0x3f]   ;;  %v601_v23 = vand.u32 %v2511_v20, %v2672_v5 }
   0x7   :  { %735 = vmatpush1.bf16.msra.mxu0 %v586_v12  ;;  %777 = vmatprep.subr.bf16.mxu1 %v595_v15  ;;  %v592_v19 = vand.u32 %v2508_v17, %v2672_v5  ;;  %v2512_v21 = vld [vmem:[%s3347_s0 + $0x18] ss:$196 sps:$4 sm:$0xff]   ;;  %v598_v24 = vand.u32 %v2509_v18, %v2672_v5  ;;  %v2515_v25 = vld [vmem:[%s3347_s0 + $0x1a0] ss:$196 sps:$4 sm:$0x3f]  }
   0x8   :  { %818 = vmatprep.subr.bf16.mxu0 %v2507_v16  ;;  %v2514_v22 = vld [vmem:[%s3347_s0 + $0x1c] ss:$196 sps:$4 sm:$0xff]   ;;  %v2517_v26 = vld [vmem:[%s3347_s0 + $0x1a4] ss:$196 sps:$4 sm:$0x3f]   ;;  %v604_v31 = vand.u32 %v2515_v25, %v2672_v5 }
   0x9   :  { %778 = vmatpush1.bf16.msra.mxu1 %v592_v19  ;;  %v607_v27 = vand.u32 %v2517_v26, %v2672_v5  ;;  %v2520_v28 = vld [vmem:[%s3347_s0 + $0x24] ss:$196 sps:$4 sm:$0xff]   ;;  %v2523_v30 = vld [vmem:[%s3347_s0 + $0x1ac] ss:$196 sps:$4 sm:$0x3f]  }
   0xa   :  { %2352 = vmatmul.mubr.msk.bf16.vlgmr.msra.gmra.mrb[0].mxu0 %vm577_vm2, %v2691_v11  ;;  %861 = vmatprep.subr.bf16.mxu1 %v2514_v22  ;;  %v2518_v29 = vld [vmem:[%s3347_s0 + $0x20] ss:$196 sps:$4 sm:$0xff]   ;;  %v2521_v32 = vld [vmem:[%s3347_s0 + $0x1a8] ss:$196 sps:$4 sm:$0x3f]   ;;  %v613_v33 = vand.u32 %v2523_v30, %v2672_v5 }
   0xb   :  { %819 = vmatpush1.bf16.msra.mxu0 %v2505_v14  ;;  %850 = vmatprep.mubr.bf16.mxu0 %v2641_v3  ;;  %v2526_v34 = vld [vmem:[%s3347_s0 + $0x2c] ss:$196 sps:$4 sm:$0xff]   ;;  %v2529_v35 = vld [vmem:[%s3347_s0 + $0x1b4] ss:$196 sps:$4 sm:$0x3f]   ;;  %v610_v37 = vand.u32 %v2521_v32, %v2672_v5 }
   0xc   :  { %820 = vmatprep.subr.bf16.mxu0 %v601_v23  ;;  %2353 = vmatmul.mubr.msk.bf16.vlgmr.msra.gmra.mrb[0].mxu1 %vm577_vm2, %v2691_v11  ;;  %v2524_v36 = vld [vmem:[%s3347_s0 + $0x28] ss:$196 sps:$4 sm:$0xff]   ;;  %v2527_v38 = vld [vmem:[%s3347_s0 + $0x1b0] ss:$196 sps:$4 sm:$0x3f]   ;;  %v619_v39 = vand.u32 %v2529_v35, %v2672_v5 }
   0xd   :  { %862 = vmatpush1.bf16.msra.mxu1 %v2512_v21  ;;  %893 = vmatprep.mubr.bf16.mxu1 %v2641_v3  ;;  %v2532_v40 = vld [vmem:[%s3347_s0 + $0x34] ss:$196 sps:$4 sm:$0xff]   ;;  %v2535_v41 = vld [vmem:[%s3347_s0 + $0x1bc] ss:$196 sps:$4 sm:$0x3f]   ;;  %v616_v43 = vand.u32 %v2527_v38, %v2672_v5 }
   0xe   :  { %863 = vmatprep.subr.bf16.mxu1 %v607_v27  ;;  %v2530_v42 = vld [vmem:[%s3347_s0 + $0x30] ss:$196 sps:$4 sm:$0xff]   ;;  %v2533_v44 = vld [vmem:[%s3347_s0 + $0x1b8] ss:$196 sps:$4 sm:$0x3f]   ;;  %v625_v46 = vand.u32 %v2535_v41, %v2672_v5 }
   0xf   :  { %821 = vmatpush1.bf16.msra.mxu0 %v598_v24  ;;  %v2538_v45 = vld [vmem:[%s3347_s0 + $0x3c] ss:$196 sps:$4 sm:$0xff]   ;;  %v2541_v47 = vld [vmem:[%s3347_s0 + $0x1c4] ss:$196 sps:$4 sm:$0x3f]   ;;  %v622_v50 = vand.u32 %v2533_v44, %v2672_v5 }
  0x10   :  { %904 = vmatprep.subr.bf16.mxu0 %v2520_v28  ;;  %v2536_v48 = vld [vmem:[%s3347_s0 + $0x38] ss:$196 sps:$4 sm:$0xff]   ;;  %v2539_v49 = vld [vmem:[%s3347_s0 + $0x1c0] ss:$196 sps:$4 sm:$0x3f]   ;;  %v631_v52 = vand.u32 %v2541_v47, %v2672_v5 }
  0x11   :  { %864 = vmatpush1.bf16.msra.mxu1 %v604_v31  ;;  %v2544_v51 = vld [vmem:[%s3347_s0 + $0x44] ss:$196 sps:$4 sm:$0xff]   ;;  %v2547_v53 = vld [vmem:[%s3347_s0 + $0x1cc] ss:$196 sps:$4 sm:$0x3f]   ;;  %v628_v55 = vand.u32 %v2539_v49, %v2672_v5 }
  0x12   :  { %2354 = vmatmul.mubr.msk.bf16.vlgmr.msra.gmra.mrb[4].mxu0 %vm577_vm2, %v2691_v11  ;;  %947 = vmatprep.subr.bf16.mxu1 %v2526_v34  ;;  %v2542_v54 = vld [vmem:[%s3347_s0 + $0x40] ss:$196 sps:$4 sm:$0xff]   ;;  %v2545_v56 = vld [vmem:[%s3347_s0 + $0x1c8] ss:$196 sps:$4 sm:$0x3f]   ;;  %v637_v57 = vand.u32 %v2547_v53, %v2672_v5 }
  0x13   :  { %905 = vmatpush1.bf16.msra.mxu0 %v2518_v29  ;;  %936 = vmatprep.mubr.bf16.mxu0 %v2641_v3  ;;  %v2550_v58 = vld [vmem:[%s3347_s0 + $0x4c] ss:$196 sps:$4 sm:$0xff]   ;;  %v2553_v59 = vld [vmem:[%s3347_s0 + $0x1d4] ss:$196 sps:$4 sm:$0x3f]   ;;  %v634_v61 = vand.u32 %v2545_v56, %v2672_v5 }
  0x14   :  { %906 = vmatprep.subr.bf16.mxu0 %v613_v33  ;;  %2355 = vmatmul.mubr.msk.bf16.vlgmr.msra.gmra.mrb[4].mxu1 %vm577_vm2, %v2691_v11  ;;  %v2548_v60 = vld [vmem:[%s3347_s0 + $0x48] ss:$196 sps:$4 sm:$0xff]   ;;  %v2551_v62 = vld [vmem:[%s3347_s0 + $0x1d0] ss:$196 sps:$4 sm:$0x3f]   ;;  %v643_v0 = vand.u32 %v2553_v59, %v2672_v5 }
  0x15   :  { %948 = vmatpush1.bf16.msra.mxu1 %v2524_v36  ;;  %979 = vmatprep.mubr.bf16.mxu1 %v2641_v3  ;;  %v2556_v63 = vld [vmem:[%s3347_s0 + $0x54] ss:$196 sps:$4 sm:$0xff]   ;;  %v2559_v1 = vld [vmem:[%s3347_s0 + $0x1dc] ss:$196 sps:$4 sm:$0x3f]   ;;  %v640_v6 = vand.u32 %v2551_v62, %v2672_v5 }
  0x16   :  { %949 = vmatprep.subr.bf16.mxu1 %v619_v39  ;;  %v2554_v2 = vld [vmem:[%s3347_s0 + $0x50] ss:$196 sps:$4 sm:$0xff]   ;;  %v2557_v4 = vld [vmem:[%s3347_s0 + $0x1d8] ss:$196 sps:$4 sm:$0x3f]   ;;  %v649_v8 = vand.u32 %v2559_v1, %v2672_v5 }
  0x17   :  { %907 = vmatpush1.bf16.msra.mxu0 %v610_v37  ;;  %v2562_v7 = vld [vmem:[%s3347_s0 + $0x5c] ss:$196 sps:$4 sm:$0xff]   ;;  %v2565_v9 = vld [vmem:[%s3347_s0 + $0x1e4] ss:$196 sps:$4 sm:$0x3f]   ;;  %v646_v12 = vand.u32 %v2557_v4, %v2672_v5 }
  0x18   :  { %990 = vmatprep.subr.bf16.mxu0 %v2532_v40  ;;  %v2560_v10 = vld [vmem:[%s3347_s0 + $0x58] ss:$196 sps:$4 sm:$0xff]   ;;  %v2563_v13 = vld [vmem:[%s3347_s0 + $0x1e0] ss:$196 sps:$4 sm:$0x3f]   ;;  %v655_v14 = vand.u32 %v2565_v9, %v2672_v5 }
  0x19   :  { %950 = vmatpush1.bf16.msra.mxu1 %v616_v43  ;;  %v2568_v15 = vld [vmem:[%s3347_s0 + $0x64] ss:$196 sps:$4 sm:$0xff]   ;;  %v2571_v16 = vld [vmem:[%s3347_s0 + $0x1ec] ss:$196 sps:$4 sm:$0x3f]   ;;  %v652_v18 = vand.u32 %v2563_v13, %v2672_v5 }
  0x1a   :  { %2356 = vmatmul.mubr.msk.bf16.vlgmr.msra.gmra.mrb[8].mxu0 %vm577_vm2, %v2691_v11  ;;  %1033 = vmatprep.subr.bf16.mxu1 %v2538_v45  ;;  %v2566_v17 = vld [vmem:[%s3347_s0 + $0x60] ss:$196 sps:$4 sm:$0xff]   ;;  %v2569_v19 = vld [vmem:[%s3347_s0 + $0x1e8] ss:$196 sps:$4 sm:$0x3f]   ;;  %v661_v21 = vand.u32 %v2571_v16, %v2672_v5 }
  0x1b   :  { %991 = vmatpush1.bf16.msra.mxu0 %v2530_v42  ;;  %1022 = vmatprep.mubr.bf16.mxu0 %v2641_v3  ;;  %v2574_v20 = vld [vmem:[%s3347_s0 + $0x6c] ss:$196 sps:$4 sm:$0xff]   ;;  %v2577_v22 = vld [vmem:[%s3347_s0 + $0x1f4] ss:$196 sps:$4 sm:$0x3f]   ;;  %v658_v25 = vand.u32 %v2569_v19, %v2672_v5 }
  0x1c   :  { %992 = vmatprep.subr.bf16.mxu0 %v625_v46  ;;  %2357 = vmatmul.mubr.msk.bf16.vlgmr.msra.gmra.mrb[8].mxu1 %vm577_vm2, %v2691_v11  ;;  %v2572_v23 = vld [vmem:[%s3347_s0 + $0x68] ss:$196 sps:$4 sm:$0xff]   ;;  %v2575_v24 = vld [vmem:[%s3347_s0 + $0x1f0] ss:$196 sps:$4 sm:$0x3f]   ;;  %v667_v27 = vand.u32 %v2577_v22, %v2672_v5 }
  0x1d   :  { %1034 = vmatpush1.bf16.msra.mxu1 %v2536_v48  ;;  %1065 = vmatprep.mubr.bf16.mxu1 %v2641_v3  ;;  %v2580_v26 = vld [vmem:[%s3347_s0 + $0x74] ss:$196 sps:$4 sm:$0xff]   ;;  %v2583_v28 = vld [vmem:[%s3347_s0 + $0x1fc] ss:$196 sps:$4 sm:$0x3f]   ;;  %v664_v30 = vand.u32 %v2575_v24, %v2672_v5 }
  0x1e   :  { %1035 = vmatprep.subr.bf16.mxu1 %v631_v52  ;;  %v2578_v29 = vld [vmem:[%s3347_s0 + $0x70] ss:$196 sps:$4 sm:$0xff]   ;;  %v2581_v31 = vld [vmem:[%s3347_s0 + $0x1f8] ss:$196 sps:$4 sm:$0x3f]   ;;  %v673_v32 = vand.u32 %v2583_v28, %v2672_v5 }
  0x1f   :  { %993 = vmatpush1.bf16.msra.mxu0 %v622_v50  ;;  %v2586_v33 = vld [vmem:[%s3347_s0 + $0x7c] ss:$196 sps:$4 sm:$0xff]   ;;  %v2589_v34 = vld [vmem:[%s3347_s0 + $0x204] ss:$196 sps:$4 sm:$0x3f]   ;;  %v670_v36 = vand.u32 %v2581_v31, %v2672_v5  ;;  %v2642_v31 = vmov 0.0  }
  0x20   :  { %1076 = vmatprep.subr.bf16.mxu0 %v2544_v51  ;;  %v2584_v35 = vld [vmem:[%s3347_s0 + $0x78] ss:$196 sps:$4 sm:$0xff]   ;;  %v2587_v37 = vld [vmem:[%s3347_s0 + $0x200] ss:$196 sps:$4 sm:$0x3f]   ;;  %v679_v39 = vand.u32 %v2589_v34, %v2672_v5 }
  0x21   :  { %1036 = vmatpush1.bf16.msra.mxu1 %v628_v55  ;;  %v2592_v38 = vld [vmem:[%s3347_s0 + $0x84] ss:$196 sps:$4 sm:$0xff]   ;;  %v2595_v40 = vld [vmem:[%s3347_s0 + $0x20c] ss:$196 sps:$4 sm:$0x3f]   ;;  %v676_v43 = vand.u32 %v2587_v37, %v2672_v5 }
  0x22   :  { %2358 = vmatmul.mubr.msk.bf16.vlgmr.msra.gmra.mrb[12].mxu0 %vm577_vm2, %v2691_v11  ;;  %1119 = vmatprep.subr.bf16.mxu1 %v2550_v58  ;;  %v2590_v41 = vld [vmem:[%s3347_s0 + $0x80] ss:$196 sps:$4 sm:$0xff]   ;;  %v2593_v42 = vld [vmem:[%s3347_s0 + $0x208] ss:$196 sps:$4 sm:$0x3f]   ;;  %v685_v45 = vand.u32 %v2595_v40, %v2672_v5 }
  0x23   :  { %1077 = vmatpush1.bf16.msra.mxu0 %v2542_v54  ;;  %1108 = vmatprep.mubr.bf16.mxu0 %v2641_v3  ;;  %v2598_v44 = vld [vmem:[%s3347_s0 + $0x8c] ss:$196 sps:$4 sm:$0xff]   ;;  %v2601_v46 = vld [vmem:[%s3347_s0 + $0x214] ss:$196 sps:$4 sm:$0x3f]   ;;  %v682_v49 = vand.u32 %v2593_v42, %v2672_v5  ;;  %v117_v51 = vld [vmem:[%s3349_s2] sm:$0xff] }
  0x24   :  { %1078 = vmatprep.subr.bf16.mxu0 %v637_v57  ;;  %2359 = vmatmul.mubr.msk.bf16.vlgmr.msra.gmra.mrb[12].mxu1 %vm577_vm2, %v2691_v11  ;;  %v2596_v47 = vld [vmem:[%s3347_s0 + $0x88] ss:$196 sps:$4 sm:$0xff]   ;;  %v2599_v48 = vld [vmem:[%s3347_s0 + $0x210] ss:$196 sps:$4 sm:$0x3f]   ;;  %v691_v52 = vand.u32 %v2601_v46, %v2672_v5 }
  0x25   :  { %1120 = vmatpush1.bf16.msra.mxu1 %v2548_v60  ;;  %1151 = vmatprep.mubr.bf16.mxu1 %v2641_v3  ;;  %v2604_v50 = vld [vmem:[%s3347_s0 + $0x94] ss:$196 sps:$4 sm:$0xff]   ;;  %v2607_v53 = vld [vmem:[%s3347_s0 + $0x21c] ss:$196 sps:$4 sm:$0x3f]   ;;  %v118_v55 = vld [vmem:[%s3349_s2 + $0x8] sm:$0xff]  ;;  %v688_v57 = vand.u32 %v2599_v48, %v2672_v5 }
  0x26   :  { %1121 = vmatprep.subr.bf16.mxu1 %v643_v0  ;;  %121 = vperm.xlu0 %2492, %v117_v51   ;;  %v2605_v54 = vld [vmem:[%s3347_s0 + $0x218] ss:$196 sps:$4 sm:$0x3f]   ;;  %v2602_v56 = vld [vmem:[%s3347_s0 + $0x90] ss:$196 sps:$4 sm:$0xff]   ;;  %v697_v59 = vand.u32 %v2607_v53, %v2672_v5 }
  0x27   :  { %1079 = vmatpush1.bf16.msra.mxu0 %v634_v61  ;;  %v2610_v58 = vld [vmem:[%s3347_s0 + $0x9c] ss:$196 sps:$4 sm:$0xff]   ;;  %v2613_v60 = vld [vmem:[%s3347_s0 + $0x224] ss:$196 sps:$4 sm:$0x3f]   ;;  %v694_v62 = vand.u32 %v2605_v54, %v2672_v5 }
  0x28   :  { %1162 = vmatprep.subr.bf16.mxu0 %v2556_v63  ;;  %v2608_v61 = vld [vmem:[%s3347_s0 + $0x98] ss:$196 sps:$4 sm:$0xff]   ;;  %v2611_v63 = vld [vmem:[%s3347_s0 + $0x220] ss:$196 sps:$4 sm:$0x3f]   ;;  %v703_v0 = vand.u32 %v2613_v60, %v2672_v5 }
  0x29   :  { %1122 = vmatpush1.bf16.msra.mxu1 %v640_v6  ;;  %v2616_v1 = vld [vmem:[%s3347_s0 + $0xa4] ss:$196 sps:$4 sm:$0xff]   ;;  %v700_v6 = vand.u32 %v2611_v63, %v2672_v5  ;;  %v2622_v9 = vld [vmem:[%s3347_s0 + $0xac] ss:$196 sps:$4 sm:$0xff]   ;;  %v2628_v16 = vld [vmem:[%s3347_s0 + $0xb4] ss:$196 sps:$4 sm:$0xff]  }
  0x2a   :  { %2360 = vmatmul.mubr.msk.bf16.vlgmr.msra.gmra.mrb[16].mxu0 %vm577_vm2, %v2691_v11  ;;  %1205 = vmatprep.subr.bf16.mxu1 %v2562_v7  ;;  %v2614_v4 = vld [vmem:[%s3347_s0 + $0xa0] ss:$196 sps:$4 sm:$0xff]   ;;  %v2617_v7 = vld [vmem:[%s3347_s0 + $0x228] ss:$196 sps:$4 sm:$0x3f]  }
  0x2b   :  { %1163 = vmatpush1.bf16.msra.mxu0 %v2554_v2  ;;  %1194 = vmatprep.mubr.bf16.mxu0 %v2641_v3  ;;  %v2619_v2 = vld [vmem:[%s3347_s0 + $0x22c] ss:$196 sps:$4 sm:$0x3f]   ;;  %v706_v13 = vand.u32 %v2617_v7, %v2672_v5  ;;  %v2634_v22 = vld [vmem:[%s3347_s0 + $0xbc] ss:$196 sps:$4 sm:$0xff]  }
  0x2c   :  { %1164 = vmatprep.subr.bf16.mxu0 %v649_v8  ;;  %2361 = vmatmul.mubr.msk.bf16.vlgmr.msra.gmra.mrb[16].mxu1 %vm577_vm2, %v2691_v11  ;;  %v709_v8 = vand.u32 %v2619_v2, %v2672_v5  ;;  %v2632_v24 = vld [vmem:[%s3347_s0 + $0xb8] ss:$196 sps:$4 sm:$0xff]  }
  0x2d   :  { %1206 = vmatpush1.bf16.msra.mxu1 %v2560_v10  ;;  %1237 = vmatprep.mubr.bf16.mxu1 %v2641_v3  ;;  %v2625_v10 = vld [vmem:[%s3347_s0 + $0x234] ss:$196 sps:$4 sm:$0x3f]  }
  0x2e   :  { %1207 = vmatprep.subr.bf16.mxu1 %v655_v14  ;;  %126 = vperm.xlu0 %2492, %v118_v55   ;;  %v2623_v14 = vld [vmem:[%s3347_s0 + $0x230] ss:$196 sps:$4 sm:$0x3f]  }
  0x2f   :  { %1165 = vmatpush1.bf16.msra.mxu0 %v646_v12  ;;  %v2620_v12 = vld [vmem:[%s3347_s0 + $0xa8] ss:$196 sps:$4 sm:$0xff]   ;;  %v712_v19 = vand.u32 %v2623_v14, %v2672_v5 }
  0x30   :  { %1248 = vmatprep.subr.bf16.mxu0 %v2568_v15  ;;  %v715_v15 = vand.u32 %v2625_v10, %v2672_v5 }
  0x31   :  { %1208 = vmatpush1.bf16.msra.mxu1 %v652_v18  ;;  %v2626_v18 = vld [vmem:[%s3347_s0 + $0xb0] ss:$196 sps:$4 sm:$0xff]  }
  0x32   :  { %2362 = vmatmul.mubr.msk.bf16.vlgmr.msra.gmra.mrb[20].mxu0 %vm577_vm2, %v2691_v11  ;;  %1291 = vmatprep.subr.bf16.mxu1 %v2574_v20  ;;  %v2629_v20 = vld [vmem:[%s3347_s0 + $0x238] ss:$196 sps:$4 sm:$0x3f]  }
  0x33   :  { %1249 = vmatpush1.bf16.msra.mxu0 %v2566_v17  ;;  %1280 = vmatprep.mubr.bf16.mxu0 %v2641_v3  ;;  %v2631_v17 = vld [vmem:[%s3347_s0 + $0x23c] ss:$196 sps:$4 sm:$0x3f]  }
  0x34   :  { %1250 = vmatprep.subr.bf16.mxu0 %v661_v21  ;;  %2363 = vmatmul.mubr.msk.bf16.vlgmr.msra.gmra.mrb[20].mxu1 %vm577_vm2, %v2691_v11  ;;  %v721_v21 = vand.u32 %v2631_v17, %v2672_v5 }
  0x35   :  { %1292 = vmatpush1.bf16.msra.mxu1 %v2572_v23  ;;  %1323 = vmatprep.mubr.bf16.mxu1 %v2641_v3  ;;  %v2637_v23 = vld [vmem:[%s3347_s0 + $0x244] ss:$196 sps:$4 sm:$0x3f]  }
  0x36   :  { %1293 = vmatprep.subr.bf16.mxu1 %v667_v27  ;;  %v727_v27 = vand.u32 %v2637_v23, %v2672_v5 }
  0x37   :  { %1251 = vmatpush1.bf16.msra.mxu0 %v658_v25  ;;  %v718_v25 = vand.u32 %v2629_v20, %v2672_v5 }
  0x38   :  { %1334 = vmatprep.subr.bf16.mxu0 %v2580_v26  ;;  %v2635_v26 = vld [vmem:[%s3347_s0 + $0x240] ss:$196 sps:$4 sm:$0x3f]  }
  0x39   :  { %1294 = vmatpush1.bf16.msra.mxu1 %v664_v30  ;;  %v724_v28 = vand.u32 %v2635_v26, %v2672_v5  ;;  %v2639_v30 = vld [vmem:[%s3347_s0 + $0x248] ss:$196 sps:$4 sm:$0x3f]  }
  0x3a   :  { %2364 = vmatmul.mubr.msk.bf16.vlgmr.msra.gmra.mrb[24].mxu0 %vm577_vm2, %v2691_v11  ;;  %1377 = vmatprep.subr.bf16.mxu1 %v2586_v33 }
  0x3b   :  { %1335 = vmatpush1.bf16.msra.mxu0 %v2578_v29  ;;  %1366 = vmatprep.mubr.bf16.mxu0 %v2641_v3  ;;  %v2638_v29 = vld [vmem:[%s3347_s0 + $0xc0] ss:$196 sps:$4 sm:$0xff]  }
  0x3c   :  { %1336 = vmatprep.subr.bf16.mxu0 %v673_v32  ;;  %2365 = vmatmul.mubr.msk.bf16.vlgmr.msra.gmra.mrb[24].mxu1 %vm577_vm2, %v2691_v11  ;;  %v730_v32 = vand.u32 %v2639_v30, %v2672_v5 }
  0x3d   :  { %1378 = vmatpush1.bf16.msra.mxu1 %v2584_v35  ;;  %1409 = vmatprep.mubr.bf16.mxu1 %v2641_v3 }
  0x3e   :  { %1379 = vmatprep.subr.bf16.mxu1 %v679_v39 }
  0x3f   :  { %1337 = vmatpush1.bf16.msra.mxu0 %v670_v36 }
  0x40   :  { %1420 = vmatprep.subr.bf16.mxu0 %v2592_v38 }
  0x41   :  { %1380 = vmatpush1.bf16.msra.mxu1 %v676_v43 }
  0x42   :  { %2366 = vmatmul.mubr.msk.bf16.vlgmr.msra.gmra.mrb[28].mxu0 %vm577_vm2, %v2691_v11  ;;  %1463 = vmatprep.subr.bf16.mxu1 %v2598_v44 }
  0x43   :  { %1421 = vmatpush1.bf16.msra.mxu0 %v2590_v41  ;;  %1452 = vmatprep.mubr.bf16.mxu0 %v2641_v3 }
  0x44   :  { %1422 = vmatprep.subr.bf16.mxu0 %v685_v45  ;;  %2367 = vmatmul.mubr.msk.bf16.vlgmr.msra.gmra.mrb[28].mxu1 %vm577_vm2, %v2691_v11 }
  0x45   :  { %1464 = vmatpush1.bf16.msra.mxu1 %v2596_v47  ;;  %1495 = vmatprep.mubr.bf16.mxu1 %v2641_v3 }
  0x46   :  { %1465 = vmatprep.subr.bf16.mxu1 %v691_v52 }
  0x47   :  { %1423 = vmatpush1.bf16.msra.mxu0 %v682_v49 }
  0x48   :  { %1506 = vmatprep.subr.bf16.mxu0 %v2604_v50 }
  0x49   :  { %1466 = vmatpush1.bf16.msra.mxu1 %v688_v57 }
  0x4a   :  { %2368 = vmatmul.mubr.msk.bf16.vlgmr.msra.gmra.mrb[32].mxu0 %vm577_vm2, %v2691_v11  ;;  %1549 = vmatprep.subr.bf16.mxu1 %v2610_v58 }
  0x4b   :  { %1507 = vmatpush1.bf16.msra.mxu0 %v2602_v56  ;;  %1538 = vmatprep.mubr.bf16.mxu0 %v2641_v3 }
  0x4c   :  { %1508 = vmatprep.subr.bf16.mxu0 %v697_v59  ;;  %2369 = vmatmul.mubr.msk.bf16.vlgmr.msra.gmra.mrb[32].mxu1 %vm577_vm2, %v2691_v11 }
  0x4d   :  { %1550 = vmatpush1.bf16.msra.mxu1 %v2608_v61  ;;  %1581 = vmatprep.mubr.bf16.mxu1 %v2641_v3 }
  0x4e   :  { %1551 = vmatprep.subr.bf16.mxu1 %v703_v0 }
  0x4f   :  { %1509 = vmatpush1.bf16.msra.mxu0 %v694_v62 }
  0x50   :  { %1592 = vmatprep.subr.bf16.mxu0 %v2616_v1 }
  0x51   :  { %1552 = vmatpush1.bf16.msra.mxu1 %v700_v6 }
  0x52   :  { %2370 = vmatmul.mubr.msk.bf16.vlgmr.msra.gmra.mrb[36].mxu0 %vm577_vm2, %v2691_v11  ;;  %1635 = vmatprep.subr.bf16.mxu1 %v2622_v9 }
  0x53   :  { %1593 = vmatpush1.bf16.msra.mxu0 %v2614_v4  ;;  %1624 = vmatprep.mubr.bf16.mxu0 %v2641_v3 }
  0x54   :  { %1594 = vmatprep.subr.bf16.mxu0 %v709_v8  ;;  %2371 = vmatmul.mubr.msk.bf16.vlgmr.msra.gmra.mrb[36].mxu1 %vm577_vm2, %v2691_v11 }
  0x55   :  { %1636 = vmatpush1.bf16.msra.mxu1 %v2620_v12  ;;  %1667 = vmatprep.mubr.bf16.mxu1 %v2641_v3 }
  0x56   :  { %1637 = vmatprep.subr.bf16.mxu1 %v715_v15 }
  0x57   :  { %1595 = vmatpush1.bf16.msra.mxu0 %v706_v13 }
  0x58   :  { %1678 = vmatprep.subr.bf16.mxu0 %v2628_v16 }
  0x59   :  { %1638 = vmatpush1.bf16.msra.mxu1 %v712_v19 }
  0x5a   :  { %2372 = vmatmul.mubr.msk.bf16.vlgmr.msra.gmra.mrb[40].mxu0 %vm577_vm2, %v2691_v11  ;;  %1721 = vmatprep.subr.bf16.mxu1 %v2634_v22 }
  0x5b   :  { %1679 = vmatpush1.bf16.msra.mxu0 %v2626_v18  ;;  %1710 = vmatprep.mubr.bf16.mxu0 %v2641_v3 }
  0x5c   :  { %1680 = vmatprep.subr.bf16.mxu0 %v721_v21  ;;  %2373 = vmatmul.mubr.msk.bf16.vlgmr.msra.gmra.mrb[40].mxu1 %vm577_vm2, %v2691_v11 }
  0x5d   :  { %1722 = vmatpush1.bf16.msra.mxu1 %v2632_v24  ;;  %1753 = vmatprep.mubr.bf16.mxu1 %v2641_v3 }
  0x5e   :  { %1723 = vmatprep.subr.bf16.mxu1 %v727_v27 }
  0x5f   :  { %1681 = vmatpush1.bf16.msra.mxu0 %v718_v25 }
  0x60   :  { %2480 = vmatprep.subr.bf16.mxu0 %v2642_v31 }
  0x61   :  { %1724 = vmatpush1.bf16.msra.mxu1 %v724_v28 }
  0x62   :  { %2374 = vmatmul.mubr.msk.bf16.vlgmr.msra.gmra.mrb[44].mxu0 %vm577_vm2, %v2691_v11 }
  0x63   :  { %2481 = vmatpush3.bf16.msra.mxu0 %v2638_v29  ;;  %2484 = vmatprep.mubr.msk.bf16.mxu0 %vm2643_vm3, %v2642_v31 }
  0x64   :  { %2482 = vmatprep.subr.bf16.mxu0 %v2642_v31  ;;  %2375 = vmatmul.mubr.msk.bf16.vlgmr.msra.gmra.mrb[44].mxu1 %vm577_vm2, %v2691_v11 }
  0x67   :  { %2483 = vmatpush3.bf16.msra.mxu0 %v730_v32 }
  0x6a   :  { %2485 = vmatmul.mubr.msk.bf16.vlgmr.msra.gmra.mrb[48].mxu0 %vm577_vm2, %v2691_v11 }
  0xa5   :  { %v3095_v33 = vpop.permute.xlu0 %121 }
  0xad   :  { %v3097_v34 = vpop.permute.xlu0 %126 }
  0xdd   :  { %v766_v3 = vpop.f32.mrb[0].mxu0 }
  0xde   :  { %v767_v35 = vadd.f32 %v766_v3, %v3095_v33  ;;  %v768_v36 = vpop.f32.mrb[1].mxu0 }
  0xdf   :  { %v769_v5 = vadd.f32 %v768_v36, %v3095_v33  ;;  %v770_v37 = vpop.f32.mrb[2].mxu0  ;;  %v809_v43 = vpop.f32.mrb[0].mxu1 }
  0xe0   :  { %v1805_v38 = vmax.f32 %v767_v35, 0.0  ;;  %v771_v39 = vadd.f32 %v770_v37, %v3097_v34  ;;  %v772_v40 = vpop.f32.mrb[3].mxu0  ;;  %v810_v44 = vadd.f32 %v809_v43, %v3095_v33  ;;  %v811_v45 = vpop.f32.mrb[1].mxu1 }
  0xe1   :  { %v1806_v41 = vmax.f32 %v769_v5, 0.0  ;;  %v773_v42 = vadd.f32 %v772_v40, %v3097_v34  ;;  %v812_v48 = vadd.f32 %v811_v45, %v3095_v33  ;;  %v813_v49 = vpop.f32.mrb[2].mxu1 }
  0xe2   :  { %v1854_v11 = vmax.f32 %v771_v39, 0.0  ;;  %v1807_v50 = vmax.f32 %v810_v44, 0.0  ;;  %v814_v51 = vadd.f32 %v813_v49, %v3097_v34  ;;  %v815_v52 = vpop.f32.mrb[3].mxu1 }
  0xe3   :  { %v2427_v46 = vpack.c.bf16 %v1806_v41, %v1805_v38  ;;  %v1855_v47 = vmax.f32 %v773_v42, 0.0  ;;  %v1808_v54 = vmax.f32 %v812_v48, 0.0  ;;  %v816_v55 = vadd.f32 %v815_v52, %v3097_v34 }
  0xe4   :  { %v1856_v57 = vmax.f32 %v814_v51, 0.0 }
  0xe5   :  { %2199 = vst [vmem:[%s3350_s3] sm:$0xff] %v2427_v46  ;;  %v2452_v53 = vpack.c.bf16 %v1855_v47, %v1854_v11  ;;  %v852_v56 = vpop.f32.mrb[4].mxu0  ;;  %v2428_v60 = vpack.c.bf16 %v1808_v54, %v1807_v50  ;;  %v1857_v61 = vmax.f32 %v816_v55, 0.0 }
  0xe6   :  { %v853_v58 = vadd.f32 %v852_v56, %v3095_v33  ;;  %v854_v59 = vpop.f32.mrb[5].mxu0 }
  0xe7   :  { %2224 = vst [vmem:[%s3350_s3 + $0xc4] sm:$0xff] %v2452_v53  ;;  %v855_v62 = vadd.f32 %v854_v59, %v3095_v33  ;;  %v856_v63 = vpop.f32.mrb[6].mxu0  ;;  %2200 = vst [vmem:[%s3350_s3 + $0x8] sm:$0xff] %v2428_v60  ;;  %v2453_v4 = vpack.c.bf16 %v1857_v61, %v1856_v57  ;;  %v895_v8 = vpop.f32.mrb[4].mxu1 }
  0xe8   :  { %v1809_v0 = vmax.f32 %v853_v58, 0.0  ;;  %v857_v1 = vadd.f32 %v856_v63, %v3097_v34  ;;  %v858_v2 = vpop.f32.mrb[7].mxu0  ;;  %v896_v10 = vadd.f32 %v895_v8, %v3095_v33  ;;  %v897_v12 = vpop.f32.mrb[5].mxu1 }
  0xe9   :  { %v1810_v6 = vmax.f32 %v855_v62, 0.0  ;;  %v859_v7 = vadd.f32 %v858_v2, %v3097_v34  ;;  %2225 = vst [vmem:[%s3350_s3 + $0xcc] sm:$0xff] %v2453_v4  ;;  %v898_v15 = vadd.f32 %v897_v12, %v3095_v33  ;;  %v899_v16 = vpop.f32.mrb[6].mxu1 }
  0xea   :  { %v1858_v9 = vmax.f32 %v857_v1, 0.0  ;;  %v1811_v17 = vmax.f32 %v896_v10, 0.0  ;;  %v900_v18 = vadd.f32 %v899_v16, %v3097_v34  ;;  %v901_v19 = vpop.f32.mrb[7].mxu1 }
  0xeb   :  { %v2429_v13 = vpack.c.bf16 %v1810_v6, %v1809_v0  ;;  %v1859_v14 = vmax.f32 %v859_v7, 0.0  ;;  %v1812_v21 = vmax.f32 %v898_v15, 0.0  ;;  %v902_v22 = vadd.f32 %v901_v19, %v3097_v34 }
  0xec   :  { %v1860_v24 = vmax.f32 %v900_v18, 0.0 }
  0xed   :  { %2201 = vst [vmem:[%s3350_s3 + $0x10] sm:$0xff] %v2429_v13  ;;  %v2454_v20 = vpack.c.bf16 %v1859_v14, %v1858_v9  ;;  %v938_v23 = vpop.f32.mrb[8].mxu0  ;;  %v2430_v27 = vpack.c.bf16 %v1812_v21, %v1811_v17  ;;  %v1861_v28 = vmax.f32 %v902_v22, 0.0 }
  0xee   :  { %v939_v25 = vadd.f32 %v938_v23, %v3095_v33  ;;  %v940_v26 = vpop.f32.mrb[9].mxu0 }
  0xef   :  { %2226 = vst [vmem:[%s3350_s3 + $0xd4] sm:$0xff] %v2454_v20  ;;  %v941_v29 = vadd.f32 %v940_v26, %v3095_v33  ;;  %v942_v30 = vpop.f32.mrb[10].mxu0  ;;  %2202 = vst [vmem:[%s3350_s3 + $0x18] sm:$0xff] %v2430_v27  ;;  %v2455_v35 = vpack.c.bf16 %v1861_v28, %v1860_v24  ;;  %v981_v37 = vpop.f32.mrb[8].mxu1 }
  0xf0   :  { %v1813_v31 = vmax.f32 %v939_v25, 0.0  ;;  %v943_v32 = vadd.f32 %v942_v30, %v3097_v34  ;;  %v944_v3 = vpop.f32.mrb[11].mxu0  ;;  %v982_v39 = vadd.f32 %v981_v37, %v3095_v33  ;;  %v983_v40 = vpop.f32.mrb[9].mxu1 }
  0xf1   :  { %v1814_v36 = vmax.f32 %v941_v29, 0.0  ;;  %v945_v5 = vadd.f32 %v944_v3, %v3097_v34  ;;  %2227 = vst [vmem:[%s3350_s3 + $0xdc] sm:$0xff] %v2455_v35  ;;  %v984_v43 = vadd.f32 %v983_v40, %v3095_v33  ;;  %v985_v11 = vpop.f32.mrb[10].mxu1 }
  0xf2   :  { %v1862_v38 = vmax.f32 %v943_v32, 0.0  ;;  %v1815_v44 = vmax.f32 %v982_v39, 0.0  ;;  %v986_v45 = vadd.f32 %v985_v11, %v3097_v34  ;;  %v987_v46 = vpop.f32.mrb[11].mxu1 }
  0xf3   :  { %v2431_v41 = vpack.c.bf16 %v1814_v36, %v1813_v31  ;;  %v1863_v42 = vmax.f32 %v945_v5, 0.0  ;;  %v1816_v48 = vmax.f32 %v984_v43, 0.0  ;;  %v988_v49 = vadd.f32 %v987_v46, %v3097_v34 }
  0xf4   :  { %v1864_v51 = vmax.f32 %v986_v45, 0.0 }
  0xf5   :  { %2203 = vst [vmem:[%s3350_s3 + $0x20] sm:$0xff] %v2431_v41  ;;  %v2456_v47 = vpack.c.bf16 %v1863_v42, %v1862_v38  ;;  %v1024_v50 = vpop.f32.mrb[12].mxu0  ;;  %v2432_v54 = vpack.c.bf16 %v1816_v48, %v1815_v44  ;;  %v1865_v55 = vmax.f32 %v988_v49, 0.0 }
  0xf6   :  { %v1025_v52 = vadd.f32 %v1024_v50, %v3095_v33  ;;  %v1026_v53 = vpop.f32.mrb[13].mxu0 }
  0xf7   :  { %2228 = vst [vmem:[%s3350_s3 + $0xe4] sm:$0xff] %v2456_v47  ;;  %v1027_v56 = vadd.f32 %v1026_v53, %v3095_v33  ;;  %v1028_v57 = vpop.f32.mrb[14].mxu0  ;;  %2204 = vst [vmem:[%s3350_s3 + $0x28] sm:$0xff] %v2432_v54  ;;  %v2457_v61 = vpack.c.bf16 %v1865_v55, %v1864_v51  ;;  %v1067_v0 = vpop.f32.mrb[12].mxu1 }
  0xf8   :  { %v1817_v58 = vmax.f32 %v1025_v52, 0.0  ;;  %v1029_v59 = vadd.f32 %v1028_v57, %v3097_v34  ;;  %v1030_v60 = vpop.f32.mrb[15].mxu0  ;;  %v1068_v2 = vadd.f32 %v1067_v0, %v3095_v33  ;;  %v1069_v4 = vpop.f32.mrb[13].mxu1 }
  0xf9   :  { %v1818_v62 = vmax.f32 %v1027_v56, 0.0  ;;  %v1031_v63 = vadd.f32 %v1030_v60, %v3097_v34  ;;  %2229 = vst [vmem:[%s3350_s3 + $0xec] sm:$0xff] %v2457_v61  ;;  %v1070_v8 = vadd.f32 %v1069_v4, %v3095_v33  ;;  %v1071_v9 = vpop.f32.mrb[14].mxu1 }
  0xfa   :  { %v1866_v1 = vmax.f32 %v1029_v59, 0.0  ;;  %v1819_v10 = vmax.f32 %v1068_v2, 0.0  ;;  %v1072_v12 = vadd.f32 %v1071_v9, %v3097_v34  ;;  %v1073_v13 = vpop.f32.mrb[15].mxu1 }
  0xfb   :  { %v2433_v6 = vpack.c.bf16 %v1818_v62, %v1817_v58  ;;  %v1867_v7 = vmax.f32 %v1031_v63, 0.0  ;;  %v1820_v15 = vmax.f32 %v1070_v8, 0.0  ;;  %v1074_v16 = vadd.f32 %v1073_v13, %v3097_v34 }
  0xfc   :  { %v1868_v18 = vmax.f32 %v1072_v12, 0.0 }
  0xfd   :  { %2205 = vst [vmem:[%s3350_s3 + $0x30] sm:$0xff] %v2433_v6  ;;  %v2458_v14 = vpack.c.bf16 %v1867_v7, %v1866_v1  ;;  %v1110_v17 = vpop.f32.mrb[16].mxu0  ;;  %v2434_v21 = vpack.c.bf16 %v1820_v15, %v1819_v10  ;;  %v1869_v22 = vmax.f32 %v1074_v16, 0.0 }
  0xfe   :  { %v1111_v19 = vadd.f32 %v1110_v17, %v3095_v33  ;;  %v1112_v20 = vpop.f32.mrb[17].mxu0 }
  0xff   :  { %2230 = vst [vmem:[%s3350_s3 + $0xf4] sm:$0xff] %v2458_v14  ;;  %v1113_v23 = vadd.f32 %v1112_v20, %v3095_v33  ;;  %v1114_v24 = vpop.f32.mrb[18].mxu0  ;;  %2206 = vst [vmem:[%s3350_s3 + $0x38] sm:$0xff] %v2434_v21  ;;  %v2459_v28 = vpack.c.bf16 %v1869_v22, %v1868_v18  ;;  %v1153_v31 = vpop.f32.mrb[16].mxu1 }
 0x100   :  { %v1821_v25 = vmax.f32 %v1111_v19, 0.0  ;;  %v1115_v26 = vadd.f32 %v1114_v24, %v3097_v34  ;;  %v1116_v27 = vpop.f32.mrb[19].mxu0  ;;  %v1154_v3 = vadd.f32 %v1153_v31, %v3095_v33  ;;  %v1155_v35 = vpop.f32.mrb[17].mxu1 }
 0x101   :  { %v1822_v29 = vmax.f32 %v1113_v23, 0.0  ;;  %v1117_v30 = vadd.f32 %v1116_v27, %v3097_v34  ;;  %2231 = vst [vmem:[%s3350_s3 + $0xfc] sm:$0xff] %v2459_v28  ;;  %v1156_v37 = vadd.f32 %v1155_v35, %v3095_v33  ;;  %v1157_v38 = vpop.f32.mrb[18].mxu1 }
 0x102   :  { %v1870_v32 = vmax.f32 %v1115_v26, 0.0  ;;  %v1823_v39 = vmax.f32 %v1154_v3, 0.0  ;;  %v1158_v40 = vadd.f32 %v1157_v38, %v3097_v34  ;;  %v1159_v41 = vpop.f32.mrb[19].mxu1 }
 0x103   :  { %v2435_v36 = vpack.c.bf16 %v1822_v29, %v1821_v25  ;;  %v1871_v5 = vmax.f32 %v1117_v30, 0.0  ;;  %v1824_v43 = vmax.f32 %v1156_v37, 0.0  ;;  %v1160_v11 = vadd.f32 %v1159_v41, %v3097_v34 }
 0x104   :  { %v1872_v45 = vmax.f32 %v1158_v40, 0.0 }
 0x105   :  { %2207 = vst [vmem:[%s3350_s3 + $0x40] sm:$0xff] %v2435_v36  ;;  %v2460_v42 = vpack.c.bf16 %v1871_v5, %v1870_v32  ;;  %v1196_v44 = vpop.f32.mrb[20].mxu0  ;;  %v2436_v48 = vpack.c.bf16 %v1824_v43, %v1823_v39  ;;  %v1873_v49 = vmax.f32 %v1160_v11, 0.0 }
 0x106   :  { %v1197_v46 = vadd.f32 %v1196_v44, %v3095_v33  ;;  %v1198_v47 = vpop.f32.mrb[21].mxu0 }
 0x107   :  { %2232 = vst [vmem:[%s3350_s3 + $0x104] sm:$0xff] %v2460_v42  ;;  %v1199_v50 = vadd.f32 %v1198_v47, %v3095_v33  ;;  %v1200_v51 = vpop.f32.mrb[22].mxu0  ;;  %2208 = vst [vmem:[%s3350_s3 + $0x48] sm:$0xff] %v2436_v48  ;;  %v2461_v55 = vpack.c.bf16 %v1873_v49, %v1872_v45  ;;  %v1239_v58 = vpop.f32.mrb[20].mxu1 }
 0x108   :  { %v1825_v52 = vmax.f32 %v1197_v46, 0.0  ;;  %v1201_v53 = vadd.f32 %v1200_v51, %v3097_v34  ;;  %v1202_v54 = vpop.f32.mrb[23].mxu0  ;;  %v1240_v60 = vadd.f32 %v1239_v58, %v3095_v33  ;;  %v1241_v61 = vpop.f32.mrb[21].mxu1 }
 0x109   :  { %v1826_v56 = vmax.f32 %v1199_v50, 0.0  ;;  %v1203_v57 = vadd.f32 %v1202_v54, %v3097_v34  ;;  %2233 = vst [vmem:[%s3350_s3 + $0x10c] sm:$0xff] %v2461_v55  ;;  %v1242_v0 = vadd.f32 %v1241_v61, %v3095_v33  ;;  %v1243_v1 = vpop.f32.mrb[22].mxu1 }
 0x10a   :  { %v1874_v59 = vmax.f32 %v1201_v53, 0.0  ;;  %v1827_v2 = vmax.f32 %v1240_v60, 0.0  ;;  %v1244_v4 = vadd.f32 %v1243_v1, %v3097_v34  ;;  %v1245_v6 = vpop.f32.mrb[23].mxu1 }
 0x10b   :  { %v2437_v62 = vpack.c.bf16 %v1826_v56, %v1825_v52  ;;  %v1875_v63 = vmax.f32 %v1203_v57, 0.0  ;;  %v1828_v8 = vmax.f32 %v1242_v0, 0.0  ;;  %v1246_v9 = vadd.f32 %v1245_v6, %v3097_v34 }
 0x10c   :  { %v1876_v12 = vmax.f32 %v1244_v4, 0.0 }
 0x10d   :  { %2209 = vst [vmem:[%s3350_s3 + $0x50] sm:$0xff] %v2437_v62  ;;  %v2462_v7 = vpack.c.bf16 %v1875_v63, %v1874_v59  ;;  %v1282_v10 = vpop.f32.mrb[24].mxu0  ;;  %v2438_v15 = vpack.c.bf16 %v1828_v8, %v1827_v2  ;;  %v1877_v16 = vmax.f32 %v1246_v9, 0.0 }
 0x10e   :  { %v1283_v13 = vadd.f32 %v1282_v10, %v3095_v33  ;;  %v1284_v14 = vpop.f32.mrb[25].mxu0 }
 0x10f   :  { %2234 = vst [vmem:[%s3350_s3 + $0x114] sm:$0xff] %v2462_v7  ;;  %v1285_v17 = vadd.f32 %v1284_v14, %v3095_v33  ;;  %v1286_v18 = vpop.f32.mrb[26].mxu0  ;;  %2210 = vst [vmem:[%s3350_s3 + $0x58] sm:$0xff] %v2438_v15  ;;  %v2463_v22 = vpack.c.bf16 %v1877_v16, %v1876_v12  ;;  %v1325_v25 = vpop.f32.mrb[24].mxu1 }
 0x110   :  { %v1829_v19 = vmax.f32 %v1283_v13, 0.0  ;;  %v1287_v20 = vadd.f32 %v1286_v18, %v3097_v34  ;;  %v1288_v21 = vpop.f32.mrb[27].mxu0  ;;  %v1326_v27 = vadd.f32 %v1325_v25, %v3095_v33  ;;  %v1327_v28 = vpop.f32.mrb[25].mxu1 }
 0x111   :  { %v1830_v23 = vmax.f32 %v1285_v17, 0.0  ;;  %v1289_v24 = vadd.f32 %v1288_v21, %v3097_v34  ;;  %2235 = vst [vmem:[%s3350_s3 + $0x11c] sm:$0xff] %v2463_v22  ;;  %v1328_v31 = vadd.f32 %v1327_v28, %v3095_v33  ;;  %v1329_v32 = vpop.f32.mrb[26].mxu1 }
 0x112   :  { %v1878_v26 = vmax.f32 %v1287_v20, 0.0  ;;  %v1831_v3 = vmax.f32 %v1326_v27, 0.0  ;;  %v1330_v35 = vadd.f32 %v1329_v32, %v3097_v34  ;;  %v1331_v36 = vpop.f32.mrb[27].mxu1 }
 0x113   :  { %v2439_v29 = vpack.c.bf16 %v1830_v23, %v1829_v19  ;;  %v1879_v30 = vmax.f32 %v1289_v24, 0.0  ;;  %v1832_v37 = vmax.f32 %v1328_v31, 0.0  ;;  %v1332_v38 = vadd.f32 %v1331_v36, %v3097_v34 }
 0x114   :  { %v1880_v40 = vmax.f32 %v1330_v35, 0.0 }
 0x115   :  { %2211 = vst [vmem:[%s3350_s3 + $0x60] sm:$0xff] %v2439_v29  ;;  %v2464_v5 = vpack.c.bf16 %v1879_v30, %v1878_v26  ;;  %v1368_v39 = vpop.f32.mrb[28].mxu0  ;;  %v2440_v43 = vpack.c.bf16 %v1832_v37, %v1831_v3  ;;  %v1881_v11 = vmax.f32 %v1332_v38, 0.0 }
 0x116   :  { %v1369_v41 = vadd.f32 %v1368_v39, %v3095_v33  ;;  %v1370_v42 = vpop.f32.mrb[29].mxu0 }
 0x117   :  { %2236 = vst [vmem:[%s3350_s3 + $0x124] sm:$0xff] %v2464_v5  ;;  %v1371_v44 = vadd.f32 %v1370_v42, %v3095_v33  ;;  %v1372_v45 = vpop.f32.mrb[30].mxu0  ;;  %2212 = vst [vmem:[%s3350_s3 + $0x68] sm:$0xff] %v2440_v43  ;;  %v2465_v49 = vpack.c.bf16 %v1881_v11, %v1880_v40  ;;  %v1411_v52 = vpop.f32.mrb[28].mxu1 }
 0x118   :  { %v1833_v46 = vmax.f32 %v1369_v41, 0.0  ;;  %v1373_v47 = vadd.f32 %v1372_v45, %v3097_v34  ;;  %v1374_v48 = vpop.f32.mrb[31].mxu0  ;;  %v1412_v54 = vadd.f32 %v1411_v52, %v3095_v33  ;;  %v1413_v55 = vpop.f32.mrb[29].mxu1 }
 0x119   :  { %v1834_v50 = vmax.f32 %v1371_v44, 0.0  ;;  %v1375_v51 = vadd.f32 %v1374_v48, %v3097_v34  ;;  %2237 = vst [vmem:[%s3350_s3 + $0x12c] sm:$0xff] %v2465_v49  ;;  %v1414_v58 = vadd.f32 %v1413_v55, %v3095_v33  ;;  %v1415_v59 = vpop.f32.mrb[30].mxu1 }
 0x11a   :  { %v1882_v53 = vmax.f32 %v1373_v47, 0.0  ;;  %v1835_v60 = vmax.f32 %v1412_v54, 0.0  ;;  %v1416_v61 = vadd.f32 %v1415_v59, %v3097_v34  ;;  %v1417_v62 = vpop.f32.mrb[31].mxu1 }
 0x11b   :  { %v2441_v56 = vpack.c.bf16 %v1834_v50, %v1833_v46  ;;  %v1883_v57 = vmax.f32 %v1375_v51, 0.0  ;;  %v1836_v0 = vmax.f32 %v1414_v58, 0.0  ;;  %v1418_v1 = vadd.f32 %v1417_v62, %v3097_v34 }
 0x11c   :  { %v1884_v4 = vmax.f32 %v1416_v61, 0.0 }
 0x11d   :  { %2213 = vst [vmem:[%s3350_s3 + $0x70] sm:$0xff] %v2441_v56  ;;  %v2466_v63 = vpack.c.bf16 %v1883_v57, %v1882_v53  ;;  %v1454_v2 = vpop.f32.mrb[32].mxu0  ;;  %v2442_v8 = vpack.c.bf16 %v1836_v0, %v1835_v60  ;;  %v1885_v9 = vmax.f32 %v1418_v1, 0.0 }
 0x11e   :  { %v1455_v6 = vadd.f32 %v1454_v2, %v3095_v33  ;;  %v1456_v7 = vpop.f32.mrb[33].mxu0 }
 0x11f   :  { %2238 = vst [vmem:[%s3350_s3 + $0x134] sm:$0xff] %v2466_v63  ;;  %v1457_v10 = vadd.f32 %v1456_v7, %v3095_v33  ;;  %v1458_v12 = vpop.f32.mrb[34].mxu0  ;;  %2214 = vst [vmem:[%s3350_s3 + $0x78] sm:$0xff] %v2442_v8  ;;  %v2467_v16 = vpack.c.bf16 %v1885_v9, %v1884_v4  ;;  %v1497_v19 = vpop.f32.mrb[32].mxu1 }
 0x120   :  { %v1837_v13 = vmax.f32 %v1455_v6, 0.0  ;;  %v1459_v14 = vadd.f32 %v1458_v12, %v3097_v34  ;;  %v1460_v15 = vpop.f32.mrb[35].mxu0  ;;  %v1498_v21 = vadd.f32 %v1497_v19, %v3095_v33  ;;  %v1499_v22 = vpop.f32.mrb[33].mxu1 }
 0x121   :  { %v1838_v17 = vmax.f32 %v1457_v10, 0.0  ;;  %v1461_v18 = vadd.f32 %v1460_v15, %v3097_v34  ;;  %2239 = vst [vmem:[%s3350_s3 + $0x13c] sm:$0xff] %v2467_v16  ;;  %v1500_v25 = vadd.f32 %v1499_v22, %v3095_v33  ;;  %v1501_v26 = vpop.f32.mrb[34].mxu1 }
 0x122   :  { %v1886_v20 = vmax.f32 %v1459_v14, 0.0  ;;  %v1839_v27 = vmax.f32 %v1498_v21, 0.0  ;;  %v1502_v28 = vadd.f32 %v1501_v26, %v3097_v34  ;;  %v1503_v29 = vpop.f32.mrb[35].mxu1 }
 0x123   :  { %v2443_v23 = vpack.c.bf16 %v1838_v17, %v1837_v13  ;;  %v1887_v24 = vmax.f32 %v1461_v18, 0.0  ;;  %v1840_v31 = vmax.f32 %v1500_v25, 0.0  ;;  %v1504_v32 = vadd.f32 %v1503_v29, %v3097_v34 }
 0x124   :  { %v1888_v35 = vmax.f32 %v1502_v28, 0.0 }
 0x125   :  { %2215 = vst [vmem:[%s3350_s3 + $0x80] sm:$0xff] %v2443_v23  ;;  %v2468_v30 = vpack.c.bf16 %v1887_v24, %v1886_v20  ;;  %v1540_v3 = vpop.f32.mrb[36].mxu0  ;;  %v2444_v37 = vpack.c.bf16 %v1840_v31, %v1839_v27  ;;  %v1889_v38 = vmax.f32 %v1504_v32, 0.0 }
 0x126   :  { %v1541_v36 = vadd.f32 %v1540_v3, %v3095_v33  ;;  %v1542_v5 = vpop.f32.mrb[37].mxu0 }
 0x127   :  { %2240 = vst [vmem:[%s3350_s3 + $0x144] sm:$0xff] %v2468_v30  ;;  %v1543_v39 = vadd.f32 %v1542_v5, %v3095_v33  ;;  %v1544_v40 = vpop.f32.mrb[38].mxu0  ;;  %2216 = vst [vmem:[%s3350_s3 + $0x88] sm:$0xff] %v2444_v37  ;;  %v2469_v11 = vpack.c.bf16 %v1889_v38, %v1888_v35  ;;  %v1583_v46 = vpop.f32.mrb[36].mxu1 }
 0x128   :  { %v1841_v41 = vmax.f32 %v1541_v36, 0.0  ;;  %v1545_v42 = vadd.f32 %v1544_v40, %v3097_v34  ;;  %v1546_v43 = vpop.f32.mrb[39].mxu0  ;;  %v1584_v48 = vadd.f32 %v1583_v46, %v3095_v33  ;;  %v1585_v49 = vpop.f32.mrb[37].mxu1 }
 0x129   :  { %v1842_v44 = vmax.f32 %v1543_v39, 0.0  ;;  %v1547_v45 = vadd.f32 %v1546_v43, %v3097_v34  ;;  %2241 = vst [vmem:[%s3350_s3 + $0x14c] sm:$0xff] %v2469_v11  ;;  %v1586_v52 = vadd.f32 %v1585_v49, %v3095_v33  ;;  %v1587_v53 = vpop.f32.mrb[38].mxu1 }
 0x12a   :  { %v1890_v47 = vmax.f32 %v1545_v42, 0.0  ;;  %v1843_v54 = vmax.f32 %v1584_v48, 0.0  ;;  %v1588_v55 = vadd.f32 %v1587_v53, %v3097_v34  ;;  %v1589_v56 = vpop.f32.mrb[39].mxu1 }
 0x12b   :  { %v2445_v50 = vpack.c.bf16 %v1842_v44, %v1841_v41  ;;  %v1891_v51 = vmax.f32 %v1547_v45, 0.0  ;;  %v1844_v58 = vmax.f32 %v1586_v52, 0.0  ;;  %v1590_v59 = vadd.f32 %v1589_v56, %v3097_v34 }
 0x12c   :  { %v1892_v61 = vmax.f32 %v1588_v55, 0.0 }
 0x12d   :  { %2217 = vst [vmem:[%s3350_s3 + $0x90] sm:$0xff] %v2445_v50  ;;  %v2470_v57 = vpack.c.bf16 %v1891_v51, %v1890_v47  ;;  %v1626_v60 = vpop.f32.mrb[40].mxu0  ;;  %v2446_v0 = vpack.c.bf16 %v1844_v58, %v1843_v54  ;;  %v1893_v1 = vmax.f32 %v1590_v59, 0.0 }
 0x12e   :  { %v1627_v62 = vadd.f32 %v1626_v60, %v3095_v33  ;;  %v1628_v63 = vpop.f32.mrb[41].mxu0 }
 0x12f   :  { %2242 = vst [vmem:[%s3350_s3 + $0x154] sm:$0xff] %v2470_v57  ;;  %v1629_v2 = vadd.f32 %v1628_v63, %v3095_v33  ;;  %v1630_v4 = vpop.f32.mrb[42].mxu0  ;;  %2218 = vst [vmem:[%s3350_s3 + $0x98] sm:$0xff] %v2446_v0  ;;  %v2471_v9 = vpack.c.bf16 %v1893_v1, %v1892_v61  ;;  %v1669_v13 = vpop.f32.mrb[40].mxu1 }
 0x130   :  { %v1845_v6 = vmax.f32 %v1627_v62, 0.0  ;;  %v1631_v7 = vadd.f32 %v1630_v4, %v3097_v34  ;;  %v1632_v8 = vpop.f32.mrb[43].mxu0  ;;  %v1670_v15 = vadd.f32 %v1669_v13, %v3095_v33  ;;  %v1671_v16 = vpop.f32.mrb[41].mxu1 }
 0x131   :  { %v1846_v10 = vmax.f32 %v1629_v2, 0.0  ;;  %v1633_v12 = vadd.f32 %v1632_v8, %v3097_v34  ;;  %2243 = vst [vmem:[%s3350_s3 + $0x15c] sm:$0xff] %v2471_v9  ;;  %v1672_v19 = vadd.f32 %v1671_v16, %v3095_v33  ;;  %v1673_v20 = vpop.f32.mrb[42].mxu1 }
 0x132   :  { %v1894_v14 = vmax.f32 %v1631_v7, 0.0  ;;  %v1847_v21 = vmax.f32 %v1670_v15, 0.0  ;;  %v1674_v22 = vadd.f32 %v1673_v20, %v3097_v34  ;;  %v1675_v23 = vpop.f32.mrb[43].mxu1 }
 0x133   :  { %v2447_v17 = vpack.c.bf16 %v1846_v10, %v1845_v6  ;;  %v1895_v18 = vmax.f32 %v1633_v12, 0.0  ;;  %v1848_v25 = vmax.f32 %v1672_v19, 0.0  ;;  %v1676_v26 = vadd.f32 %v1675_v23, %v3097_v34 }
 0x134   :  { %v1896_v28 = vmax.f32 %v1674_v22, 0.0 }
 0x135   :  { %2219 = vst [vmem:[%s3350_s3 + $0xa0] sm:$0xff] %v2447_v17  ;;  %v2472_v24 = vpack.c.bf16 %v1895_v18, %v1894_v14  ;;  %v1712_v27 = vpop.f32.mrb[44].mxu0  ;;  %v2448_v31 = vpack.c.bf16 %v1848_v25, %v1847_v21  ;;  %v1897_v32 = vmax.f32 %v1676_v26, 0.0 }
 0x136   :  { %v1713_v29 = vadd.f32 %v1712_v27, %v3095_v33  ;;  %v1714_v30 = vpop.f32.mrb[45].mxu0 }
 0x137   :  { %2244 = vst [vmem:[%s3350_s3 + $0x164] sm:$0xff] %v2472_v24  ;;  %v1715_v3 = vadd.f32 %v1714_v30, %v3095_v33  ;;  %v1716_v35 = vpop.f32.mrb[46].mxu0  ;;  %2220 = vst [vmem:[%s3350_s3 + $0xa8] sm:$0xff] %v2448_v31  ;;  %v2473_v38 = vpack.c.bf16 %v1897_v32, %v1896_v28  ;;  %v1755_v41 = vpop.f32.mrb[44].mxu1 }
 0x138   :  { %v1849_v36 = vmax.f32 %v1713_v29, 0.0  ;;  %v1717_v5 = vadd.f32 %v1716_v35, %v3097_v34  ;;  %v1718_v37 = vpop.f32.mrb[47].mxu0  ;;  %v1756_v43 = vadd.f32 %v1755_v41, %v3095_v33  ;;  %v1757_v11 = vpop.f32.mrb[45].mxu1 }
 0x139   :  { %v1850_v39 = vmax.f32 %v1715_v3, 0.0  ;;  %v1719_v40 = vadd.f32 %v1718_v37, %v3097_v34  ;;  %2245 = vst [vmem:[%s3350_s3 + $0x16c] sm:$0xff] %v2473_v38  ;;  %v1758_v46 = vadd.f32 %v1757_v11, %v3095_v33  ;;  %v1759_v47 = vpop.f32.mrb[46].mxu1 }
 0x13a   :  { %v1898_v42 = vmax.f32 %v1717_v5, 0.0  ;;  %v1851_v48 = vmax.f32 %v1756_v43, 0.0  ;;  %v1760_v49 = vadd.f32 %v1759_v47, %v3097_v34  ;;  %v1761_v50 = vpop.f32.mrb[47].mxu1 }
 0x13b   :  { %v2449_v44 = vpack.c.bf16 %v1850_v39, %v1849_v36  ;;  %v1899_v45 = vmax.f32 %v1719_v40, 0.0  ;;  %v1852_v52 = vmax.f32 %v1758_v46, 0.0  ;;  %v1762_v53 = vadd.f32 %v1761_v50, %v3097_v34 }
 0x13c   :  { %v1900_v55 = vmax.f32 %v1760_v49, 0.0 }
 0x13d   :  { %2221 = vst [vmem:[%s3350_s3 + $0xb0] sm:$0xff] %v2449_v44  ;;  %v2474_v51 = vpack.c.bf16 %v1899_v45, %v1898_v42  ;;  %v1798_v54 = vpop.f32.mrb[48].mxu0  ;;  %v2450_v58 = vpack.c.bf16 %v1852_v52, %v1851_v48  ;;  %v1901_v59 = vmax.f32 %v1762_v53, 0.0 }
 0x13e   :  { %v1799_v56 = vadd.f32 %v1798_v54, %v3095_v33  ;;  %v2486_v57 = vpop.f32.mrb[49].mxu0 }
 0x13f   :  { %2246 = vst [vmem:[%s3350_s3 + $0x174] sm:$0xff] %v2474_v51  ;;  %v1801_v60 = vpop.f32.mrb[50].mxu0  ;;  %2222 = vst [vmem:[%s3350_s3 + $0xb8] sm:$0xff] %v2450_v58  ;;  %v2475_v0 = vpack.c.bf16 %v1901_v59, %v1900_v55 }
 0x140   :  { %v1853_v61 = vmax.f32 %v1799_v56, 0.0  ;;  %v1802_v62 = vadd.f32 %v1801_v60, %v3097_v34  ;;  %v2487_v63 = vpop.f32.mrb[51].mxu0 }
 0x141   :  { %2247 = vst [vmem:[%s3350_s3 + $0x17c] sm:$0xff] %v2475_v0 }
 0x142   :  { %v2451_v1 = vpack.c.bf16 %v1853_v61, %v1853_v61  ;;  %v1902_v2 = vmax.f32 %v1802_v62, 0.0 }
 0x144   :  { %2223 = vst [vmem:[%s3350_s3 + $0xc0] sm:$0xf] %v2451_v1  ;;  %v2476_v33 = vpack.c.bf16 %v1902_v2, %v1902_v2 }
 0x146   :  { %2248 = vst [vmem:[%s3350_s3 + $0x184] sm:$0xf] %v2476_v33 }

// kernel: encoder_forward.7
= control target key start
LH: loop header
LB: loop body
LE: loop exit
PB: predicated region body
PF: predicated region fallthrough
CT: control target
= control target key end

     0   :  { %v1789_v1 = vmov 0   ;;  %vm781_vm0 = vcmask 130048   ;;  %vm1373_vm1 = vcmask 257024   ;;  %s2399_s0 = inlined_call_operand.vmem [shape: bf16[144,1568], index: 0, kind: input, shape index: {}]   ;;  %s2400_s1 = inlined_call_operand.vmem [shape: bf16[32,144], index: 1, kind: input, shape index: {}]   ;;  %s2401_s2 = inlined_call_operand.vmem [shape: f32[32,1], index: 2, kind: input, shape index: {}]   ;;  %s2402_s3 = inlined_call_operand.vmem [shape: bf16[32,1568], index: 3, kind: output, shape index: {}]  }
   0x1   :  { %v1612_v0 = vld [vmem:[%s2399_s0 + $0x4] ss:$52 sps:$4 sm:$0xff]   ;;  %1610 = vset.pattern.permute.xlu0 %v1789_v1  ;;  %1611 = vset.pattern.permute.xlu1 %v1789_v1  ;;  %v1614_v2 = vld [vmem:[%s2399_s0 + $0xc] ss:$52 sps:$4 sm:$0xff]   ;;  %v1617_v4 = vld [vmem:[%s2399_s0 + $0x8] ss:$52 sps:$4 sm:$0xff]  }
   0x2   :  { %788 = vmatprep.subr.bf16.mxu0 %v1612_v0  ;;  %v1616_v3 = vld [vmem:[%s2399_s0] ss:$52 sps:$4 sm:$0xff]   ;;  %841 = vmatprep.subr.bf16.mxu1 %v1614_v2  ;;  %v1622_v7 = vld [vmem:[%s2399_s0 + $0x68] ss:$52 sps:$4 sm:$0xff]   ;;  %v1623_v8 = vld [vmem:[%s2399_s0 + $0x70] ss:$52 sps:$4 sm:$0xff]  }
   0x3   :  { %v1618_v5 = vld [vmem:[%s2399_s0 + $0x6c] ss:$52 sps:$4 sm:$0xff]   ;;  %789 = vmatpush1.bf16.msra.mxu0 %v1616_v3  ;;  %842 = vmatpush1.bf16.msra.mxu1 %v1617_v4  ;;  %v1620_v6 = vld [vmem:[%s2399_s0 + $0x74] ss:$52 sps:$4 sm:$0xff]   ;;  %v1626_v10 = vld [vmem:[%s2399_s0 + $0xdc] ss:$52 sps:$4 sm:$0xff]  }
   0x4   :  { %790 = vmatprep.subr.bf16.mxu0 %v1618_v5  ;;  %843 = vmatprep.subr.bf16.mxu1 %v1620_v6  ;;  %v1624_v9 = vld [vmem:[%s2399_s0 + $0xd4] ss:$52 sps:$4 sm:$0xff]   ;;  %v1628_v11 = vld [vmem:[%s2399_s0 + $0xd0] ss:$52 sps:$4 sm:$0xff]   ;;  %v1629_v12 = vld [vmem:[%s2399_s0 + $0xd8] ss:$52 sps:$4 sm:$0xff]  }
   0x5   :  { %v1630_v13 = vld [vmem:[%s2399_s0 + $0x13c] ss:$52 sps:$4 sm:$0xff]   ;;  %v1632_v14 = vld [vmem:[%s2399_s0 + $0x144] ss:$52 sps:$4 sm:$0xff]   ;;  %v1635_v16 = vld [vmem:[%s2399_s0 + $0x140] ss:$52 sps:$4 sm:$0xff]  }
   0x6   :  { %v1634_v15 = vld [vmem:[%s2399_s0 + $0x138] ss:$52 sps:$4 sm:$0xff]   ;;  %v1640_v19 = vld [vmem:[%s2399_s0 + $0x1a0] ss:$52 sps:$4 sm:$0xff]   ;;  %v1641_v20 = vld [vmem:[%s2399_s0 + $0x1a8] ss:$52 sps:$4 sm:$0xff]  }
   0x7   :  { %791 = vmatpush1.bf16.msra.mxu0 %v1622_v7  ;;  %844 = vmatpush1.bf16.msra.mxu1 %v1623_v8  ;;  %v1636_v17 = vld [vmem:[%s2399_s0 + $0x1a4] ss:$52 sps:$4 sm:$0xff]   ;;  %v1638_v18 = vld [vmem:[%s2399_s0 + $0x1ac] ss:$52 sps:$4 sm:$0xff]   ;;  %v1644_v22 = vld [vmem:[%s2399_s0 + $0x214] ss:$52 sps:$4 sm:$0xff]  }
   0x8   :  { %792 = vmatprep.subr.bf16.mxu0 %v1624_v9  ;;  %845 = vmatprep.subr.bf16.mxu1 %v1626_v10  ;;  %v1642_v21 = vld [vmem:[%s2399_s0 + $0x20c] ss:$52 sps:$4 sm:$0xff]   ;;  %v1646_v23 = vld [vmem:[%s2399_s0 + $0x208] ss:$52 sps:$4 sm:$0xff]   ;;  %v1647_v24 = vld [vmem:[%s2399_s0 + $0x210] ss:$52 sps:$4 sm:$0xff]  }
   0x9   :  { %v1648_v25 = vld [vmem:[%s2399_s0 + $0x274] ss:$52 sps:$4 sm:$0xff]   ;;  %v1650_v26 = vld [vmem:[%s2399_s0 + $0x27c] ss:$52 sps:$4 sm:$0xff]   ;;  %v1653_v28 = vld [vmem:[%s2399_s0 + $0x278] ss:$52 sps:$4 sm:$0xff]  }
   0xa   :  { %v1652_v27 = vld [vmem:[%s2399_s0 + $0x270] ss:$52 sps:$4 sm:$0xff]   ;;  %v1658_v32 = vld [vmem:[%s2399_s0 + $0x2d8] ss:$52 sps:$4 sm:$0xff]   ;;  %v1659_v33 = vld [vmem:[%s2399_s0 + $0x2e0] ss:$52 sps:$4 sm:$0xff]  }
   0xb   :  { %793 = vmatpush1.bf16.msra.mxu0 %v1628_v11  ;;  %846 = vmatpush1.bf16.msra.mxu1 %v1629_v12  ;;  %v1654_v29 = vld [vmem:[%s2399_s0 + $0x2dc] ss:$52 sps:$4 sm:$0xff]   ;;  %v1902_v30 = vld [vmem:[%s2400_s1 + $0x4] ss:$8 sps:$4 sm:$0xff]   ;;  %v1664_v36 = vld [vmem:[%s2399_s0 + $0x340] ss:$52 sps:$4 sm:$0xff]  }
   0xc   :  { %794 = vmatprep.subr.bf16.mxu0 %v1630_v13  ;;  %847 = vmatprep.subr.bf16.mxu1 %v1632_v14  ;;  %v1656_v31 = vld [vmem:[%s2399_s0 + $0x2e4] ss:$52 sps:$4 sm:$0xff]   ;;  %v1662_v35 = vld [vmem:[%s2399_s0 + $0x34c] ss:$52 sps:$4 sm:$0xff]   ;;  %v1665_v37 = vld [vmem:[%s2399_s0 + $0x348] ss:$52 sps:$4 sm:$0xff]  }
   0xd   :  { %1521 = vmatprep.mubr.msk.bf16.mxu0 %vm781_vm0, %v1902_v30  ;;  %1523 = vmatprep.mubr.msk.bf16.mxu1 %vm781_vm0, %v1902_v30  ;;  %v1660_v34 = vld [vmem:[%s2399_s0 + $0x344] ss:$52 sps:$4 sm:$0xff]   ;;  %v1671_v38 = vld [vmem:[%s2399_s0 + $0x14] ss:$52 sps:$4 sm:$0xff]   ;;  %v1674_v39 = vld [vmem:[%s2399_s0 + $0x1c] ss:$52 sps:$4 sm:$0xff]  }
   0xe   :  { %v1938_v40 = vld [vmem:[%s2400_s1] ss:$8 sps:$4 sm:$0xff]   ;;  %v1669_v41 = vld [vmem:[%s2399_s0 + $0x10] ss:$52 sps:$4 sm:$0xff]   ;;  %v1672_v42 = vld [vmem:[%s2399_s0 + $0x18] ss:$52 sps:$4 sm:$0xff]  }
   0xf   :  { %795 = vmatpush1.bf16.msra.mxu0 %v1634_v15  ;;  %848 = vmatpush1.bf16.msra.mxu1 %v1635_v16  ;;  %v1677_v43 = vld [vmem:[%s2399_s0 + $0x7c] ss:$52 sps:$4 sm:$0xff]   ;;  %v1680_v44 = vld [vmem:[%s2399_s0 + $0x84] ss:$52 sps:$4 sm:$0xff]   ;;  %v1678_v46 = vld [vmem:[%s2399_s0 + $0x80] ss:$52 sps:$4 sm:$0xff]  }
  0x10   :  { %796 = vmatprep.subr.bf16.mxu0 %v1636_v17  ;;  %849 = vmatprep.subr.bf16.mxu1 %v1638_v18  ;;  %v1675_v45 = vld [vmem:[%s2399_s0 + $0x78] ss:$52 sps:$4 sm:$0xff]   ;;  %v1681_v49 = vld [vmem:[%s2399_s0 + $0xe0] ss:$52 sps:$4 sm:$0xff]   ;;  %v1684_v50 = vld [vmem:[%s2399_s0 + $0xe8] ss:$52 sps:$4 sm:$0xff]  }
  0x11   :  { %v1683_v47 = vld [vmem:[%s2399_s0 + $0xe4] ss:$52 sps:$4 sm:$0xff]   ;;  %v1686_v48 = vld [vmem:[%s2399_s0 + $0xec] ss:$52 sps:$4 sm:$0xff]   ;;  %v1692_v52 = vld [vmem:[%s2399_s0 + $0x154] ss:$52 sps:$4 sm:$0xff]  }
  0x12   :  { %v1689_v51 = vld [vmem:[%s2399_s0 + $0x14c] ss:$52 sps:$4 sm:$0xff]   ;;  %v1981_v53 = vld [vmem:[%s2400_s1 + $0x14] ss:$8 sps:$4 sm:$0xff]   ;;  %v1986_v54 = vld [vmem:[%s2400_s1 + $0x10] ss:$8 sps:$4 sm:$0xff]  }
  0x13   :  { %797 = vmatpush1.bf16.msra.mxu0 %v1640_v19  ;;  %850 = vmatpush1.bf16.msra.mxu1 %v1641_v20  ;;  %v1687_v55 = vld [vmem:[%s2399_s0 + $0x148] ss:$52 sps:$4 sm:$0xff]   ;;  %v1690_v56 = vld [vmem:[%s2399_s0 + $0x150] ss:$52 sps:$4 sm:$0xff]   ;;  %v1696_v60 = vld [vmem:[%s2399_s0 + $0x1b8] ss:$52 sps:$4 sm:$0xff]  }
  0x14   :  { %798 = vmatprep.subr.bf16.mxu0 %v1642_v21  ;;  %851 = vmatprep.subr.bf16.mxu1 %v1644_v22  ;;  %v1695_v57 = vld [vmem:[%s2399_s0 + $0x1b4] ss:$52 sps:$4 sm:$0xff]   ;;  %v1698_v58 = vld [vmem:[%s2399_s0 + $0x1bc] ss:$52 sps:$4 sm:$0xff]   ;;  %v1704_v62 = vld [vmem:[%s2399_s0 + $0x224] ss:$52 sps:$4 sm:$0xff]  }
  0x15   :  { %v1693_v59 = vld [vmem:[%s2399_s0 + $0x1b0] ss:$52 sps:$4 sm:$0xff]   ;;  %v1699_v63 = vld [vmem:[%s2399_s0 + $0x218] ss:$52 sps:$4 sm:$0xff]   ;;  %v1702_v0 = vld [vmem:[%s2399_s0 + $0x220] ss:$52 sps:$4 sm:$0xff]  }
  0x16   :  { %v1701_v61 = vld [vmem:[%s2399_s0 + $0x21c] ss:$52 sps:$4 sm:$0xff]   ;;  %v1707_v2 = vld [vmem:[%s2399_s0 + $0x284] ss:$52 sps:$4 sm:$0xff]   ;;  %v1710_v3 = vld [vmem:[%s2399_s0 + $0x28c] ss:$52 sps:$4 sm:$0xff]  }
  0x17   :  { %799 = vmatpush1.bf16.msra.mxu0 %v1646_v23  ;;  %852 = vmatpush1.bf16.msra.mxu1 %v1647_v24  ;;  %v1705_v4 = vld [vmem:[%s2399_s0 + $0x280] ss:$52 sps:$4 sm:$0xff]   ;;  %v1708_v5 = vld [vmem:[%s2399_s0 + $0x288] ss:$52 sps:$4 sm:$0xff]   ;;  %v1717_v9 = vld [vmem:[%s2399_s0 + $0x2f0] ss:$52 sps:$4 sm:$0xff]  }
  0x18   :  { %800 = vmatprep.subr.bf16.mxu0 %v1648_v25  ;;  %853 = vmatprep.subr.bf16.mxu1 %v1650_v26  ;;  %v1716_v6 = vld [vmem:[%s2399_s0 + $0x2ec] ss:$52 sps:$4 sm:$0xff]   ;;  %v1719_v7 = vld [vmem:[%s2399_s0 + $0x2f4] ss:$52 sps:$4 sm:$0xff]   ;;  %v1725_v11 = vld [vmem:[%s2399_s0 + $0x35c] ss:$52 sps:$4 sm:$0xff]  }
  0x19   :  { %v1714_v8 = vld [vmem:[%s2399_s0 + $0x2e8] ss:$52 sps:$4 sm:$0xff]   ;;  %v1720_v12 = vld [vmem:[%s2399_s0 + $0x350] ss:$52 sps:$4 sm:$0xff]   ;;  %v1723_v13 = vld [vmem:[%s2399_s0 + $0x358] ss:$52 sps:$4 sm:$0xff]  }
  0x1a   :  { %v1722_v10 = vld [vmem:[%s2399_s0 + $0x354] ss:$52 sps:$4 sm:$0xff]   ;;  %v1728_v14 = vld [vmem:[%s2399_s0 + $0x24] ss:$52 sps:$4 sm:$0xff]   ;;  %v1731_v15 = vld [vmem:[%s2399_s0 + $0x2c] ss:$52 sps:$4 sm:$0xff]  }
  0x1b   :  { %801 = vmatpush1.bf16.msra.mxu0 %v1652_v27  ;;  %854 = vmatpush1.bf16.msra.mxu1 %v1653_v28  ;;  %v1726_v16 = vld [vmem:[%s2399_s0 + $0x20] ss:$52 sps:$4 sm:$0xff]   ;;  %v1729_v17 = vld [vmem:[%s2399_s0 + $0x28] ss:$52 sps:$4 sm:$0xff]   ;;  %v1735_v21 = vld [vmem:[%s2399_s0 + $0x90] ss:$52 sps:$4 sm:$0xff]  }
  0x1c   :  { %802 = vmatprep.subr.bf16.mxu0 %v1654_v29  ;;  %855 = vmatprep.subr.bf16.mxu1 %v1656_v31  ;;  %v1734_v18 = vld [vmem:[%s2399_s0 + $0x8c] ss:$52 sps:$4 sm:$0xff]   ;;  %v1737_v19 = vld [vmem:[%s2399_s0 + $0x94] ss:$52 sps:$4 sm:$0xff]   ;;  %v1743_v23 = vld [vmem:[%s2399_s0 + $0xfc] ss:$52 sps:$4 sm:$0xff]  }
  0x1d   :  { %v1732_v20 = vld [vmem:[%s2399_s0 + $0x88] ss:$52 sps:$4 sm:$0xff]   ;;  %v145_v24 = vld [vmem:[%s2401_s2] sm:$0xff]  ;;  %v1741_v26 = vld [vmem:[%s2399_s0 + $0xf8] ss:$52 sps:$4 sm:$0xff]  }
  0x1e   :  { %v1740_v22 = vld [vmem:[%s2399_s0 + $0xf4] ss:$52 sps:$4 sm:$0xff]   ;;  %v1738_v25 = vld [vmem:[%s2399_s0 + $0xf0] ss:$52 sps:$4 sm:$0xff]   ;;  %151 = vperm.xlu0 %1610, %v145_v24   ;;  %v1744_v29 = vld [vmem:[%s2399_s0 + $0x158] ss:$52 sps:$4 sm:$0xff]  }
  0x1f   :  { %803 = vmatpush1.bf16.msra.mxu0 %v1658_v32  ;;  %856 = vmatpush1.bf16.msra.mxu1 %v1659_v33  ;;  %v1746_v27 = vld [vmem:[%s2399_s0 + $0x15c] ss:$52 sps:$4 sm:$0xff]   ;;  %v1749_v28 = vld [vmem:[%s2399_s0 + $0x164] ss:$52 sps:$4 sm:$0xff]   ;;  %v1747_v31 = vld [vmem:[%s2399_s0 + $0x160] ss:$52 sps:$4 sm:$0xff]  }
  0x20   :  { %804 = vmatprep.subr.bf16.mxu0 %v1660_v34  ;;  %857 = vmatprep.subr.bf16.mxu1 %v1662_v35  ;;  %v146_v32 = vld [vmem:[%s2401_s2 + $0x8] sm:$0xff]  ;;  %v147_v33 = vld [vmem:[%s2401_s2 + $0x10] sm:$0xff]  ;;  %v1752_v34 = vld [vmem:[%s2399_s0 + $0x1c4] ss:$52 sps:$4 sm:$0xff]  }
  0x21   :  { %v1755_v35 = vld [vmem:[%s2399_s0 + $0x1cc] ss:$52 sps:$4 sm:$0xff]   ;;  %161 = vperm.xlu1 %1611, %v147_v33  }
  0x22   :  { %156 = vperm.xlu0 %1610, %v146_v32  }
  0x23   :  { %805 = vmatpush1.bf16.msra.mxu0 %v1664_v36  ;;  %858 = vmatpush1.bf16.msra.mxu1 %v1665_v37  ;;  %v1750_v36 = vld [vmem:[%s2399_s0 + $0x1c0] ss:$52 sps:$4 sm:$0xff]   ;;  %v1753_v37 = vld [vmem:[%s2399_s0 + $0x1c8] ss:$52 sps:$4 sm:$0xff]  }
  0x24   :  { %894 = vmatprep.subr.bf16.mxu0 %v1671_v38  ;;  %947 = vmatprep.subr.bf16.mxu1 %v1674_v39  ;;  %v148_v38 = vld [vmem:[%s2401_s2 + $0x18] sm:$0xff]  ;;  %v1758_v39 = vld [vmem:[%s2399_s0 + $0x22c] ss:$52 sps:$4 sm:$0xff]  }
  0x25   :  { %166 = vperm.xlu1 %1611, %v148_v38  }
  0x26   :  { %821 = vmatmul.mubr.bf16.vlgmr.msra.gmra.mrb[0].mxu0 %v1938_v40  ;;  %874 = vmatmul.mubr.bf16.vlgmr.msra.gmra.mrb[0].mxu1 %v1938_v40 }
  0x27   :  { %895 = vmatpush1.bf16.msra.mxu0 %v1669_v41  ;;  %948 = vmatpush1.bf16.msra.mxu1 %v1672_v42  ;;  %v1761_v41 = vld [vmem:[%s2399_s0 + $0x234] ss:$52 sps:$4 sm:$0xff]  }
  0x28   :  { %896 = vmatprep.subr.bf16.mxu0 %v1677_v43  ;;  %949 = vmatprep.subr.bf16.mxu1 %v1680_v44  ;;  %v1756_v42 = vld [vmem:[%s2399_s0 + $0x228] ss:$52 sps:$4 sm:$0xff]   ;;  %v1759_v43 = vld [vmem:[%s2399_s0 + $0x230] ss:$52 sps:$4 sm:$0xff]  }
  0x29   :  { %1522 = vmatprep.mubr.msk.bf16.mxu0 %vm781_vm0, %v1981_v53  ;;  %1524 = vmatprep.mubr.msk.bf16.mxu1 %vm781_vm0, %v1981_v53  ;;  %v1764_v44 = vld [vmem:[%s2399_s0 + $0x294] ss:$52 sps:$4 sm:$0xff]  }
  0x2b   :  { %897 = vmatpush1.bf16.msra.mxu0 %v1675_v45  ;;  %950 = vmatpush1.bf16.msra.mxu1 %v1678_v46  ;;  %v1767_v45 = vld [vmem:[%s2399_s0 + $0x29c] ss:$52 sps:$4 sm:$0xff]  }
  0x2c   :  { %898 = vmatprep.subr.bf16.mxu0 %v1683_v47  ;;  %951 = vmatprep.subr.bf16.mxu1 %v1686_v48  ;;  %v1762_v46 = vld [vmem:[%s2399_s0 + $0x290] ss:$52 sps:$4 sm:$0xff]   ;;  %v1765_v47 = vld [vmem:[%s2399_s0 + $0x298] ss:$52 sps:$4 sm:$0xff]  }
  0x2d   :  { %v1770_v48 = vld [vmem:[%s2399_s0 + $0x2fc] ss:$52 sps:$4 sm:$0xff]  }
  0x2e   :  { %831 = vmatmul.mubr.bf16.gmra.mrb[4].mxu0 %v1986_v54  ;;  %884 = vmatmul.mubr.bf16.gmra.mrb[4].mxu1 %v1986_v54 }
  0x2f   :  { %899 = vmatpush1.bf16.msra.mxu0 %v1681_v49  ;;  %952 = vmatpush1.bf16.msra.mxu1 %v1684_v50  ;;  %v1773_v49 = vld [vmem:[%s2399_s0 + $0x304] ss:$52 sps:$4 sm:$0xff]  }
  0x30   :  { %900 = vmatprep.subr.bf16.mxu0 %v1689_v51  ;;  %953 = vmatprep.subr.bf16.mxu1 %v1692_v52  ;;  %v1768_v50 = vld [vmem:[%s2399_s0 + $0x2f8] ss:$52 sps:$4 sm:$0xff]   ;;  %v1771_v51 = vld [vmem:[%s2399_s0 + $0x300] ss:$52 sps:$4 sm:$0xff]  }
  0x31   :  { %1525 = vmatprep.mubr.msk.bf16.mxu0 %vm781_vm0, %v1902_v30  ;;  %1527 = vmatprep.mubr.msk.bf16.mxu1 %vm781_vm0, %v1902_v30  ;;  %v1776_v52 = vld [vmem:[%s2399_s0 + $0x364] ss:$52 sps:$4 sm:$0xff]  }
  0x33   :  { %901 = vmatpush1.bf16.msra.mxu0 %v1687_v55  ;;  %954 = vmatpush1.bf16.msra.mxu1 %v1690_v56  ;;  %v1779_v55 = vld [vmem:[%s2399_s0 + $0x36c] ss:$52 sps:$4 sm:$0xff]  }
  0x34   :  { %902 = vmatprep.subr.bf16.mxu0 %v1695_v57  ;;  %955 = vmatprep.subr.bf16.mxu1 %v1698_v58  ;;  %v1774_v56 = vld [vmem:[%s2399_s0 + $0x360] ss:$52 sps:$4 sm:$0xff]   ;;  %v1777_v57 = vld [vmem:[%s2399_s0 + $0x368] ss:$52 sps:$4 sm:$0xff]   ;;  %v1780_v58 = vld [vmem:[%s2399_s0 + $0x30] ss:$52 sps:$4 sm:$0xff]  }
  0x37   :  { %903 = vmatpush1.bf16.msra.mxu0 %v1693_v59  ;;  %956 = vmatpush1.bf16.msra.mxu1 %v1696_v60  ;;  %v1781_v59 = vld [vmem:[%s2399_s0 + $0x98] ss:$52 sps:$4 sm:$0xff]   ;;  %v1782_v60 = vld [vmem:[%s2399_s0 + $0x100] ss:$52 sps:$4 sm:$0xff]  }
  0x38   :  { %904 = vmatprep.subr.bf16.mxu0 %v1701_v61  ;;  %957 = vmatprep.subr.bf16.mxu1 %v1704_v62  ;;  %v1783_v61 = vld [vmem:[%s2399_s0 + $0x168] ss:$52 sps:$4 sm:$0xff]   ;;  %v1784_v62 = vld [vmem:[%s2399_s0 + $0x1d0] ss:$52 sps:$4 sm:$0xff]  }
  0x3b   :  { %905 = vmatpush1.bf16.msra.mxu0 %v1699_v63  ;;  %958 = vmatpush1.bf16.msra.mxu1 %v1702_v0  ;;  %v1785_v63 = vld [vmem:[%s2399_s0 + $0x238] ss:$52 sps:$4 sm:$0xff]   ;;  %v1788_v0 = vld [vmem:[%s2399_s0 + $0x370] ss:$52 sps:$4 sm:$0xff]  }
  0x3c   :  { %906 = vmatprep.subr.bf16.mxu0 %v1707_v2  ;;  %959 = vmatprep.subr.bf16.mxu1 %v1710_v3 }
  0x3f   :  { %907 = vmatpush1.bf16.msra.mxu0 %v1705_v4  ;;  %960 = vmatpush1.bf16.msra.mxu1 %v1708_v5 }
  0x40   :  { %908 = vmatprep.subr.bf16.mxu0 %v1716_v6  ;;  %961 = vmatprep.subr.bf16.mxu1 %v1719_v7 }
  0x43   :  { %909 = vmatpush1.bf16.msra.mxu0 %v1714_v8  ;;  %962 = vmatpush1.bf16.msra.mxu1 %v1717_v9 }
  0x44   :  { %910 = vmatprep.subr.bf16.mxu0 %v1722_v10  ;;  %963 = vmatprep.subr.bf16.mxu1 %v1725_v11 }
  0x47   :  { %911 = vmatpush1.bf16.msra.mxu0 %v1720_v12  ;;  %964 = vmatpush1.bf16.msra.mxu1 %v1723_v13 }
  0x48   :  { %1000 = vmatprep.subr.bf16.mxu0 %v1728_v14  ;;  %1053 = vmatprep.subr.bf16.mxu1 %v1731_v15 }
  0x4a   :  { %927 = vmatmul.mubr.bf16.vlgmr.msra.gmra.mrb[8].mxu0 %v1938_v40  ;;  %980 = vmatmul.mubr.bf16.vlgmr.msra.gmra.mrb[8].mxu1 %v1938_v40 }
  0x4b   :  { %1001 = vmatpush1.bf16.msra.mxu0 %v1726_v16  ;;  %1054 = vmatpush1.bf16.msra.mxu1 %v1729_v17 }
  0x4c   :  { %1002 = vmatprep.subr.bf16.mxu0 %v1734_v18  ;;  %1055 = vmatprep.subr.bf16.mxu1 %v1737_v19 }
  0x4d   :  { %1526 = vmatprep.mubr.msk.bf16.mxu0 %vm781_vm0, %v1981_v53  ;;  %1528 = vmatprep.mubr.msk.bf16.mxu1 %vm781_vm0, %v1981_v53 }
  0x4f   :  { %1003 = vmatpush1.bf16.msra.mxu0 %v1732_v20  ;;  %1056 = vmatpush1.bf16.msra.mxu1 %v1735_v21 }
  0x50   :  { %1004 = vmatprep.subr.bf16.mxu0 %v1740_v22  ;;  %1057 = vmatprep.subr.bf16.mxu1 %v1743_v23 }
  0x52   :  { %937 = vmatmul.mubr.bf16.gmra.mrb[12].mxu0 %v1986_v54  ;;  %990 = vmatmul.mubr.bf16.gmra.mrb[12].mxu1 %v1986_v54 }
  0x53   :  { %1005 = vmatpush1.bf16.msra.mxu0 %v1738_v25  ;;  %1058 = vmatpush1.bf16.msra.mxu1 %v1741_v26 }
  0x54   :  { %1006 = vmatprep.subr.bf16.mxu0 %v1746_v27  ;;  %1059 = vmatprep.subr.bf16.mxu1 %v1749_v28 }
  0x55   :  { %1529 = vmatprep.mubr.msk.bf16.mxu0 %vm781_vm0, %v1902_v30  ;;  %1531 = vmatprep.mubr.msk.bf16.mxu1 %vm781_vm0, %v1902_v30 }
  0x57   :  { %1007 = vmatpush1.bf16.msra.mxu0 %v1744_v29  ;;  %1060 = vmatpush1.bf16.msra.mxu1 %v1747_v31 }
  0x58   :  { %1008 = vmatprep.subr.bf16.mxu0 %v1752_v34  ;;  %1061 = vmatprep.subr.bf16.mxu1 %v1755_v35 }
  0x5b   :  { %1009 = vmatpush1.bf16.msra.mxu0 %v1750_v36  ;;  %1062 = vmatpush1.bf16.msra.mxu1 %v1753_v37 }
  0x5c   :  { %1010 = vmatprep.subr.bf16.mxu0 %v1758_v39  ;;  %1063 = vmatprep.subr.bf16.mxu1 %v1761_v41 }
  0x5f   :  { %1011 = vmatpush1.bf16.msra.mxu0 %v1756_v42  ;;  %1064 = vmatpush1.bf16.msra.mxu1 %v1759_v43 }
  0x60   :  { %1012 = vmatprep.subr.bf16.mxu0 %v1764_v44  ;;  %1065 = vmatprep.subr.bf16.mxu1 %v1767_v45 }
  0x63   :  { %1013 = vmatpush1.bf16.msra.mxu0 %v1762_v46  ;;  %1066 = vmatpush1.bf16.msra.mxu1 %v1765_v47 }
  0x64   :  { %1014 = vmatprep.subr.bf16.mxu0 %v1770_v48  ;;  %1067 = vmatprep.subr.bf16.mxu1 %v1773_v49 }
  0x67   :  { %1015 = vmatpush1.bf16.msra.mxu0 %v1768_v50  ;;  %1068 = vmatpush1.bf16.msra.mxu1 %v1771_v51 }
  0x68   :  { %1016 = vmatprep.subr.bf16.mxu0 %v1776_v52  ;;  %1069 = vmatprep.subr.bf16.mxu1 %v1779_v55 }
  0x6b   :  { %1017 = vmatpush1.bf16.msra.mxu0 %v1774_v56  ;;  %1070 = vmatpush1.bf16.msra.mxu1 %v1777_v57 }
  0x6c   :  { %1106 = vmatprep.subr.bf16.mxu0 %v1789_v1  ;;  %1591 = vmatprep.subr.bf16.mxu1 %v1789_v1 }
  0x6e   :  { %1033 = vmatmul.mubr.bf16.vlgmr.msra.gmra.mrb[16].mxu0 %v1938_v40  ;;  %1086 = vmatmul.mubr.bf16.vlgmr.msra.gmra.mrb[16].mxu1 %v1938_v40 }
  0x6f   :  { %1107 = vmatpush1.bf16.msra.mxu0 %v1780_v58  ;;  %1600 = vmatpush1.bf16.msra.mxu1 %v1780_v58 }
  0x70   :  { %1108 = vmatprep.subr.bf16.mxu0 %v1789_v1  ;;  %1592 = vmatprep.subr.bf16.mxu1 %v1789_v1 }
  0x71   :  { %1530 = vmatprep.mubr.msk.bf16.mxu0 %vm781_vm0, %v1981_v53  ;;  %1532 = vmatprep.mubr.msk.bf16.mxu1 %vm781_vm0, %v1981_v53 }
  0x73   :  { %1109 = vmatpush1.bf16.msra.mxu0 %v1781_v59  ;;  %1601 = vmatpush1.bf16.msra.mxu1 %v1781_v59 }
  0x74   :  { %1110 = vmatprep.subr.bf16.mxu0 %v1789_v1  ;;  %1593 = vmatprep.subr.bf16.mxu1 %v1789_v1 }
  0x76   :  { %1043 = vmatmul.mubr.bf16.gmra.mrb[20].mxu0 %v1986_v54  ;;  %1096 = vmatmul.mubr.bf16.gmra.mrb[20].mxu1 %v1986_v54 }
  0x77   :  { %1111 = vmatpush1.bf16.msra.mxu0 %v1782_v60  ;;  %1602 = vmatpush1.bf16.msra.mxu1 %v1782_v60 }
  0x78   :  { %1112 = vmatprep.subr.bf16.mxu0 %v1789_v1  ;;  %1594 = vmatprep.subr.bf16.mxu1 %v1789_v1 }
  0x79   :  { %1533 = vmatprep.mubr.msk.bf16.mxu0 %vm781_vm0, %v1902_v30  ;;  %1534 = vmatprep.mubr.msk.bf16.mxu1 %vm781_vm0, %v1981_v53  ;;  %v1786_v30 = vld [vmem:[%s2399_s0 + $0x2a0] ss:$52 sps:$4 sm:$0xff]   ;;  %v1787_v53 = vld [vmem:[%s2399_s0 + $0x308] ss:$52 sps:$4 sm:$0xff]  }
  0x7b   :  { %1113 = vmatpush1.bf16.msra.mxu0 %v1783_v61  ;;  %1603 = vmatpush1.bf16.msra.mxu1 %v1783_v61 }
  0x7c   :  { %1114 = vmatprep.subr.bf16.mxu0 %v1789_v1  ;;  %1595 = vmatprep.subr.bf16.mxu1 %v1789_v1 }
  0x7f   :  { %1115 = vmatpush1.bf16.msra.mxu0 %v1784_v62  ;;  %1604 = vmatpush1.bf16.msra.mxu1 %v1784_v62 }
  0x80   :  { %1116 = vmatprep.subr.bf16.mxu0 %v1789_v1  ;;  %1596 = vmatprep.subr.bf16.mxu1 %v1789_v1 }
  0x83   :  { %1117 = vmatpush1.bf16.msra.mxu0 %v1785_v63  ;;  %1605 = vmatpush1.bf16.msra.mxu1 %v1785_v63 }
  0x84   :  { %1118 = vmatprep.subr.bf16.mxu0 %v1789_v1  ;;  %1597 = vmatprep.subr.bf16.mxu1 %v1789_v1 }
  0x87   :  { %1119 = vmatpush1.bf16.msra.mxu0 %v1786_v30  ;;  %1606 = vmatpush1.bf16.msra.mxu1 %v1786_v30 }
  0x88   :  { %1120 = vmatprep.subr.bf16.mxu0 %v1789_v1  ;;  %1598 = vmatprep.subr.bf16.mxu1 %v1789_v1 }
  0x8b   :  { %1121 = vmatpush1.bf16.msra.mxu0 %v1787_v53  ;;  %1607 = vmatpush1.bf16.msra.mxu1 %v1787_v53 }
  0x8c   :  { %1122 = vmatprep.subr.bf16.mxu0 %v1789_v1  ;;  %1599 = vmatprep.subr.bf16.mxu1 %v1789_v1 }
  0x8f   :  { %1123 = vmatpush1.bf16.msra.mxu0 %v1788_v0  ;;  %1608 = vmatpush1.bf16.msra.mxu1 %v1788_v0 }
  0x92   :  { %1139 = vmatmul.mubr.bf16.vlgmr.msra.gmra.mrb[24].mxu0 %v1938_v40  ;;  %1147 = vmatmul.mubr.bf16.vlgmr.msra.gmra.mrb[24].mxu1 %v1986_v54 }
  0x9d   :  { %v2255_v2 = vpop.permute.xlu0 %151 }
  0xa0   :  { %v2259_v4 = vpop.permute.xlu1 %161 }
  0xa1   :  { %v2257_v3 = vpop.permute.xlu0 %156 }
  0xa4   :  { %v2269_v28 = vpop.permute.xlu1 %166 }
  0xf9   :  { %v822_v5 = vpop.f32.mrb[0].mxu0  ;;  %v875_v6 = vpop.f32.mrb[0].mxu1 }
  0xfa   :  { %v823_v7 = vadd.f32 %v822_v5, %v2255_v2  ;;  %v876_v8 = vadd.f32 %v875_v6, %v2255_v2  ;;  %v824_v9 = vpop.f32.mrb[1].mxu0  ;;  %v877_v1 = vpop.f32.mrb[1].mxu1 }
  0xfb   :  { %v825_v10 = vadd.f32 %v824_v9, %v2255_v2  ;;  %v878_v40 = vadd.f32 %v877_v1, %v2255_v2  ;;  %v826_v11 = vpop.f32.mrb[2].mxu0  ;;  %v879_v54 = vpop.f32.mrb[2].mxu1 }
  0xfc   :  { %v1155_v12 = vmax.f32 %v823_v7, 0.0  ;;  %v1157_v13 = vmax.f32 %v876_v8, 0.0  ;;  %v827_v14 = vadd.f32 %v826_v11, %v2257_v3  ;;  %v880_v15 = vadd.f32 %v879_v54, %v2257_v3  ;;  %v828_v16 = vpop.f32.mrb[3].mxu0  ;;  %v881_v17 = vpop.f32.mrb[3].mxu1 }
  0xfd   :  { %v1156_v18 = vmax.f32 %v825_v10, 0.0  ;;  %v1158_v19 = vmax.f32 %v878_v40, 0.0  ;;  %v829_v20 = vadd.f32 %v828_v16, %v2257_v3  ;;  %v882_v21 = vadd.f32 %v881_v17, %v2257_v3 }
  0xfe   :  { %v1168_v22 = vmax.f32 %v827_v14, 0.0  ;;  %v1170_v23 = vmax.f32 %v880_v15, 0.0 }
  0xff   :  { %v1563_v24 = vpack.c.bf16 %v1156_v18, %v1155_v12  ;;  %v1564_v25 = vpack.c.bf16 %v1158_v19, %v1157_v13  ;;  %v1169_v26 = vmax.f32 %v829_v20, 0.0  ;;  %v1171_v27 = vmax.f32 %v882_v21, 0.0 }
 0x101   :  { %1367 = vst [vmem:[%s2402_s3] sm:$0xff] %v1563_v24  ;;  %1368 = vst [vmem:[%s2402_s3 + $0x8] sm:$0xff] %v1564_v25  ;;  %v1570_v29 = vpack.c.bf16 %v1169_v26, %v1168_v22  ;;  %v1571_v31 = vpack.c.bf16 %v1171_v27, %v1170_v23  ;;  %v832_v32 = vpop.f32.mrb[4].mxu0  ;;  %v885_v33 = vpop.f32.mrb[4].mxu1 }
 0x102   :  { %v833_v34 = vadd.f32 %v832_v32, %v2259_v4  ;;  %v886_v35 = vadd.f32 %v885_v33, %v2259_v4  ;;  %v834_v36 = vpop.f32.mrb[5].mxu0  ;;  %v887_v37 = vpop.f32.mrb[5].mxu1 }
 0x103   :  { %1375 = vst [vmem:[%s2402_s3 + $0x34] sm:$0xff] %v1570_v29  ;;  %1376 = vst [vmem:[%s2402_s3 + $0x3c] sm:$0xff] %v1571_v31  ;;  %v835_v38 = vadd.f32 %v834_v36, %v2259_v4  ;;  %v888_v39 = vadd.f32 %v887_v37, %v2259_v4  ;;  %v836_v41 = vpop.f32.mrb[6].mxu0  ;;  %v889_v42 = vpop.f32.mrb[6].mxu1 }
 0x104   :  { %v1181_v43 = vmax.f32 %v833_v34, 0.0  ;;  %v1183_v44 = vmax.f32 %v886_v35, 0.0  ;;  %v837_v45 = vadd.f32 %v836_v41, %v2269_v28  ;;  %v838_v46 = vpop.f32.mrb[7].mxu0  ;;  %v890_v47 = vadd.f32 %v889_v42, %v2269_v28  ;;  %v891_v48 = vpop.f32.mrb[7].mxu1 }
 0x105   :  { %v1182_v49 = vmax.f32 %v835_v38, 0.0  ;;  %v1184_v50 = vmax.f32 %v888_v39, 0.0  ;;  %v839_v51 = vadd.f32 %v838_v46, %v2269_v28  ;;  %v892_v52 = vadd.f32 %v891_v48, %v2269_v28 }
 0x106   :  { %v1194_v55 = vmax.f32 %v837_v45, 0.0  ;;  %v1196_v56 = vmax.f32 %v890_v47, 0.0 }
 0x107   :  { %v1577_v57 = vpack.c.bf16 %v1182_v49, %v1181_v43  ;;  %v1578_v58 = vpack.c.bf16 %v1184_v50, %v1183_v44  ;;  %v1195_v59 = vmax.f32 %v839_v51, 0.0  ;;  %v1197_v60 = vmax.f32 %v892_v52, 0.0 }
 0x109   :  { %1382 = vst [vmem:[%s2402_s3 + $0x68] sm:$0xff] %v1577_v57  ;;  %1383 = vst [vmem:[%s2402_s3 + $0x70] sm:$0xff] %v1578_v58  ;;  %v1584_v61 = vpack.c.bf16 %v1195_v59, %v1194_v55  ;;  %v1585_v62 = vpack.c.bf16 %v1197_v60, %v1196_v56 }
 0x10b   :  { %1389 = vst [vmem:[%s2402_s3 + $0x9c] sm:$0xff] %v1584_v61  ;;  %1390 = vst [vmem:[%s2402_s3 + $0xa4] sm:$0xff] %v1585_v62 }
 0x11d   :  { %v928_v63 = vpop.f32.mrb[8].mxu0  ;;  %v981_v30 = vpop.f32.mrb[8].mxu1 }
 0x11e   :  { %v929_v53 = vadd.f32 %v928_v63, %v2255_v2  ;;  %v982_v0 = vadd.f32 %v981_v30, %v2255_v2  ;;  %v930_v5 = vpop.f32.mrb[9].mxu0  ;;  %v983_v6 = vpop.f32.mrb[9].mxu1 }
 0x11f   :  { %v931_v7 = vadd.f32 %v930_v5, %v2255_v2  ;;  %v984_v8 = vadd.f32 %v983_v6, %v2255_v2  ;;  %v932_v9 = vpop.f32.mrb[10].mxu0  ;;  %v985_v1 = vpop.f32.mrb[10].mxu1 }
 0x120   :  { %v1159_v10 = vmax.f32 %v929_v53, 0.0  ;;  %v1161_v40 = vmax.f32 %v982_v0, 0.0  ;;  %v933_v11 = vadd.f32 %v932_v9, %v2257_v3  ;;  %v986_v54 = vadd.f32 %v985_v1, %v2257_v3  ;;  %v934_v12 = vpop.f32.mrb[11].mxu0  ;;  %v987_v13 = vpop.f32.mrb[11].mxu1 }
 0x121   :  { %v1160_v14 = vmax.f32 %v931_v7, 0.0  ;;  %v1162_v15 = vmax.f32 %v984_v8, 0.0  ;;  %v935_v16 = vadd.f32 %v934_v12, %v2257_v3  ;;  %v988_v17 = vadd.f32 %v987_v13, %v2257_v3 }
 0x122   :  { %v1172_v18 = vmax.f32 %v933_v11, 0.0  ;;  %v1174_v19 = vmax.f32 %v986_v54, 0.0 }
 0x123   :  { %v1565_v20 = vpack.c.bf16 %v1160_v14, %v1159_v10  ;;  %v1566_v21 = vpack.c.bf16 %v1162_v15, %v1161_v40  ;;  %v1173_v22 = vmax.f32 %v935_v16, 0.0  ;;  %v1175_v23 = vmax.f32 %v988_v17, 0.0 }
 0x125   :  { %1369 = vst [vmem:[%s2402_s3 + $0x10] sm:$0xff] %v1565_v20  ;;  %1370 = vst [vmem:[%s2402_s3 + $0x18] sm:$0xff] %v1566_v21  ;;  %v1572_v24 = vpack.c.bf16 %v1173_v22, %v1172_v18  ;;  %v1573_v25 = vpack.c.bf16 %v1175_v23, %v1174_v19  ;;  %v938_v26 = vpop.f32.mrb[12].mxu0  ;;  %v991_v27 = vpop.f32.mrb[12].mxu1 }
 0x126   :  { %v939_v29 = vadd.f32 %v938_v26, %v2259_v4  ;;  %v992_v31 = vadd.f32 %v991_v27, %v2259_v4  ;;  %v940_v32 = vpop.f32.mrb[13].mxu0  ;;  %v993_v33 = vpop.f32.mrb[13].mxu1 }
 0x127   :  { %1377 = vst [vmem:[%s2402_s3 + $0x44] sm:$0xff] %v1572_v24  ;;  %1378 = vst [vmem:[%s2402_s3 + $0x4c] sm:$0xff] %v1573_v25  ;;  %v941_v34 = vadd.f32 %v940_v32, %v2259_v4  ;;  %v994_v35 = vadd.f32 %v993_v33, %v2259_v4  ;;  %v942_v36 = vpop.f32.mrb[14].mxu0  ;;  %v995_v37 = vpop.f32.mrb[14].mxu1 }
 0x128   :  { %v1185_v38 = vmax.f32 %v939_v29, 0.0  ;;  %v1187_v39 = vmax.f32 %v992_v31, 0.0  ;;  %v943_v41 = vadd.f32 %v942_v36, %v2269_v28  ;;  %v996_v42 = vadd.f32 %v995_v37, %v2269_v28  ;;  %v944_v43 = vpop.f32.mrb[15].mxu0  ;;  %v997_v44 = vpop.f32.mrb[15].mxu1 }
 0x129   :  { %v1186_v45 = vmax.f32 %v941_v34, 0.0  ;;  %v1188_v46 = vmax.f32 %v994_v35, 0.0  ;;  %v945_v47 = vadd.f32 %v944_v43, %v2269_v28  ;;  %v998_v48 = vadd.f32 %v997_v44, %v2269_v28 }
 0x12a   :  { %v1198_v49 = vmax.f32 %v943_v41, 0.0  ;;  %v1200_v50 = vmax.f32 %v996_v42, 0.0 }
 0x12b   :  { %v1579_v51 = vpack.c.bf16 %v1186_v45, %v1185_v38  ;;  %v1580_v52 = vpack.c.bf16 %v1188_v46, %v1187_v39  ;;  %v1199_v55 = vmax.f32 %v945_v47, 0.0  ;;  %v1201_v56 = vmax.f32 %v998_v48, 0.0 }
 0x12d   :  { %1384 = vst [vmem:[%s2402_s3 + $0x78] sm:$0xff] %v1579_v51  ;;  %1385 = vst [vmem:[%s2402_s3 + $0x80] sm:$0xff] %v1580_v52  ;;  %v1586_v57 = vpack.c.bf16 %v1199_v55, %v1198_v49  ;;  %v1587_v58 = vpack.c.bf16 %v1201_v56, %v1200_v50 }
 0x12f   :  { %1391 = vst [vmem:[%s2402_s3 + $0xac] sm:$0xff] %v1586_v57  ;;  %1392 = vst [vmem:[%s2402_s3 + $0xb4] sm:$0xff] %v1587_v58 }
 0x141   :  { %v1034_v59 = vpop.f32.mrb[16].mxu0  ;;  %v1087_v60 = vpop.f32.mrb[16].mxu1 }
 0x142   :  { %v1035_v61 = vadd.f32 %v1034_v59, %v2255_v2  ;;  %v1088_v62 = vadd.f32 %v1087_v60, %v2255_v2  ;;  %v1036_v63 = vpop.f32.mrb[17].mxu0  ;;  %v1089_v30 = vpop.f32.mrb[17].mxu1 }
 0x143   :  { %v1037_v53 = vadd.f32 %v1036_v63, %v2255_v2  ;;  %v1090_v0 = vadd.f32 %v1089_v30, %v2255_v2  ;;  %v1038_v5 = vpop.f32.mrb[18].mxu0  ;;  %v1091_v6 = vpop.f32.mrb[18].mxu1 }
 0x144   :  { %v1163_v7 = vmax.f32 %v1035_v61, 0.0  ;;  %v1165_v8 = vmax.f32 %v1088_v62, 0.0  ;;  %v1039_v9 = vadd.f32 %v1038_v5, %v2257_v3  ;;  %v1092_v1 = vadd.f32 %v1091_v6, %v2257_v3  ;;  %v1040_v10 = vpop.f32.mrb[19].mxu0  ;;  %v1093_v40 = vpop.f32.mrb[19].mxu1 }
 0x145   :  { %v1164_v11 = vmax.f32 %v1037_v53, 0.0  ;;  %v1166_v54 = vmax.f32 %v1090_v0, 0.0  ;;  %v1041_v12 = vadd.f32 %v1040_v10, %v2257_v3  ;;  %v1094_v13 = vadd.f32 %v1093_v40, %v2257_v3 }
 0x146   :  { %v1176_v14 = vmax.f32 %v1039_v9, 0.0  ;;  %v1178_v15 = vmax.f32 %v1092_v1, 0.0 }
 0x147   :  { %v1567_v16 = vpack.c.bf16 %v1164_v11, %v1163_v7  ;;  %v1568_v17 = vpack.c.bf16 %v1166_v54, %v1165_v8  ;;  %v1177_v18 = vmax.f32 %v1041_v12, 0.0  ;;  %v1179_v19 = vmax.f32 %v1094_v13, 0.0 }
 0x149   :  { %1371 = vst [vmem:[%s2402_s3 + $0x20] sm:$0xff] %v1567_v16  ;;  %1372 = vst [vmem:[%s2402_s3 + $0x28] sm:$0xff] %v1568_v17  ;;  %v1574_v20 = vpack.c.bf16 %v1177_v18, %v1176_v14  ;;  %v1575_v21 = vpack.c.bf16 %v1179_v19, %v1178_v15  ;;  %v1044_v22 = vpop.f32.mrb[20].mxu0  ;;  %v1097_v23 = vpop.f32.mrb[20].mxu1 }
 0x14a   :  { %v1045_v24 = vadd.f32 %v1044_v22, %v2259_v4  ;;  %v1098_v25 = vadd.f32 %v1097_v23, %v2259_v4  ;;  %v1046_v26 = vpop.f32.mrb[21].mxu0  ;;  %v1099_v27 = vpop.f32.mrb[21].mxu1 }
 0x14b   :  { %1379 = vst [vmem:[%s2402_s3 + $0x54] sm:$0xff] %v1574_v20  ;;  %1380 = vst [vmem:[%s2402_s3 + $0x5c] sm:$0xff] %v1575_v21  ;;  %v1047_v29 = vadd.f32 %v1046_v26, %v2259_v4  ;;  %v1100_v31 = vadd.f32 %v1099_v27, %v2259_v4  ;;  %v1048_v32 = vpop.f32.mrb[22].mxu0  ;;  %v1101_v33 = vpop.f32.mrb[22].mxu1 }
 0x14c   :  { %v1189_v34 = vmax.f32 %v1045_v24, 0.0  ;;  %v1191_v35 = vmax.f32 %v1098_v25, 0.0  ;;  %v1049_v36 = vadd.f32 %v1048_v32, %v2269_v28  ;;  %v1102_v37 = vadd.f32 %v1101_v33, %v2269_v28  ;;  %v1050_v38 = vpop.f32.mrb[23].mxu0  ;;  %v1103_v39 = vpop.f32.mrb[23].mxu1 }
 0x14d   :  { %v1190_v41 = vmax.f32 %v1047_v29, 0.0  ;;  %v1192_v42 = vmax.f32 %v1100_v31, 0.0  ;;  %v1051_v43 = vadd.f32 %v1050_v38, %v2269_v28  ;;  %v1104_v44 = vadd.f32 %v1103_v39, %v2269_v28 }
 0x14e   :  { %v1202_v45 = vmax.f32 %v1049_v36, 0.0  ;;  %v1204_v46 = vmax.f32 %v1102_v37, 0.0 }
 0x14f   :  { %v1581_v47 = vpack.c.bf16 %v1190_v41, %v1189_v34  ;;  %v1582_v48 = vpack.c.bf16 %v1192_v42, %v1191_v35  ;;  %v1203_v49 = vmax.f32 %v1051_v43, 0.0  ;;  %v1205_v50 = vmax.f32 %v1104_v44, 0.0 }
 0x151   :  { %1386 = vst [vmem:[%s2402_s3 + $0x88] sm:$0xff] %v1581_v47  ;;  %1387 = vst [vmem:[%s2402_s3 + $0x90] sm:$0xff] %v1582_v48  ;;  %v1588_v51 = vpack.c.bf16 %v1203_v49, %v1202_v45  ;;  %v1589_v52 = vpack.c.bf16 %v1205_v50, %v1204_v46 }
 0x153   :  { %1393 = vst [vmem:[%s2402_s3 + $0xbc] sm:$0xff] %v1588_v51  ;;  %1394 = vst [vmem:[%s2402_s3 + $0xc4] sm:$0xff] %v1589_v52 }
 0x165   :  { %v1140_v55 = vpop.f32.mrb[24].mxu0  ;;  %v1148_v56 = vpop.f32.mrb[24].mxu1 }
 0x166   :  { %v1141_v57 = vadd.f32 %v1140_v55, %v2255_v2  ;;  %v1149_v58 = vadd.f32 %v1148_v56, %v2259_v4  ;;  %v1142_v59 = vpop.f32.mrb[25].mxu0  ;;  %v1150_v60 = vpop.f32.mrb[25].mxu1 }
 0x167   :  { %v1143_v61 = vpop.f32.mrb[26].mxu0  ;;  %v1151_v62 = vpop.f32.mrb[26].mxu1 }
 0x168   :  { %v1167_v63 = vmax.f32 %v1141_v57, 0.0  ;;  %v1193_v30 = vmax.f32 %v1149_v58, 0.0  ;;  %v1144_v53 = vadd.f32 %v1143_v61, %v2257_v3  ;;  %v1152_v0 = vadd.f32 %v1151_v62, %v2269_v28  ;;  %v1145_v5 = vpop.f32.mrb[27].mxu0  ;;  %v1153_v6 = vpop.f32.mrb[27].mxu1 }
 0x16a   :  { %v1569_v7 = vpack.c.bf16 %v1167_v63, %v1167_v63  ;;  %v1583_v8 = vpack.c.bf16 %v1193_v30, %v1193_v30  ;;  %v1180_v9 = vmax.f32 %v1144_v53, 0.0  ;;  %v1206_v1 = vmax.f32 %v1152_v0, 0.0 }
 0x16c   :  { %1374 = vst.msk [vmem:[%s2402_s3 + $0x30] sm:$0xf] %vm1373_vm1, %v1569_v7  ;;  %1388 = vst.msk [vmem:[%s2402_s3 + $0x98] sm:$0xf] %vm1373_vm1, %v1583_v8  ;;  %v1576_v2 = vpack.c.bf16 %v1180_v9, %v1180_v9  ;;  %v1590_v4 = vpack.c.bf16 %v1206_v1, %v1206_v1 }
 0x16e   :  { %1381 = vst.msk [vmem:[%s2402_s3 + $0x64] sm:$0xf] %vm1373_vm1, %v1576_v2  ;;  %1395 = vst.msk [vmem:[%s2402_s3 + $0xcc] sm:$0xf] %vm1373_vm1, %v1590_v4 }

// kernel: encoder_forward.8
= control target key start
LH: loop header
LB: loop body
LE: loop exit
PB: predicated region body
PF: predicated region fallthrough
CT: control target
= control target key end

     0   :  { %v1342_v1 = vmov 0   ;;  %vm571_vm0 = vcmask 261120   ;;  %vm1005_vm1 = vcmask 1043456   ;;  %vm1006_vm2 = vcmask 64516   ;;  %s1726_s0 = inlined_call_operand.vmem [shape: bf16[288,392], index: 0, kind: input, shape index: {}]   ;;  %s1727_s1 = inlined_call_operand.vmem [shape: bf16[64,288], index: 1, kind: input, shape index: {}]   ;;  %s1728_s2 = inlined_call_operand.vmem [shape: f32[64,1], index: 2, kind: input, shape index: {}]   ;;  %s1729_s3 = inlined_call_operand.vmem [shape: bf16[64,392], index: 3, kind: output, shape index: {}]  }
   0x1   :  { %v1218_v0 = vld [vmem:[%s1726_s0 + $0x4] ss:$16 sps:$4 sm:$0xff]   ;;  %1216 = vset.pattern.permute.xlu0 %v1342_v1  ;;  %1217 = vset.pattern.permute.xlu1 %v1342_v1  ;;  %v1220_v2 = vld [vmem:[%s1726_s0 + $0xc] ss:$16 sps:$4 sm:$0xff]   ;;  %v1222_v3 = vld [vmem:[%s1726_s0] ss:$16 sps:$4 sm:$0xff]  }
   0x2   :  { %584 = vmatprep.subr.bf16.mxu0 %v1218_v0  ;;  %v1223_v4 = vld [vmem:[%s1726_s0 + $0x8] ss:$16 sps:$4 sm:$0xff]   ;;  %730 = vmatprep.subr.bf16.mxu1 %v1220_v2  ;;  %v1224_v5 = vld [vmem:[%s1726_s0 + $0x24] ss:$16 sps:$4 sm:$0xff]   ;;  %v1226_v6 = vld [vmem:[%s1726_s0 + $0x2c] ss:$16 sps:$4 sm:$0xff]  }
   0x3   :  { %585 = vmatpush1.bf16.msra.mxu0 %v1222_v3  ;;  %731 = vmatpush1.bf16.msra.mxu1 %v1223_v4  ;;  %v1228_v7 = vld [vmem:[%s1726_s0 + $0x20] ss:$16 sps:$4 sm:$0xff]   ;;  %v1229_v8 = vld [vmem:[%s1726_s0 + $0x28] ss:$16 sps:$4 sm:$0xff]   ;;  %v1230_v9 = vld [vmem:[%s1726_s0 + $0x44] ss:$16 sps:$4 sm:$0xff]  }
   0x4   :  { %586 = vmatprep.subr.bf16.mxu0 %v1224_v5  ;;  %732 = vmatprep.subr.bf16.mxu1 %v1226_v6  ;;  %v1232_v10 = vld [vmem:[%s1726_s0 + $0x4c] ss:$16 sps:$4 sm:$0xff]   ;;  %v1234_v11 = vld [vmem:[%s1726_s0 + $0x40] ss:$16 sps:$4 sm:$0xff]   ;;  %v1235_v12 = vld [vmem:[%s1726_s0 + $0x48] ss:$16 sps:$4 sm:$0xff]  }
   0x5   :  { %v1236_v13 = vld [vmem:[%s1726_s0 + $0x64] ss:$16 sps:$4 sm:$0xff]   ;;  %v1238_v14 = vld [vmem:[%s1726_s0 + $0x6c] ss:$16 sps:$4 sm:$0xff]   ;;  %v1240_v15 = vld [vmem:[%s1726_s0 + $0x60] ss:$16 sps:$4 sm:$0xff]  }
   0x6   :  { %v1241_v16 = vld [vmem:[%s1726_s0 + $0x68] ss:$16 sps:$4 sm:$0xff]   ;;  %v1242_v17 = vld [vmem:[%s1726_s0 + $0x84] ss:$16 sps:$4 sm:$0xff]   ;;  %v1244_v18 = vld [vmem:[%s1726_s0 + $0x8c] ss:$16 sps:$4 sm:$0xff]  }
   0x7   :  { %587 = vmatpush1.bf16.msra.mxu0 %v1228_v7  ;;  %733 = vmatpush1.bf16.msra.mxu1 %v1229_v8  ;;  %v1246_v19 = vld [vmem:[%s1726_s0 + $0x80] ss:$16 sps:$4 sm:$0xff]   ;;  %v1247_v20 = vld [vmem:[%s1726_s0 + $0x88] ss:$16 sps:$4 sm:$0xff]   ;;  %v1248_v21 = vld [vmem:[%s1726_s0 + $0xa4] ss:$16 sps:$4 sm:$0xff]  }
   0x8   :  { %588 = vmatprep.subr.bf16.mxu0 %v1230_v9  ;;  %734 = vmatprep.subr.bf16.mxu1 %v1232_v10  ;;  %v1250_v22 = vld [vmem:[%s1726_s0 + $0xac] ss:$16 sps:$4 sm:$0xff]   ;;  %v1252_v23 = vld [vmem:[%s1726_s0 + $0xa0] ss:$16 sps:$4 sm:$0xff]   ;;  %v1253_v24 = vld [vmem:[%s1726_s0 + $0xa8] ss:$16 sps:$4 sm:$0xff]  }
   0x9   :  { %v1254_v25 = vld [vmem:[%s1726_s0 + $0xc4] ss:$16 sps:$4 sm:$0xff]   ;;  %v1256_v26 = vld [vmem:[%s1726_s0 + $0xcc] ss:$16 sps:$4 sm:$0xff]   ;;  %v1258_v27 = vld [vmem:[%s1726_s0 + $0xc0] ss:$16 sps:$4 sm:$0xff]  }
   0xa   :  { %v1259_v28 = vld [vmem:[%s1726_s0 + $0xc8] ss:$16 sps:$4 sm:$0xff]   ;;  %v1260_v29 = vld [vmem:[%s1726_s0 + $0xe4] ss:$16 sps:$4 sm:$0xff]   ;;  %v1262_v30 = vld [vmem:[%s1726_s0 + $0xec] ss:$16 sps:$4 sm:$0xff]  }
   0xb   :  { %589 = vmatpush1.bf16.msra.mxu0 %v1234_v11  ;;  %735 = vmatpush1.bf16.msra.mxu1 %v1235_v12  ;;  %v1264_v31 = vld [vmem:[%s1726_s0 + $0xe0] ss:$16 sps:$4 sm:$0xff]   ;;  %v1265_v32 = vld [vmem:[%s1726_s0 + $0xe8] ss:$16 sps:$4 sm:$0xff]   ;;  %v1266_v33 = vld [vmem:[%s1726_s0 + $0x104] ss:$16 sps:$4 sm:$0xff]  }
   0xc   :  { %590 = vmatprep.subr.bf16.mxu0 %v1236_v13  ;;  %736 = vmatprep.subr.bf16.mxu1 %v1238_v14  ;;  %v1268_v34 = vld [vmem:[%s1726_s0 + $0x10c] ss:$16 sps:$4 sm:$0xff]   ;;  %v1270_v35 = vld [vmem:[%s1726_s0 + $0x100] ss:$16 sps:$4 sm:$0xff]   ;;  %v1271_v36 = vld [vmem:[%s1726_s0 + $0x108] ss:$16 sps:$4 sm:$0xff]  }
   0xd   :  { %v1272_v37 = vld [vmem:[%s1726_s0 + $0x124] ss:$16 sps:$4 sm:$0xff]   ;;  %v1274_v38 = vld [vmem:[%s1726_s0 + $0x12c] ss:$16 sps:$4 sm:$0xff]   ;;  %v1276_v39 = vld [vmem:[%s1726_s0 + $0x120] ss:$16 sps:$4 sm:$0xff]  }
   0xe   :  { %v1277_v40 = vld [vmem:[%s1726_s0 + $0x128] ss:$16 sps:$4 sm:$0xff]   ;;  %v1278_v41 = vld [vmem:[%s1726_s0 + $0x144] ss:$16 sps:$4 sm:$0xff]   ;;  %v1280_v42 = vld [vmem:[%s1726_s0 + $0x14c] ss:$16 sps:$4 sm:$0xff]  }
   0xf   :  { %591 = vmatpush1.bf16.msra.mxu0 %v1240_v15  ;;  %737 = vmatpush1.bf16.msra.mxu1 %v1241_v16  ;;  %v1282_v43 = vld [vmem:[%s1726_s0 + $0x140] ss:$16 sps:$4 sm:$0xff]   ;;  %v1283_v44 = vld [vmem:[%s1726_s0 + $0x148] ss:$16 sps:$4 sm:$0xff]   ;;  %v1284_v45 = vld [vmem:[%s1726_s0 + $0x164] ss:$16 sps:$4 sm:$0xff]  }
  0x10   :  { %592 = vmatprep.subr.bf16.mxu0 %v1242_v17  ;;  %738 = vmatprep.subr.bf16.mxu1 %v1244_v18  ;;  %v1286_v46 = vld [vmem:[%s1726_s0 + $0x16c] ss:$16 sps:$4 sm:$0xff]   ;;  %v1288_v47 = vld [vmem:[%s1726_s0 + $0x160] ss:$16 sps:$4 sm:$0xff]   ;;  %v1289_v48 = vld [vmem:[%s1726_s0 + $0x168] ss:$16 sps:$4 sm:$0xff]  }
  0x11   :  { %v1316_v49 = vld [vmem:[%s1727_s1 + $0x4] ss:$12 sps:$4 sm:$0xff]   ;;  %v1292_v51 = vld [vmem:[%s1726_s0 + $0x18c] ss:$16 sps:$4 sm:$0xff]   ;;  %v1295_v53 = vld [vmem:[%s1726_s0 + $0x188] ss:$16 sps:$4 sm:$0xff]  }
  0x12   :  { %v1290_v50 = vld [vmem:[%s1726_s0 + $0x184] ss:$16 sps:$4 sm:$0xff]   ;;  %616 = vmatprep.mubr.bf16.mxu0 %v1316_v49  ;;  %762 = vmatprep.mubr.bf16.mxu1 %v1316_v49  ;;  %v1294_v52 = vld [vmem:[%s1726_s0 + $0x180] ss:$16 sps:$4 sm:$0xff]   ;;  %v1298_v55 = vld [vmem:[%s1726_s0 + $0x1ac] ss:$16 sps:$4 sm:$0xff]  }
  0x13   :  { %593 = vmatpush1.bf16.msra.mxu0 %v1246_v19  ;;  %739 = vmatpush1.bf16.msra.mxu1 %v1247_v20  ;;  %v1296_v54 = vld [vmem:[%s1726_s0 + $0x1a4] ss:$16 sps:$4 sm:$0xff]   ;;  %v1300_v56 = vld [vmem:[%s1726_s0 + $0x1a0] ss:$16 sps:$4 sm:$0xff]   ;;  %v1301_v57 = vld [vmem:[%s1726_s0 + $0x1a8] ss:$16 sps:$4 sm:$0xff]  }
  0x14   :  { %594 = vmatprep.subr.bf16.mxu0 %v1248_v21  ;;  %740 = vmatprep.subr.bf16.mxu1 %v1250_v22  ;;  %v1302_v58 = vld [vmem:[%s1726_s0 + $0x1c4] ss:$16 sps:$4 sm:$0xff]   ;;  %v1304_v59 = vld [vmem:[%s1726_s0 + $0x1cc] ss:$16 sps:$4 sm:$0xff]   ;;  %v1306_v60 = vld [vmem:[%s1726_s0 + $0x1c0] ss:$16 sps:$4 sm:$0xff]  }
  0x15   :  { %v1307_v61 = vld [vmem:[%s1726_s0 + $0x1c8] ss:$16 sps:$4 sm:$0xff]   ;;  %v1308_v62 = vld [vmem:[%s1726_s0 + $0x1e4] ss:$16 sps:$4 sm:$0xff]   ;;  %v1310_v63 = vld [vmem:[%s1726_s0 + $0x1ec] ss:$16 sps:$4 sm:$0xff]  }
  0x16   :  { %v103_v0 = vld [vmem:[%s1728_s2] sm:$0xff]  ;;  %v105_v2 = vld [vmem:[%s1728_s2 + $0x10] sm:$0xff]  ;;  %v104_v3 = vld [vmem:[%s1728_s2 + $0x8] sm:$0xff] }
  0x17   :  { %595 = vmatpush1.bf16.msra.mxu0 %v1252_v23  ;;  %741 = vmatpush1.bf16.msra.mxu1 %v1253_v24  ;;  %v1312_v4 = vld [vmem:[%s1726_s0 + $0x1e0] ss:$16 sps:$4 sm:$0xff]   ;;  %v1313_v5 = vld [vmem:[%s1726_s0 + $0x1e8] ss:$16 sps:$4 sm:$0xff]   ;;  %v1319_v7 = vld [vmem:[%s1726_s0 + $0x204] ss:$16 sps:$4 sm:$0xff]  }
  0x18   :  { %596 = vmatprep.subr.bf16.mxu0 %v1254_v25  ;;  %742 = vmatprep.subr.bf16.mxu1 %v1256_v26  ;;  %v106_v6 = vld [vmem:[%s1728_s2 + $0x18] sm:$0xff]  ;;  %v1314_v9 = vld [vmem:[%s1727_s1] ss:$12 sps:$4 sm:$0xff]   ;;  %v1331_v14 = vld [vmem:[%s1726_s0 + $0x224] ss:$16 sps:$4 sm:$0xff]  }
  0x19   :  { %113 = vperm.xlu0 %1216, %v103_v0   ;;  %123 = vperm.xlu1 %1217, %v105_v2   ;;  %v1322_v8 = vld [vmem:[%s1726_s0 + $0x20c] ss:$16 sps:$4 sm:$0xff]   ;;  %v107_v10 = vld [vmem:[%s1728_s2 + $0x20] sm:$0xff]  ;;  %v1320_v12 = vld [vmem:[%s1726_s0 + $0x208] ss:$16 sps:$4 sm:$0xff]  }
  0x1a   :  { %v1317_v11 = vld [vmem:[%s1726_s0 + $0x200] ss:$16 sps:$4 sm:$0xff]   ;;  %v1323_v13 = vld [vmem:[%s1727_s1 + $0x1c] ss:$12 sps:$4 sm:$0xff]   ;;  %v1325_v20 = vld [vmem:[%s1727_s1 + $0x18] ss:$12 sps:$4 sm:$0xff]  }
  0x1b   :  { %597 = vmatpush1.bf16.msra.mxu0 %v1258_v27  ;;  %743 = vmatpush1.bf16.msra.mxu1 %v1259_v28  ;;  %v1334_v15 = vld [vmem:[%s1726_s0 + $0x22c] ss:$16 sps:$4 sm:$0xff]   ;;  %v1329_v16 = vld [vmem:[%s1726_s0 + $0x220] ss:$16 sps:$4 sm:$0xff]   ;;  %v1332_v17 = vld [vmem:[%s1726_s0 + $0x228] ss:$16 sps:$4 sm:$0xff]  }
  0x1c   :  { %598 = vmatprep.subr.bf16.mxu0 %v1260_v29  ;;  %744 = vmatprep.subr.bf16.mxu1 %v1262_v30  ;;  %v108_v18 = vld [vmem:[%s1728_s2 + $0x28] sm:$0xff]  ;;  %v109_v19 = vld [vmem:[%s1728_s2 + $0x30] sm:$0xff]  ;;  %v110_v22 = vld [vmem:[%s1728_s2 + $0x38] sm:$0xff] }
  0x1d   :  { %118 = vperm.xlu0 %1216, %v104_v3   ;;  %128 = vperm.xlu1 %1217, %v106_v6   ;;  %v1326_v21 = vld [vmem:[%s1727_s1 + $0x34] ss:$12 sps:$4 sm:$0xff]   ;;  %v1328_v23 = vld [vmem:[%s1727_s1 + $0x30] ss:$12 sps:$4 sm:$0xff]   ;;  %v1335_v24 = vld [vmem:[%s1727_s1 + $0x4c] ss:$12 sps:$4 sm:$0xff]  }
  0x1e   :  { %v1337_v25 = vld [vmem:[%s1727_s1 + $0x48] ss:$12 sps:$4 sm:$0xff]   ;;  %v1339_v27 = vld [vmem:[%s1727_s1 + $0x20] ss:$12 sps:$4 sm:$0xff]   ;;  %v1340_v28 = vld [vmem:[%s1727_s1 + $0x38] ss:$12 sps:$4 sm:$0xff]  }
  0x1f   :  { %599 = vmatpush1.bf16.msra.mxu0 %v1264_v31  ;;  %745 = vmatpush1.bf16.msra.mxu1 %v1265_v32  ;;  %v1338_v26 = vld [vmem:[%s1727_s1 + $0x8] ss:$12 sps:$4 sm:$0xff]   ;;  %v1341_v29 = vld [vmem:[%s1727_s1 + $0x50] ss:$12 sps:$4 sm:$0xff]   ;;  %vm1658_vm3 = vmor %vm1006_vm2, %vm1005_vm1 }
  0x20   :  { %600 = vmatprep.subr.bf16.mxu0 %v1266_v33  ;;  %746 = vmatprep.subr.bf16.mxu1 %v1268_v34 }
  0x21   :  { %133 = vperm.xlu0 %1216, %v107_v10   ;;  %138 = vperm.xlu1 %1217, %v108_v18  }
  0x23   :  { %601 = vmatpush1.bf16.msra.mxu0 %v1270_v35  ;;  %747 = vmatpush1.bf16.msra.mxu1 %v1271_v36 }
  0x24   :  { %602 = vmatprep.subr.bf16.mxu0 %v1272_v37  ;;  %748 = vmatprep.subr.bf16.mxu1 %v1274_v38 }
  0x25   :  { %143 = vperm.xlu0 %1216, %v109_v19   ;;  %148 = vperm.xlu1 %1217, %v110_v22  }
  0x27   :  { %603 = vmatpush1.bf16.msra.mxu0 %v1276_v39  ;;  %749 = vmatpush1.bf16.msra.mxu1 %v1277_v40 }
  0x28   :  { %604 = vmatprep.subr.bf16.mxu0 %v1278_v41  ;;  %750 = vmatprep.subr.bf16.mxu1 %v1280_v42 }
  0x2b   :  { %605 = vmatpush1.bf16.msra.mxu0 %v1282_v43  ;;  %751 = vmatpush1.bf16.msra.mxu1 %v1283_v44 }
  0x2c   :  { %606 = vmatprep.subr.bf16.mxu0 %v1284_v45  ;;  %752 = vmatprep.subr.bf16.mxu1 %v1286_v46 }
  0x2f   :  { %607 = vmatpush1.bf16.msra.mxu0 %v1288_v47  ;;  %753 = vmatpush1.bf16.msra.mxu1 %v1289_v48 }
  0x30   :  { %608 = vmatprep.subr.bf16.mxu0 %v1290_v50  ;;  %754 = vmatprep.subr.bf16.mxu1 %v1292_v51 }
  0x33   :  { %609 = vmatpush1.bf16.msra.mxu0 %v1294_v52  ;;  %755 = vmatpush1.bf16.msra.mxu1 %v1295_v53 }
  0x34   :  { %610 = vmatprep.subr.bf16.mxu0 %v1296_v54  ;;  %756 = vmatprep.subr.bf16.mxu1 %v1298_v55 }
  0x37   :  { %611 = vmatpush1.bf16.msra.mxu0 %v1300_v56  ;;  %757 = vmatpush1.bf16.msra.mxu1 %v1301_v57 }
  0x38   :  { %612 = vmatprep.subr.bf16.mxu0 %v1302_v58  ;;  %758 = vmatprep.subr.bf16.mxu1 %v1304_v59 }
  0x3b   :  { %613 = vmatpush1.bf16.msra.mxu0 %v1306_v60  ;;  %759 = vmatpush1.bf16.msra.mxu1 %v1307_v61 }
  0x3c   :  { %614 = vmatprep.subr.bf16.mxu0 %v1308_v62  ;;  %760 = vmatprep.subr.bf16.mxu1 %v1310_v63 }
  0x3f   :  { %615 = vmatpush1.bf16.msra.mxu0 %v1312_v4  ;;  %761 = vmatpush1.bf16.msra.mxu1 %v1313_v5 }
  0x40   :  { %657 = vmatprep.subr.bf16.mxu0 %v1319_v7  ;;  %803 = vmatprep.subr.bf16.mxu1 %v1322_v8 }
  0x42   :  { %617 = vmatmul.mubr.bf16.vlgmr.msra.gmra.mrb[0].mxu0 %v1314_v9  ;;  %763 = vmatmul.mubr.bf16.vlgmr.msra.gmra.mrb[0].mxu1 %v1314_v9 }
  0x43   :  { %658 = vmatpush1.bf16.msra.mxu0 %v1317_v11  ;;  %804 = vmatpush1.bf16.msra.mxu1 %v1320_v12 }
  0x44   :  { %626 = vmatprep.mubr.bf16.mxu0 %v1323_v13  ;;  %772 = vmatprep.mubr.bf16.mxu1 %v1323_v13 }
  0x45   :  { %659 = vmatprep.subr.bf16.mxu0 %v1331_v14  ;;  %805 = vmatprep.subr.bf16.mxu1 %v1334_v15 }
  0x47   :  { %660 = vmatpush1.bf16.msra.mxu0 %v1329_v16  ;;  %806 = vmatpush1.bf16.msra.mxu1 %v1332_v17 }
  0x4a   :  { %627 = vmatmul.mubr.bf16.gmra.mrb[4].mxu0 %v1325_v20  ;;  %773 = vmatmul.mubr.bf16.gmra.mrb[4].mxu1 %v1325_v20 }
  0x4b   :  { %636 = vmatprep.mubr.bf16.mxu0 %v1326_v21  ;;  %782 = vmatprep.mubr.bf16.mxu1 %v1326_v21 }
  0x52   :  { %637 = vmatmul.mubr.bf16.gmra.mrb[8].mxu0 %v1328_v23  ;;  %783 = vmatmul.mubr.bf16.gmra.mrb[8].mxu1 %v1328_v23 }
  0x53   :  { %646 = vmatprep.mubr.bf16.mxu0 %v1335_v24  ;;  %792 = vmatprep.mubr.bf16.mxu1 %v1335_v24 }
  0x5a   :  { %647 = vmatmul.mubr.bf16.gmra.mrb[12].mxu0 %v1337_v25  ;;  %793 = vmatmul.mubr.bf16.gmra.mrb[12].mxu1 %v1337_v25 }
  0x5b   :  { %689 = vmatprep.mubr.bf16.mxu0 %v1342_v1  ;;  %835 = vmatprep.mubr.bf16.mxu1 %v1342_v1 }
  0x62   :  { %1111 = vmatmul.mubr.msk.bf16.vlgmr.msra.gmra.mrb[0].mxu0 %vm571_vm0, %v1338_v26  ;;  %1115 = vmatmul.mubr.msk.bf16.vlgmr.msra.gmra.mrb[0].mxu1 %vm571_vm0, %v1338_v26 }
  0x63   :  { %699 = vmatprep.mubr.bf16.mxu0 %v1342_v1  ;;  %845 = vmatprep.mubr.bf16.mxu1 %v1342_v1 }
  0x6a   :  { %1112 = vmatmul.mubr.msk.bf16.gmra.mrb[4].mxu0 %vm571_vm0, %v1339_v27  ;;  %1116 = vmatmul.mubr.msk.bf16.gmra.mrb[4].mxu1 %vm571_vm0, %v1339_v27 }
  0x6b   :  { %709 = vmatprep.mubr.bf16.mxu0 %v1342_v1  ;;  %855 = vmatprep.mubr.bf16.mxu1 %v1342_v1 }
  0x72   :  { %1113 = vmatmul.mubr.msk.bf16.gmra.mrb[8].mxu0 %vm571_vm0, %v1340_v28  ;;  %1117 = vmatmul.mubr.msk.bf16.gmra.mrb[8].mxu1 %vm571_vm0, %v1340_v28 }
  0x73   :  { %719 = vmatprep.mubr.bf16.mxu0 %v1342_v1  ;;  %865 = vmatprep.mubr.bf16.mxu1 %v1342_v1 }
  0x7a   :  { %1114 = vmatmul.mubr.msk.bf16.gmra.mrb[12].mxu0 %vm571_vm0, %v1341_v29  ;;  %1118 = vmatmul.mubr.msk.bf16.gmra.mrb[12].mxu1 %vm571_vm0, %v1341_v29 }
  0x98   :  { %v114_v30 = vpop.permute.xlu0 %113  ;;  %v124_v32 = vpop.permute.xlu1 %123 }
  0x9c   :  { %v119_v31 = vpop.permute.xlu0 %118  ;;  %v129_v59 = vpop.permute.xlu1 %128 }
  0xa0   :  { %v139_v25 = vpop.permute.xlu1 %138  ;;  %v134_v26 = vpop.permute.xlu0 %133 }
 0x135   :  { %v691_v33 = vpop.f32.mrb[0].mxu0  ;;  %v837_v34 = vpop.f32.mrb[0].mxu1 }
 0x136   :  { %v1151_v35 = vadd.f32 %v691_v33, %v114_v30  ;;  %v1167_v36 = vadd.f32 %v837_v34, %v114_v30  ;;  %v693_v37 = vpop.f32.mrb[1].mxu0  ;;  %v839_v38 = vpop.f32.mrb[1].mxu1 }
 0x137   :  { %v1152_v39 = vadd.f32 %v693_v37, %v114_v30  ;;  %v1168_v40 = vadd.f32 %v839_v38, %v114_v30  ;;  %v695_v1 = vpop.f32.mrb[2].mxu0  ;;  %v841_v41 = vpop.f32.mrb[2].mxu1 }
 0x138   :  { %v876_v42 = vmax.f32 %v1151_v35, 0.0  ;;  %v878_v43 = vmax.f32 %v1167_v36, 0.0  ;;  %v1153_v44 = vadd.f32 %v695_v1, %v119_v31  ;;  %v1169_v45 = vadd.f32 %v841_v41, %v119_v31  ;;  %v697_v46 = vpop.f32.mrb[3].mxu0  ;;  %v843_v47 = vpop.f32.mrb[3].mxu1 }
 0x139   :  { %v877_v48 = vmax.f32 %v1152_v39, 0.0  ;;  %v879_v49 = vmax.f32 %v1168_v40, 0.0  ;;  %v1154_v50 = vadd.f32 %v697_v46, %v119_v31  ;;  %v1170_v51 = vadd.f32 %v843_v47, %v119_v31 }
 0x13a   :  { %v880_v53 = vmax.f32 %v1153_v44, 0.0  ;;  %v882_v54 = vmax.f32 %v1169_v45, 0.0 }
 0x13b   :  { %v1135_v55 = vpack.c.bf16 %v877_v48, %v876_v42  ;;  %v1136_v56 = vpack.c.bf16 %v879_v49, %v878_v43  ;;  %v881_v57 = vmax.f32 %v1154_v50, 0.0  ;;  %v883_v58 = vmax.f32 %v1170_v51, 0.0 }
 0x13d   :  { %1004 = vst [vmem:[%s1729_s3] sm:$0xff] %v1135_v55  ;;  %1008 = vst.msk [vmem:[%s1729_s3 + $0x8] sm:$0xff] %vm1658_vm3, %v1136_v56  ;;  %v1137_v60 = vpack.c.bf16 %v881_v57, %v880_v53  ;;  %v1138_v61 = vpack.c.bf16 %v883_v58, %v882_v54  ;;  %v701_v62 = vpop.f32.mrb[4].mxu0  ;;  %v847_v63 = vpop.f32.mrb[4].mxu1 }
 0x13e   :  { %v1155_v0 = vadd.f32 %v701_v62, %v124_v32  ;;  %v1171_v2 = vadd.f32 %v847_v63, %v124_v32  ;;  %v703_v3 = vpop.f32.mrb[5].mxu0  ;;  %v849_v4 = vpop.f32.mrb[5].mxu1 }
 0x13f   :  { %1009 = vst [vmem:[%s1729_s3 + $0x10] sm:$0xff] %v1137_v60  ;;  %1010 = vst.msk [vmem:[%s1729_s3 + $0x18] sm:$0xff] %vm1658_vm3, %v1138_v61  ;;  %v1156_v5 = vadd.f32 %v703_v3, %v124_v32  ;;  %v1172_v6 = vadd.f32 %v849_v4, %v124_v32  ;;  %v705_v7 = vpop.f32.mrb[6].mxu0  ;;  %v851_v8 = vpop.f32.mrb[6].mxu1 }
 0x140   :  { %v884_v9 = vmax.f32 %v1155_v0, 0.0  ;;  %v886_v10 = vmax.f32 %v1171_v2, 0.0  ;;  %v1157_v11 = vadd.f32 %v705_v7, %v129_v59  ;;  %v1173_v12 = vadd.f32 %v851_v8, %v129_v59  ;;  %v707_v13 = vpop.f32.mrb[7].mxu0  ;;  %v853_v14 = vpop.f32.mrb[7].mxu1 }
 0x141   :  { %v885_v15 = vmax.f32 %v1156_v5, 0.0  ;;  %v887_v16 = vmax.f32 %v1172_v6, 0.0  ;;  %v1158_v17 = vadd.f32 %v707_v13, %v129_v59  ;;  %v1174_v18 = vadd.f32 %v853_v14, %v129_v59  ;;  %v149_v55 = vpop.permute.xlu1 %148  ;;  %v144_v56 = vpop.permute.xlu0 %143 }
 0x142   :  { %v888_v19 = vmax.f32 %v1157_v11, 0.0  ;;  %v890_v20 = vmax.f32 %v1173_v12, 0.0 }
 0x143   :  { %v1139_v21 = vpack.c.bf16 %v885_v15, %v884_v9  ;;  %v1140_v22 = vpack.c.bf16 %v887_v16, %v886_v10  ;;  %v889_v23 = vmax.f32 %v1158_v17, 0.0  ;;  %v891_v24 = vmax.f32 %v1174_v18, 0.0 }
 0x145   :  { %1011 = vst [vmem:[%s1729_s3 + $0x20] sm:$0xff] %v1139_v21  ;;  %1012 = vst.msk [vmem:[%s1729_s3 + $0x28] sm:$0xff] %vm1658_vm3, %v1140_v22  ;;  %v1141_v27 = vpack.c.bf16 %v889_v23, %v888_v19  ;;  %v1142_v28 = vpack.c.bf16 %v891_v24, %v890_v20  ;;  %v711_v29 = vpop.f32.mrb[8].mxu0  ;;  %v857_v30 = vpop.f32.mrb[8].mxu1 }
 0x146   :  { %v1159_v31 = vadd.f32 %v711_v29, %v134_v26  ;;  %v1175_v32 = vadd.f32 %v857_v30, %v134_v26  ;;  %v713_v33 = vpop.f32.mrb[9].mxu0  ;;  %v859_v34 = vpop.f32.mrb[9].mxu1 }
 0x147   :  { %1013 = vst [vmem:[%s1729_s3 + $0x30] sm:$0xff] %v1141_v27  ;;  %1014 = vst.msk [vmem:[%s1729_s3 + $0x38] sm:$0xff] %vm1658_vm3, %v1142_v28  ;;  %v1160_v35 = vadd.f32 %v713_v33, %v134_v26  ;;  %v1176_v36 = vadd.f32 %v859_v34, %v134_v26  ;;  %v715_v37 = vpop.f32.mrb[10].mxu0  ;;  %v861_v38 = vpop.f32.mrb[10].mxu1 }
 0x148   :  { %v892_v39 = vmax.f32 %v1159_v31, 0.0  ;;  %v894_v40 = vmax.f32 %v1175_v32, 0.0  ;;  %v1161_v1 = vadd.f32 %v715_v37, %v139_v25  ;;  %v1177_v41 = vadd.f32 %v861_v38, %v139_v25  ;;  %v717_v42 = vpop.f32.mrb[11].mxu0  ;;  %v863_v43 = vpop.f32.mrb[11].mxu1 }
 0x149   :  { %v893_v44 = vmax.f32 %v1160_v35, 0.0  ;;  %v895_v45 = vmax.f32 %v1176_v36, 0.0  ;;  %v1162_v46 = vadd.f32 %v717_v42, %v139_v25  ;;  %v1178_v47 = vadd.f32 %v863_v43, %v139_v25 }
 0x14a   :  { %v896_v48 = vmax.f32 %v1161_v1, 0.0  ;;  %v898_v49 = vmax.f32 %v1177_v41, 0.0 }
 0x14b   :  { %v1143_v50 = vpack.c.bf16 %v893_v44, %v892_v39  ;;  %v1144_v51 = vpack.c.bf16 %v895_v45, %v894_v40  ;;  %v897_v53 = vmax.f32 %v1162_v46, 0.0  ;;  %v899_v54 = vmax.f32 %v1178_v47, 0.0 }
 0x14d   :  { %1015 = vst [vmem:[%s1729_s3 + $0x40] sm:$0xff] %v1143_v50  ;;  %1016 = vst.msk [vmem:[%s1729_s3 + $0x48] sm:$0xff] %vm1658_vm3, %v1144_v51  ;;  %v1145_v57 = vpack.c.bf16 %v897_v53, %v896_v48  ;;  %v1146_v58 = vpack.c.bf16 %v899_v54, %v898_v49  ;;  %v721_v59 = vpop.f32.mrb[12].mxu0  ;;  %v867_v60 = vpop.f32.mrb[12].mxu1 }
 0x14e   :  { %v1163_v61 = vadd.f32 %v721_v59, %v144_v56  ;;  %v1179_v62 = vadd.f32 %v867_v60, %v144_v56  ;;  %v723_v63 = vpop.f32.mrb[13].mxu0  ;;  %v869_v0 = vpop.f32.mrb[13].mxu1 }
 0x14f   :  { %1017 = vst [vmem:[%s1729_s3 + $0x50] sm:$0xff] %v1145_v57  ;;  %1018 = vst.msk [vmem:[%s1729_s3 + $0x58] sm:$0xff] %vm1658_vm3, %v1146_v58  ;;  %v1164_v2 = vadd.f32 %v723_v63, %v144_v56  ;;  %v1180_v3 = vadd.f32 %v869_v0, %v144_v56  ;;  %v725_v4 = vpop.f32.mrb[14].mxu0  ;;  %v871_v5 = vpop.f32.mrb[14].mxu1 }
 0x150   :  { %v900_v6 = vmax.f32 %v1163_v61, 0.0  ;;  %v902_v7 = vmax.f32 %v1179_v62, 0.0  ;;  %v1165_v8 = vadd.f32 %v725_v4, %v149_v55  ;;  %v1181_v9 = vadd.f32 %v871_v5, %v149_v55  ;;  %v727_v10 = vpop.f32.mrb[15].mxu0  ;;  %v873_v11 = vpop.f32.mrb[15].mxu1 }
 0x151   :  { %v901_v12 = vmax.f32 %v1164_v2, 0.0  ;;  %v903_v13 = vmax.f32 %v1180_v3, 0.0  ;;  %v1166_v14 = vadd.f32 %v727_v10, %v149_v55  ;;  %v1182_v15 = vadd.f32 %v873_v11, %v149_v55 }
 0x152   :  { %v904_v16 = vmax.f32 %v1165_v8, 0.0  ;;  %v906_v17 = vmax.f32 %v1181_v9, 0.0 }
 0x153   :  { %v1147_v18 = vpack.c.bf16 %v901_v12, %v900_v6  ;;  %v1148_v19 = vpack.c.bf16 %v903_v13, %v902_v7  ;;  %v905_v20 = vmax.f32 %v1166_v14, 0.0  ;;  %v907_v21 = vmax.f32 %v1182_v15, 0.0 }
 0x155   :  { %1019 = vst [vmem:[%s1729_s3 + $0x60] sm:$0xff] %v1147_v18  ;;  %1020 = vst.msk [vmem:[%s1729_s3 + $0x68] sm:$0xff] %vm1658_vm3, %v1148_v19  ;;  %v1149_v22 = vpack.c.bf16 %v905_v20, %v904_v16  ;;  %v1150_v23 = vpack.c.bf16 %v907_v21, %v906_v17 }
 0x157   :  { %1021 = vst [vmem:[%s1729_s3 + $0x70] sm:$0xff] %v1149_v22  ;;  %1022 = vst.msk [vmem:[%s1729_s3 + $0x78] sm:$0xff] %vm1658_vm3, %v1150_v23 }

// kernel: encoder_forward.9
= control target key start
LH: loop header
LB: loop body
LE: loop exit
PB: predicated region body
PF: predicated region fallthrough
CT: control target
= control target key end

     0   :  { %v1447_v1 = vmov 0   ;;  %vm647_vm0 = vcmask 523264   ;;  %vm1043_vm1 = vcmask 797696   ;;  %s1852_s0 = inlined_call_operand.vmem [shape: bf16[576,98], index: 0, kind: input, shape index: {}]   ;;  %s1853_s1 = inlined_call_operand.vmem [shape: bf16[128,576], index: 1, kind: input, shape index: {}]   ;;  %s1854_s2 = inlined_call_operand.vmem [shape: f32[128,1], index: 2, kind: input, shape index: {}]   ;;  %s1855_s3 = inlined_call_operand.vmem [shape: bf16[128,98], index: 3, kind: output, shape index: {}]  }
   0x1   :  { %v1355_v0 = vld [vmem:[%s1852_s0 + $0x40] sm:$0xff]   ;;  %1353 = vset.pattern.permute.xlu0 %v1447_v1  ;;  %1354 = vset.pattern.permute.xlu1 %v1447_v1  ;;  %v1359_v5 = vld [vmem:[%s1852_s0 + $0x48] sm:$0xff]   ;;  %v1363_v9 = vld [vmem:[%s1852_s0 + $0x50] sm:$0xff]  }
   0x2   :  { %v1356_v2 = vld [vmem:[%s1852_s0 + $0xc0] sm:$0xff]   ;;  %1180 = vmatprep.subr.bf16.mxu0 %v1355_v0  ;;  %v1360_v6 = vld [vmem:[%s1852_s0 + $0xc8] sm:$0xff]   ;;  %v1364_v10 = vld [vmem:[%s1852_s0 + $0xd0] sm:$0xff]  }
   0x3   :  { %v1357_v3 = vld [vmem:[%s1852_s0] sm:$0xff]   ;;  %1244 = vmatprep.subr.bf16.mxu1 %v1356_v2  ;;  %v1361_v7 = vld [vmem:[%s1852_s0 + $0x8] sm:$0xff]   ;;  %v1365_v11 = vld [vmem:[%s1852_s0 + $0x10] sm:$0xff]  }
   0x4   :  { %v1358_v4 = vld [vmem:[%s1852_s0 + $0x80] sm:$0xff]   ;;  %1181 = vmatpush3.bf16.msra.mxu0 %v1357_v3  ;;  %v1362_v8 = vld [vmem:[%s1852_s0 + $0x88] sm:$0xff]   ;;  %v1366_v12 = vld [vmem:[%s1852_s0 + $0x90] sm:$0xff]  }
   0x5   :  { %1245 = vmatpush3.bf16.msra.mxu1 %v1358_v4  ;;  %1182 = vmatprep.subr.bf16.mxu0 %v1359_v5  ;;  %v1367_v13 = vld [vmem:[%s1852_s0 + $0x58] sm:$0xff]   ;;  %v1371_v17 = vld [vmem:[%s1852_s0 + $0x60] sm:$0xff]   ;;  %v1375_v21 = vld [vmem:[%s1852_s0 + $0x68] sm:$0xff]  }
   0x6   :  { %1246 = vmatprep.subr.bf16.mxu1 %v1360_v6  ;;  %v1368_v14 = vld [vmem:[%s1852_s0 + $0xd8] sm:$0xff]   ;;  %v1372_v18 = vld [vmem:[%s1852_s0 + $0xe0] sm:$0xff]   ;;  %v1376_v22 = vld [vmem:[%s1852_s0 + $0xe8] sm:$0xff]  }
   0x7   :  { %v1369_v15 = vld [vmem:[%s1852_s0 + $0x18] sm:$0xff]   ;;  %v1373_v19 = vld [vmem:[%s1852_s0 + $0x20] sm:$0xff]   ;;  %v1377_v23 = vld [vmem:[%s1852_s0 + $0x28] sm:$0xff]  }
   0x8   :  { %1183 = vmatpush3.bf16.msra.mxu0 %v1361_v7  ;;  %v1370_v16 = vld [vmem:[%s1852_s0 + $0x98] sm:$0xff]   ;;  %v1374_v20 = vld [vmem:[%s1852_s0 + $0xa0] sm:$0xff]   ;;  %v1378_v24 = vld [vmem:[%s1852_s0 + $0xa8] sm:$0xff]  }
   0x9   :  { %1247 = vmatpush3.bf16.msra.mxu1 %v1362_v8  ;;  %1184 = vmatprep.subr.bf16.mxu0 %v1363_v9  ;;  %v1379_v25 = vld [vmem:[%s1852_s0 + $0x70] sm:$0xff]   ;;  %v1383_v29 = vld [vmem:[%s1852_s0 + $0x78] sm:$0xff]   ;;  %v1392_v36 = vld [vmem:[%s1853_s1 + $0xc] ss:$20 sps:$4 sm:$0xff]  }
   0xa   :  { %1248 = vmatprep.subr.bf16.mxu1 %v1364_v10  ;;  %v1380_v26 = vld [vmem:[%s1852_s0 + $0xf0] sm:$0xff]   ;;  %v1384_v30 = vld [vmem:[%s1852_s0 + $0xf8] sm:$0xff]   ;;  %v1393_v37 = vld [vmem:[%s1852_s0 + $0x100] sm:$0xff]   ;;  %801 = vmatprep.mubr.bf16.mxu1 %v1392_v36 }
   0xb   :  { %v1381_v27 = vld [vmem:[%s1852_s0 + $0x30] sm:$0xff]   ;;  %v1385_v31 = vld [vmem:[%s1852_s0 + $0x38] sm:$0xff]   ;;  %v1394_v38 = vld [vmem:[%s1853_s1 + $0x2c] ss:$20 sps:$4 sm:$0xff]  }
   0xc   :  { %1185 = vmatpush3.bf16.msra.mxu0 %v1365_v11  ;;  %v1382_v28 = vld [vmem:[%s1852_s0 + $0xb0] sm:$0xff]   ;;  %v1386_v32 = vld [vmem:[%s1852_s0 + $0xb8] sm:$0xff]   ;;  %v1406_v43 = vld [vmem:[%s1852_s0 + $0x108] sm:$0xff]  }
   0xd   :  { %1249 = vmatpush3.bf16.msra.mxu1 %v1366_v12  ;;  %1186 = vmatprep.subr.bf16.mxu0 %v1367_v13  ;;  %v1387_v33 = vld [vmem:[%s1853_s1] ss:$20 sps:$4 sm:$0xff]   ;;  %v1389_v34 = vld [vmem:[%s1853_s1 + $0x4] ss:$20 sps:$4 sm:$0xff]   ;;  %v1390_v35 = vld [vmem:[%s1853_s1 + $0x8] ss:$20 sps:$4 sm:$0xff]  }
   0xe   :  { %1250 = vmatprep.subr.bf16.mxu1 %v1368_v14  ;;  %704 = vmatprep.mubr.bf16.mxu0 %v1389_v34  ;;  %v1396_v39 = vld [vmem:[%s1853_s1 + $0x34] ss:$20 sps:$4 sm:$0xff]   ;;  %v1399_v41 = vld [vmem:[%s1853_s1 + $0x30] ss:$20 sps:$4 sm:$0xff]   ;;  %v1405_v46 = vld [vmem:[%s1853_s1 + $0x58] ss:$20 sps:$4 sm:$0xff]  }
   0xf   :  { %v1398_v40 = vld [vmem:[%s1853_s1 + $0x28] ss:$20 sps:$4 sm:$0xff]   ;;  %v1404_v45 = vld [vmem:[%s1853_s1 + $0x50] ss:$20 sps:$4 sm:$0xff]   ;;  %v1411_v51 = vld [vmem:[%s1853_s1 + $0x78] ss:$20 sps:$4 sm:$0xff]  }
  0x10   :  { %1187 = vmatpush3.bf16.msra.mxu0 %v1369_v15  ;;  %v1400_v42 = vld [vmem:[%s1853_s1 + $0x54] ss:$20 sps:$4 sm:$0xff]   ;;  %v1402_v44 = vld [vmem:[%s1853_s1 + $0x5c] ss:$20 sps:$4 sm:$0xff]   ;;  %v1409_v49 = vld [vmem:[%s1853_s1 + $0x84] ss:$20 sps:$4 sm:$0xff]  }
  0x11   :  { %1251 = vmatpush3.bf16.msra.mxu1 %v1370_v16  ;;  %1188 = vmatprep.subr.bf16.mxu0 %v1371_v17  ;;  %v1419_v47 = vld [vmem:[%s1852_s0 + $0x110] sm:$0xff]   ;;  %v1432_v50 = vld [vmem:[%s1852_s0 + $0x118] sm:$0xff]   ;;  %v1415_v54 = vld [vmem:[%s1853_s1 + $0xac] ss:$20 sps:$4 sm:$0xff]  }
  0x12   :  { %1252 = vmatprep.subr.bf16.mxu1 %v1372_v18  ;;  %v1407_v48 = vld [vmem:[%s1853_s1 + $0x7c] ss:$20 sps:$4 sm:$0xff]   ;;  %v1412_v52 = vld [vmem:[%s1853_s1 + $0x80] ss:$20 sps:$4 sm:$0xff]   ;;  %v1413_v53 = vld [vmem:[%s1853_s1 + $0xa4] ss:$20 sps:$4 sm:$0xff]  }
  0x13   :  { %v1417_v55 = vld [vmem:[%s1853_s1 + $0xa0] ss:$20 sps:$4 sm:$0xff]   ;;  %v1418_v56 = vld [vmem:[%s1853_s1 + $0xa8] ss:$20 sps:$4 sm:$0xff]   ;;  %v1425_v2 = vld [vmem:[%s1853_s1 + $0xd0] ss:$20 sps:$4 sm:$0xff]  }
  0x14   :  { %1189 = vmatpush3.bf16.msra.mxu0 %v1373_v19  ;;  %v1420_v57 = vld [vmem:[%s1853_s1 + $0xcc] ss:$20 sps:$4 sm:$0xff]   ;;  %v1422_v59 = vld [vmem:[%s1853_s1 + $0xd4] ss:$20 sps:$4 sm:$0xff]   ;;  %v138_v62 = vld [vmem:[%s1854_s2 + $0x18] sm:$0xff] }
  0x15   :  { %1253 = vmatpush3.bf16.msra.mxu1 %v1374_v20  ;;  %1190 = vmatprep.subr.bf16.mxu0 %v1375_v21  ;;  %v135_v58 = vld [vmem:[%s1854_s2] sm:$0xff]  ;;  %v137_v60 = vld [vmem:[%s1854_s2 + $0x10] sm:$0xff]  ;;  %v136_v61 = vld [vmem:[%s1854_s2 + $0x8] sm:$0xff] }
  0x16   :  { %1254 = vmatprep.subr.bf16.mxu1 %v1376_v22  ;;  %153 = vperm.xlu0 %1353, %v135_v58   ;;  %v139_v63 = vld [vmem:[%s1854_s2 + $0x20] sm:$0xff]  ;;  %v1424_v0 = vld [vmem:[%s1853_s1 + $0xc8] ss:$20 sps:$4 sm:$0xff]   ;;  %v141_v5 = vld [vmem:[%s1854_s2 + $0x30] sm:$0xff] }
  0x17   :  { %163 = vperm.xlu1 %1354, %v137_v60   ;;  %v140_v1 = vld [vmem:[%s1854_s2 + $0x28] sm:$0xff]  ;;  %v1428_v4 = vld [vmem:[%s1853_s1 + $0xfc] ss:$20 sps:$4 sm:$0xff]   ;;  %v143_v7 = vld [vmem:[%s1854_s2 + $0x40] sm:$0xff] }
  0x18   :  { %1191 = vmatpush3.bf16.msra.mxu0 %v1377_v23  ;;  %v1426_v3 = vld [vmem:[%s1853_s1 + $0xf4] ss:$20 sps:$4 sm:$0xff]   ;;  %v142_v6 = vld [vmem:[%s1854_s2 + $0x38] sm:$0xff]  ;;  %v1430_v8 = vld [vmem:[%s1853_s1 + $0xf0] ss:$20 sps:$4 sm:$0xff]  }
  0x19   :  { %1255 = vmatpush3.bf16.msra.mxu1 %v1378_v24  ;;  %1192 = vmatprep.subr.bf16.mxu0 %v1379_v25  ;;  %v144_v9 = vld [vmem:[%s1854_s2 + $0x48] sm:$0xff]  ;;  %v1433_v11 = vld [vmem:[%s1853_s1 + $0x11c] ss:$20 sps:$4 sm:$0xff]   ;;  %v1435_v12 = vld [vmem:[%s1853_s1 + $0x124] ss:$20 sps:$4 sm:$0xff]  }
  0x1a   :  { %1256 = vmatprep.subr.bf16.mxu1 %v1380_v26  ;;  %158 = vperm.xlu0 %1353, %v136_v61   ;;  %v1431_v10 = vld [vmem:[%s1853_s1 + $0xf8] ss:$20 sps:$4 sm:$0xff]   ;;  %v145_v13 = vld [vmem:[%s1854_s2 + $0x50] sm:$0xff]  ;;  %v147_v15 = vld [vmem:[%s1854_s2 + $0x60] sm:$0xff] }
  0x1b   :  { %168 = vperm.xlu1 %1354, %v138_v62   ;;  %v146_v14 = vld [vmem:[%s1854_s2 + $0x58] sm:$0xff]  ;;  %v148_v17 = vld [vmem:[%s1854_s2 + $0x68] sm:$0xff]  ;;  %v1438_v18 = vld [vmem:[%s1853_s1 + $0x120] ss:$20 sps:$4 sm:$0xff]  }
  0x1c   :  { %1193 = vmatpush3.bf16.msra.mxu0 %v1381_v27  ;;  %v1437_v16 = vld [vmem:[%s1853_s1 + $0x118] ss:$20 sps:$4 sm:$0xff]   ;;  %v1439_v19 = vld [vmem:[%s1853_s1 + $0x10] ss:$20 sps:$4 sm:$0xff]   ;;  %v1443_v25 = vld [vmem:[%s1853_s1 + $0x60] ss:$20 sps:$4 sm:$0xff]  }
  0x1d   :  { %1257 = vmatpush3.bf16.msra.mxu1 %v1382_v28  ;;  %1194 = vmatprep.subr.bf16.mxu0 %v1383_v29  ;;  %v1440_v20 = vld [vmem:[%s1853_s1 + $0xb0] ss:$20 sps:$4 sm:$0xff]   ;;  %v150_v22 = vld [vmem:[%s1854_s2 + $0x78] sm:$0xff]  ;;  %v1444_v26 = vld [vmem:[%s1853_s1 + $0x100] ss:$20 sps:$4 sm:$0xff]  }
  0x1e   :  { %1258 = vmatprep.subr.bf16.mxu1 %v1384_v30  ;;  %173 = vperm.xlu0 %1353, %v139_v63   ;;  %v149_v21 = vld [vmem:[%s1854_s2 + $0x70] sm:$0xff]  ;;  %v1441_v23 = vld [vmem:[%s1853_s1 + $0x38] ss:$20 sps:$4 sm:$0xff]   ;;  %v1445_v27 = vld [vmem:[%s1853_s1 + $0x88] ss:$20 sps:$4 sm:$0xff]  }
  0x1f   :  { %178 = vperm.xlu1 %1354, %v140_v1   ;;  %v1442_v24 = vld [vmem:[%s1853_s1 + $0xd8] ss:$20 sps:$4 sm:$0xff]   ;;  %v1446_v28 = vld [vmem:[%s1853_s1 + $0x128] ss:$20 sps:$4 sm:$0xff]  }
  0x20   :  { %1195 = vmatpush3.bf16.msra.mxu0 %v1385_v31 }
  0x21   :  { %1259 = vmatpush3.bf16.msra.mxu1 %v1386_v32  ;;  %1320 = vmatprep.subr.bf16.mxu0 %v1393_v37 }
  0x22   :  { %1344 = vmatprep.subr.bf16.mxu1 %v1393_v37  ;;  %183 = vperm.xlu0 %1353, %v141_v5  }
  0x23   :  { %705 = vmatmul.mubr.bf16.vlgmr.msra.gmra.mrb[0].mxu0 %v1387_v33  ;;  %188 = vperm.xlu1 %1354, %v142_v6  }
  0x24   :  { %802 = vmatmul.mubr.bf16.vlgmr.msra.gmra.mrb[0].mxu1 %v1390_v35  ;;  %1321 = vmatpush3.bf16.msra.mxu0 %v1393_v37 }
  0x25   :  { %1348 = vmatpush3.bf16.msra.mxu1 %v1393_v37  ;;  %712 = vmatprep.mubr.bf16.mxu0 %v1394_v38 }
  0x26   :  { %809 = vmatprep.mubr.bf16.mxu1 %v1396_v39  ;;  %1322 = vmatprep.subr.bf16.mxu0 %v1406_v43 }
  0x27   :  { %1345 = vmatprep.subr.bf16.mxu1 %v1406_v43  ;;  %193 = vperm.xlu0 %1353, %v143_v7  }
  0x28   :  { %1323 = vmatpush3.bf16.msra.mxu0 %v1406_v43  ;;  %198 = vperm.xlu1 %1354, %v144_v9  }
  0x29   :  { %1349 = vmatpush3.bf16.msra.mxu1 %v1406_v43  ;;  %1324 = vmatprep.subr.bf16.mxu0 %v1419_v47 }
  0x2a   :  { %1346 = vmatprep.subr.bf16.mxu1 %v1419_v47 }
  0x2b   :  { %713 = vmatmul.mubr.bf16.gmra.mrb[4].mxu0 %v1398_v40  ;;  %203 = vperm.xlu0 %1353, %v145_v13  }
  0x2c   :  { %810 = vmatmul.mubr.bf16.gmra.mrb[4].mxu1 %v1399_v41  ;;  %720 = vmatprep.mubr.bf16.mxu0 %v1400_v42 }
  0x2d   :  { %817 = vmatprep.mubr.bf16.mxu1 %v1402_v44  ;;  %1325 = vmatpush3.bf16.msra.mxu0 %v1419_v47 }
  0x2e   :  { %1350 = vmatpush3.bf16.msra.mxu1 %v1419_v47  ;;  %1326 = vmatprep.subr.bf16.mxu0 %v1432_v50 }
  0x2f   :  { %1347 = vmatprep.subr.bf16.mxu1 %v1432_v50  ;;  %208 = vperm.xlu1 %1354, %v146_v14  }
  0x30   :  { %213 = vperm.xlu0 %1353, %v147_v15  }
  0x31   :  { %1327 = vmatpush3.bf16.msra.mxu0 %v1432_v50 }
  0x32   :  { %1351 = vmatpush3.bf16.msra.mxu1 %v1432_v50 }
  0x33   :  { %721 = vmatmul.mubr.bf16.gmra.mrb[8].mxu0 %v1404_v45  ;;  %218 = vperm.xlu1 %1354, %v148_v17  }
  0x34   :  { %818 = vmatmul.mubr.bf16.gmra.mrb[8].mxu1 %v1405_v46  ;;  %728 = vmatprep.mubr.bf16.mxu0 %v1407_v48 }
  0x35   :  { %825 = vmatprep.mubr.bf16.mxu1 %v1409_v49  ;;  %223 = vperm.xlu0 %1353, %v149_v21  }
  0x37   :  { %228 = vperm.xlu1 %1354, %v150_v22  }
  0x3b   :  { %729 = vmatmul.mubr.bf16.gmra.mrb[12].mxu0 %v1411_v51 }
  0x3c   :  { %826 = vmatmul.mubr.bf16.gmra.mrb[12].mxu1 %v1412_v52  ;;  %736 = vmatprep.mubr.bf16.mxu0 %v1413_v53 }
  0x3d   :  { %833 = vmatprep.mubr.bf16.mxu1 %v1415_v54 }
  0x43   :  { %737 = vmatmul.mubr.bf16.gmra.mrb[16].mxu0 %v1417_v55 }
  0x44   :  { %834 = vmatmul.mubr.bf16.gmra.mrb[16].mxu1 %v1418_v56  ;;  %744 = vmatprep.mubr.bf16.mxu0 %v1420_v57 }
  0x45   :  { %841 = vmatprep.mubr.bf16.mxu1 %v1422_v59 }
  0x4b   :  { %745 = vmatmul.mubr.bf16.gmra.mrb[20].mxu0 %v1424_v0 }
  0x4c   :  { %842 = vmatmul.mubr.bf16.gmra.mrb[20].mxu1 %v1425_v2  ;;  %752 = vmatprep.mubr.bf16.mxu0 %v1426_v3 }
  0x4d   :  { %849 = vmatprep.mubr.bf16.mxu1 %v1428_v4 }
  0x53   :  { %753 = vmatmul.mubr.bf16.gmra.mrb[24].mxu0 %v1430_v8 }
  0x54   :  { %850 = vmatmul.mubr.bf16.gmra.mrb[24].mxu1 %v1431_v10  ;;  %760 = vmatprep.mubr.bf16.mxu0 %v1433_v11 }
  0x55   :  { %857 = vmatprep.mubr.bf16.mxu1 %v1435_v12 }
  0x5b   :  { %761 = vmatmul.mubr.bf16.gmra.mrb[28].mxu0 %v1437_v16 }
  0x5c   :  { %858 = vmatmul.mubr.bf16.gmra.mrb[28].mxu1 %v1438_v18  ;;  %1328 = vmatprep.mubr.msk.bf16.mxu0 %vm647_vm0, %v1439_v19 }
  0x5d   :  { %1336 = vmatprep.mubr.msk.bf16.mxu1 %vm647_vm0, %v1440_v20 }
  0x63   :  { %1329 = vmatmul.mubr.msk.bf16.vlgmr.msra.gmra.mrb[32].mxu0 %vm647_vm0, %v1441_v23 }
  0x64   :  { %1337 = vmatmul.mubr.msk.bf16.vlgmr.msra.gmra.mrb[32].mxu1 %vm647_vm0, %v1442_v24  ;;  %1332 = vmatprep.mubr.msk.bf16.mxu0 %vm647_vm0, %v1443_v25 }
  0x65   :  { %1340 = vmatprep.mubr.msk.bf16.mxu1 %vm647_vm0, %v1444_v26 }
  0x6b   :  { %1333 = vmatmul.mubr.msk.bf16.gmra.mrb[36].mxu0 %vm647_vm0, %v1445_v27 }
  0x6c   :  { %1341 = vmatmul.mubr.msk.bf16.gmra.mrb[36].mxu1 %vm647_vm0, %v1446_v28 }
  0x95   :  { %v154_v29 = vpop.permute.xlu0 %153 }
  0x96   :  { %v164_v30 = vpop.permute.xlu1 %163 }
  0x99   :  { %v159_v32 = vpop.permute.xlu0 %158 }
  0x9a   :  { %v169_v48 = vpop.permute.xlu1 %168 }
  0x9d   :  { %v174_v0 = vpop.permute.xlu0 %173 }
  0x9e   :  { %v179_v2 = vpop.permute.xlu1 %178 }
  0xa1   :  { %v184_v19 = vpop.permute.xlu0 %183 }
  0xf6   :  { %v1196_v31 = vpop.f32.mrb[0].mxu0 }
  0xf7   :  { %v1260_v33 = vpop.f32.mrb[0].mxu1  ;;  %v1197_v34 = vpop.f32.mrb[1].mxu0 }
  0xf8   :  { %v1198_v35 = vadd.f32 %v1197_v34, %v1196_v31  ;;  %v1261_v36 = vpop.f32.mrb[1].mxu1  ;;  %v1199_v37 = vpop.f32.mrb[2].mxu0 }
  0xf9   :  { %v1262_v38 = vadd.f32 %v1261_v36, %v1260_v33  ;;  %v1263_v39 = vpop.f32.mrb[2].mxu1  ;;  %v1200_v40 = vpop.f32.mrb[3].mxu0 }
  0xfa   :  { %v707_v41 = vadd.f32 %v1198_v35, %v154_v29  ;;  %v1201_v42 = vadd.f32 %v1200_v40, %v1199_v37  ;;  %v1264_v43 = vpop.f32.mrb[3].mxu1  ;;  %v189_v33 = vpop.permute.xlu1 %188 }
  0xfb   :  { %v1265_v44 = vadd.f32 %v1264_v43, %v1263_v39  ;;  %v194_v36 = vpop.permute.xlu0 %193 }
  0xfc   :  { %v710_v45 = vadd.f32 %v1201_v42, %v159_v32  ;;  %v1752_v46 = vadd.f32 %v1262_v38, %v707_v41 }
  0xfe   :  { %v1202_v47 = vpop.f32.mrb[4].mxu0  ;;  %v1754_v49 = vadd.f32 %v1265_v44, %v710_v45 }
  0xff   :  { %v1266_v50 = vpop.f32.mrb[4].mxu1  ;;  %v1203_v51 = vpop.f32.mrb[5].mxu0 }
 0x100   :  { %v1204_v52 = vadd.f32 %v1203_v51, %v1202_v47  ;;  %v1267_v53 = vpop.f32.mrb[5].mxu1  ;;  %v1205_v54 = vpop.f32.mrb[6].mxu0 }
 0x101   :  { %v1268_v55 = vadd.f32 %v1267_v53, %v1266_v50  ;;  %v1269_v56 = vpop.f32.mrb[6].mxu1  ;;  %v1206_v57 = vpop.f32.mrb[7].mxu0 }
 0x102   :  { %v715_v58 = vadd.f32 %v1204_v52, %v164_v30  ;;  %v1207_v59 = vadd.f32 %v1206_v57, %v1205_v54  ;;  %v1270_v60 = vpop.f32.mrb[7].mxu1  ;;  %v199_v52 = vpop.permute.xlu1 %198 }
 0x103   :  { %v1271_v61 = vadd.f32 %v1270_v60, %v1269_v56  ;;  %v204_v56 = vpop.permute.xlu0 %203 }
 0x104   :  { %v718_v62 = vadd.f32 %v1207_v59, %v169_v48  ;;  %v1756_v63 = vadd.f32 %v1268_v55, %v715_v58 }
 0x106   :  { %v1208_v1 = vpop.f32.mrb[8].mxu0  ;;  %v1758_v3 = vadd.f32 %v1271_v61, %v718_v62 }
 0x107   :  { %v1272_v4 = vpop.f32.mrb[8].mxu1  ;;  %v1209_v5 = vpop.f32.mrb[9].mxu0 }
 0x108   :  { %v1210_v6 = vadd.f32 %v1209_v5, %v1208_v1  ;;  %v1273_v7 = vpop.f32.mrb[9].mxu1  ;;  %v1211_v8 = vpop.f32.mrb[10].mxu0 }
 0x109   :  { %v1274_v9 = vadd.f32 %v1273_v7, %v1272_v4  ;;  %v1275_v10 = vpop.f32.mrb[10].mxu1  ;;  %v1212_v11 = vpop.f32.mrb[11].mxu0 }
 0x10a   :  { %v723_v12 = vadd.f32 %v1210_v6, %v174_v0  ;;  %v1213_v13 = vadd.f32 %v1212_v11, %v1211_v8  ;;  %v1276_v14 = vpop.f32.mrb[11].mxu1  ;;  %v209_v8 = vpop.permute.xlu1 %208 }
 0x10b   :  { %v1277_v15 = vadd.f32 %v1276_v14, %v1275_v10 }
 0x10c   :  { %v726_v16 = vadd.f32 %v1213_v13, %v179_v2  ;;  %v1760_v17 = vadd.f32 %v1274_v9, %v723_v12  ;;  %v214_v12 = vpop.permute.xlu0 %213 }
 0x10e   :  { %v1214_v18 = vpop.f32.mrb[12].mxu0  ;;  %v1762_v20 = vadd.f32 %v1277_v15, %v726_v16 }
 0x10f   :  { %v1278_v21 = vpop.f32.mrb[12].mxu1  ;;  %v1215_v22 = vpop.f32.mrb[13].mxu0 }
 0x110   :  { %v1216_v23 = vadd.f32 %v1215_v22, %v1214_v18  ;;  %v1279_v24 = vpop.f32.mrb[13].mxu1  ;;  %v1217_v25 = vpop.f32.mrb[14].mxu0 }
 0x111   :  { %v1280_v26 = vadd.f32 %v1279_v24, %v1278_v21  ;;  %v1281_v27 = vpop.f32.mrb[14].mxu1  ;;  %v1218_v28 = vpop.f32.mrb[15].mxu0 }
 0x112   :  { %v731_v29 = vadd.f32 %v1216_v23, %v184_v19  ;;  %v1219_v30 = vadd.f32 %v1218_v28, %v1217_v25  ;;  %v1282_v31 = vpop.f32.mrb[15].mxu1  ;;  %v219_v28 = vpop.permute.xlu1 %218 }
 0x113   :  { %v1283_v32 = vadd.f32 %v1282_v31, %v1281_v27 }
 0x114   :  { %v734_v34 = vadd.f32 %v1219_v30, %v189_v33  ;;  %v1764_v35 = vadd.f32 %v1280_v26, %v731_v29 }
 0x116   :  { %v1220_v37 = vpop.f32.mrb[16].mxu0  ;;  %v1766_v38 = vadd.f32 %v1283_v32, %v734_v34  ;;  %v224_v32 = vpop.permute.xlu0 %223 }
 0x117   :  { %v1284_v39 = vpop.f32.mrb[16].mxu1  ;;  %v1221_v40 = vpop.f32.mrb[17].mxu0 }
 0x118   :  { %v1222_v41 = vadd.f32 %v1221_v40, %v1220_v37  ;;  %v1285_v42 = vpop.f32.mrb[17].mxu1  ;;  %v1223_v43 = vpop.f32.mrb[18].mxu0 }
 0x119   :  { %v1286_v44 = vadd.f32 %v1285_v42, %v1284_v39  ;;  %v1287_v45 = vpop.f32.mrb[18].mxu1  ;;  %v1224_v47 = vpop.f32.mrb[19].mxu0 }
 0x11a   :  { %v739_v48 = vadd.f32 %v1222_v41, %v194_v36  ;;  %v1225_v50 = vadd.f32 %v1224_v47, %v1223_v43  ;;  %v1288_v51 = vpop.f32.mrb[19].mxu1 }
 0x11b   :  { %v1289_v53 = vadd.f32 %v1288_v51, %v1287_v45 }
 0x11c   :  { %v742_v54 = vadd.f32 %v1225_v50, %v199_v52  ;;  %v1768_v55 = vadd.f32 %v1286_v44, %v739_v48  ;;  %v229_v50 = vpop.permute.xlu1 %228 }
 0x11e   :  { %v1226_v57 = vpop.f32.mrb[20].mxu0  ;;  %v1770_v58 = vadd.f32 %v1289_v53, %v742_v54 }
 0x11f   :  { %v1290_v59 = vpop.f32.mrb[20].mxu1  ;;  %v1227_v60 = vpop.f32.mrb[21].mxu0 }
 0x120   :  { %v1228_v61 = vadd.f32 %v1227_v60, %v1226_v57  ;;  %v1291_v62 = vpop.f32.mrb[21].mxu1  ;;  %v1229_v0 = vpop.f32.mrb[22].mxu0 }
 0x121   :  { %v1292_v1 = vadd.f32 %v1291_v62, %v1290_v59  ;;  %v1293_v2 = vpop.f32.mrb[22].mxu1  ;;  %v1230_v4 = vpop.f32.mrb[23].mxu0 }
 0x122   :  { %v747_v5 = vadd.f32 %v1228_v61, %v204_v56  ;;  %v1231_v6 = vadd.f32 %v1230_v4, %v1229_v0  ;;  %v1294_v7 = vpop.f32.mrb[23].mxu1 }
 0x123   :  { %v1295_v9 = vadd.f32 %v1294_v7, %v1293_v2 }
 0x124   :  { %v750_v10 = vadd.f32 %v1231_v6, %v209_v8  ;;  %v844_v11 = vadd.f32 %v1292_v1, %v747_v5 }
 0x126   :  { %v1232_v13 = vpop.f32.mrb[24].mxu0  ;;  %v847_v14 = vadd.f32 %v1295_v9, %v750_v10 }
 0x127   :  { %v1296_v15 = vpop.f32.mrb[24].mxu1  ;;  %v1233_v16 = vpop.f32.mrb[25].mxu0 }
 0x128   :  { %v1234_v18 = vadd.f32 %v1233_v16, %v1232_v13  ;;  %v1297_v19 = vpop.f32.mrb[25].mxu1  ;;  %v1235_v21 = vpop.f32.mrb[26].mxu0 }
 0x129   :  { %v1298_v22 = vadd.f32 %v1297_v19, %v1296_v15  ;;  %v1299_v23 = vpop.f32.mrb[26].mxu1  ;;  %v1236_v24 = vpop.f32.mrb[27].mxu0 }
 0x12a   :  { %v755_v25 = vadd.f32 %v1234_v18, %v214_v12  ;;  %v1237_v26 = vadd.f32 %v1236_v24, %v1235_v21  ;;  %v1300_v27 = vpop.f32.mrb[27].mxu1 }
 0x12b   :  { %v1301_v29 = vadd.f32 %v1300_v27, %v1299_v23 }
 0x12c   :  { %v758_v30 = vadd.f32 %v1237_v26, %v219_v28  ;;  %v1772_v31 = vadd.f32 %v1298_v22, %v755_v25 }
 0x12e   :  { %v1238_v33 = vpop.f32.mrb[28].mxu0  ;;  %v1774_v34 = vadd.f32 %v1301_v29, %v758_v30 }
 0x12f   :  { %v1302_v36 = vpop.f32.mrb[28].mxu1  ;;  %v1239_v37 = vpop.f32.mrb[29].mxu0 }
 0x130   :  { %v1240_v39 = vadd.f32 %v1239_v37, %v1238_v33  ;;  %v1303_v40 = vpop.f32.mrb[29].mxu1  ;;  %v1241_v41 = vpop.f32.mrb[30].mxu0 }
 0x131   :  { %v1304_v42 = vadd.f32 %v1303_v40, %v1302_v36  ;;  %v1305_v43 = vpop.f32.mrb[30].mxu1  ;;  %v1242_v44 = vpop.f32.mrb[31].mxu0 }
 0x132   :  { %v763_v45 = vadd.f32 %v1240_v39, %v224_v32  ;;  %v1243_v47 = vadd.f32 %v1242_v44, %v1241_v41  ;;  %v1306_v48 = vpop.f32.mrb[31].mxu1 }
 0x133   :  { %v1307_v51 = vadd.f32 %v1306_v48, %v1305_v43 }
 0x134   :  { %v766_v52 = vadd.f32 %v1243_v47, %v229_v50  ;;  %v860_v53 = vadd.f32 %v1304_v42, %v763_v45 }
 0x136   :  { %v1330_v54 = vpop.f32.mrb[32].mxu0  ;;  %v863_v56 = vadd.f32 %v1307_v51, %v766_v52 }
 0x137   :  { %v909_v57 = vadd.f32 %v1330_v54, %v1756_v63  ;;  %v1338_v59 = vpop.f32.mrb[32].mxu1  ;;  %v900_v60 = vpop.f32.mrb[33].mxu0 }
 0x138   :  { %v941_v61 = vadd.f32 %v1338_v59, %v844_v11  ;;  %v901_v62 = vadd.f32 %v900_v60, %v1752_v46  ;;  %v932_v0 = vpop.f32.mrb[33].mxu1  ;;  %v1331_v1 = vpop.f32.mrb[34].mxu0 }
 0x139   :  { %v965_v2 = vmax.f32 %v909_v57, 0.0  ;;  %v933_v4 = vadd.f32 %v932_v0, %v1768_v55  ;;  %v912_v5 = vadd.f32 %v1331_v1, %v1758_v3  ;;  %v1339_v6 = vpop.f32.mrb[34].mxu1  ;;  %v903_v7 = vpop.f32.mrb[35].mxu0 }
 0x13a   :  { %v973_v8 = vmax.f32 %v941_v61, 0.0  ;;  %v963_v9 = vmax.f32 %v901_v62, 0.0  ;;  %v944_v10 = vadd.f32 %v1339_v6, %v847_v14  ;;  %v904_v63 = vadd.f32 %v903_v7, %v1754_v49  ;;  %v935_v12 = vpop.f32.mrb[35].mxu1 }
 0x13b   :  { %v1166_v13 = vpack.c.bf16 %v965_v2, %v965_v2  ;;  %v971_v11 = vmax.f32 %v933_v4, 0.0  ;;  %v966_v15 = vmax.f32 %v912_v5, 0.0  ;;  %v936_v46 = vadd.f32 %v935_v12, %v1770_v58 }
 0x13c   :  { %v1174_v16 = vpack.c.bf16 %v973_v8, %v973_v8  ;;  %v1164_v18 = vpack.c.bf16 %v963_v9, %v963_v9  ;;  %v974_v19 = vmax.f32 %v944_v10, 0.0  ;;  %v964_v21 = vmax.f32 %v904_v63, 0.0 }
 0x13d   :  { %1046 = vst.msk [vmem:[%s1855_s3 + $0x8] sm:$0xf] %vm1043_vm1, %v1166_v13  ;;  %v1172_v3 = vpack.c.bf16 %v971_v11, %v971_v11  ;;  %v1167_v55 = vpack.c.bf16 %v966_v15, %v966_v15  ;;  %v972_v14 = vmax.f32 %v936_v46, 0.0 }
 0x13e   :  { %1054 = vst.msk [vmem:[%s1855_s3 + $0x28] sm:$0xf] %vm1043_vm1, %v1174_v16  ;;  %1044 = vst.msk [vmem:[%s1855_s3] sm:$0xf] %vm1043_vm1, %v1164_v18  ;;  %v1175_v49 = vpack.c.bf16 %v974_v19, %v974_v19  ;;  %v1165_v58 = vpack.c.bf16 %v964_v21, %v964_v21  ;;  %v1334_v22 = vpop.f32.mrb[36].mxu0 }
 0x13f   :  { %1052 = vst.msk [vmem:[%s1855_s3 + $0x20] sm:$0xf] %vm1043_vm1, %v1172_v3  ;;  %1047 = vst.msk [vmem:[%s1855_s3 + $0xc] sm:$0xf] %vm1043_vm1, %v1167_v55  ;;  %v1173_v23 = vpack.c.bf16 %v972_v14, %v972_v14  ;;  %v925_v24 = vadd.f32 %v1334_v22, %v1764_v35  ;;  %v1342_v25 = vpop.f32.mrb[36].mxu1  ;;  %v916_v26 = vpop.f32.mrb[37].mxu0 }
 0x140   :  { %1055 = vst.msk [vmem:[%s1855_s3 + $0x2c] sm:$0xf] %vm1043_vm1, %v1175_v49  ;;  %1045 = vst.msk [vmem:[%s1855_s3 + $0x4] sm:$0xf] %vm1043_vm1, %v1165_v58  ;;  %v957_v27 = vadd.f32 %v1342_v25, %v860_v53  ;;  %v917_v28 = vadd.f32 %v916_v26, %v1760_v17  ;;  %v948_v29 = vpop.f32.mrb[37].mxu1  ;;  %v1335_v30 = vpop.f32.mrb[38].mxu0 }
 0x141   :  { %1053 = vst.msk [vmem:[%s1855_s3 + $0x24] sm:$0xf] %vm1043_vm1, %v1173_v23  ;;  %v969_v35 = vmax.f32 %v925_v24, 0.0  ;;  %v949_v32 = vadd.f32 %v948_v29, %v1772_v31  ;;  %v928_v33 = vadd.f32 %v1335_v30, %v1766_v38  ;;  %v1343_v36 = vpop.f32.mrb[38].mxu1  ;;  %v919_v37 = vpop.f32.mrb[39].mxu0 }
 0x142   :  { %v977_v39 = vmax.f32 %v957_v27, 0.0  ;;  %v967_v40 = vmax.f32 %v917_v28, 0.0  ;;  %v960_v41 = vadd.f32 %v1343_v36, %v863_v56  ;;  %v920_v42 = vadd.f32 %v919_v37, %v1762_v20  ;;  %v951_v17 = vpop.f32.mrb[39].mxu1 }
 0x143   :  { %v1170_v43 = vpack.c.bf16 %v969_v35, %v969_v35  ;;  %v975_v44 = vmax.f32 %v949_v32, 0.0  ;;  %v970_v45 = vmax.f32 %v928_v33, 0.0  ;;  %v952_v47 = vadd.f32 %v951_v17, %v1774_v34 }
 0x144   :  { %v1178_v48 = vpack.c.bf16 %v977_v39, %v977_v39  ;;  %v1168_v50 = vpack.c.bf16 %v967_v40, %v967_v40  ;;  %v978_v51 = vmax.f32 %v960_v41, 0.0  ;;  %v968_v52 = vmax.f32 %v920_v42, 0.0 }
 0x145   :  { %1050 = vst.msk [vmem:[%s1855_s3 + $0x18] sm:$0xf] %vm1043_vm1, %v1170_v43  ;;  %v1176_v38 = vpack.c.bf16 %v975_v44, %v975_v44  ;;  %v1171_v31 = vpack.c.bf16 %v970_v45, %v970_v45  ;;  %v976_v53 = vmax.f32 %v952_v47, 0.0 }
 0x146   :  { %1058 = vst.msk [vmem:[%s1855_s3 + $0x38] sm:$0xf] %vm1043_vm1, %v1178_v48  ;;  %1048 = vst.msk [vmem:[%s1855_s3 + $0x10] sm:$0xf] %vm1043_vm1, %v1168_v50  ;;  %v1179_v20 = vpack.c.bf16 %v978_v51, %v978_v51  ;;  %v1169_v34 = vpack.c.bf16 %v968_v52, %v968_v52 }
 0x147   :  { %1056 = vst.msk [vmem:[%s1855_s3 + $0x30] sm:$0xf] %vm1043_vm1, %v1176_v38  ;;  %1051 = vst.msk [vmem:[%s1855_s3 + $0x1c] sm:$0xf] %vm1043_vm1, %v1171_v31  ;;  %v1177_v54 = vpack.c.bf16 %v976_v53, %v976_v53 }
 0x148   :  { %1059 = vst.msk [vmem:[%s1855_s3 + $0x3c] sm:$0xf] %vm1043_vm1, %v1179_v20  ;;  %1049 = vst.msk [vmem:[%s1855_s3 + $0x14] sm:$0xf] %vm1043_vm1, %v1169_v34 }
 0x149   :  { %1057 = vst.msk [vmem:[%s1855_s3 + $0x34] sm:$0xf] %vm1043_vm1, %v1177_v54 }

// kernel: encoder_forward.10
= control target key start
LH: loop header
LB: loop body
LE: loop exit
PB: predicated region body
PF: predicated region fallthrough
CT: control target
= control target key end

     0   :  { %v1704_v1 = vmov 0   ;;  %vm1228_vm0 = vcmask 797696   ;;  %s2120_s0 = inlined_call_operand.vmem [shape: bf16[1152,98], index: 0, kind: input, shape index: {}]   ;;  %s2121_s1 = inlined_call_operand.vmem [shape: bf16[64,1152], index: 1, kind: input, shape index: {}]   ;;  %s2122_s2 = inlined_call_operand.vmem [shape: f32[64,1], index: 2, kind: input, shape index: {}]   ;;  %s2123_s3 = inlined_call_operand.vmem [shape: bf16[64,98], index: 3, kind: output, shape index: {}]  }
   0x1   :  { %v1580_v0 = vld [vmem:[%s2120_s0 + $0x40] sm:$0xff]   ;;  %1578 = vset.pattern.permute.xlu0 %v1704_v1  ;;  %1579 = vset.pattern.permute.xlu1 %v1704_v1  ;;  %v1584_v5 = vld [vmem:[%s2120_s0 + $0x48] sm:$0xff]   ;;  %v1588_v9 = vld [vmem:[%s2120_s0 + $0x50] sm:$0xff]  }
   0x2   :  { %v1581_v2 = vld [vmem:[%s2120_s0 + $0xc0] sm:$0xff]   ;;  %1365 = vmatprep.subr.bf16.mxu0 %v1580_v0  ;;  %v1585_v6 = vld [vmem:[%s2120_s0 + $0xc8] sm:$0xff]   ;;  %v1589_v10 = vld [vmem:[%s2120_s0 + $0xd0] sm:$0xff]  }
   0x3   :  { %v1582_v3 = vld [vmem:[%s2120_s0] sm:$0xff]   ;;  %1405 = vmatprep.subr.bf16.mxu1 %v1581_v2  ;;  %v1586_v7 = vld [vmem:[%s2120_s0 + $0x8] sm:$0xff]   ;;  %v1590_v11 = vld [vmem:[%s2120_s0 + $0x10] sm:$0xff]  }
   0x4   :  { %v1583_v4 = vld [vmem:[%s2120_s0 + $0x80] sm:$0xff]   ;;  %1366 = vmatpush3.bf16.msra.mxu0 %v1582_v3  ;;  %v1587_v8 = vld [vmem:[%s2120_s0 + $0x88] sm:$0xff]   ;;  %v1591_v12 = vld [vmem:[%s2120_s0 + $0x90] sm:$0xff]  }
   0x5   :  { %1406 = vmatpush3.bf16.msra.mxu1 %v1583_v4  ;;  %1367 = vmatprep.subr.bf16.mxu0 %v1584_v5  ;;  %v1592_v13 = vld [vmem:[%s2120_s0 + $0x58] sm:$0xff]   ;;  %v1596_v17 = vld [vmem:[%s2120_s0 + $0x60] sm:$0xff]   ;;  %v1600_v21 = vld [vmem:[%s2120_s0 + $0x68] sm:$0xff]  }
   0x6   :  { %1407 = vmatprep.subr.bf16.mxu1 %v1585_v6  ;;  %v1593_v14 = vld [vmem:[%s2120_s0 + $0xd8] sm:$0xff]   ;;  %v1597_v18 = vld [vmem:[%s2120_s0 + $0xe0] sm:$0xff]   ;;  %v1601_v22 = vld [vmem:[%s2120_s0 + $0xe8] sm:$0xff]  }
   0x7   :  { %v1594_v15 = vld [vmem:[%s2120_s0 + $0x18] sm:$0xff]   ;;  %v1598_v19 = vld [vmem:[%s2120_s0 + $0x20] sm:$0xff]   ;;  %v1602_v23 = vld [vmem:[%s2120_s0 + $0x28] sm:$0xff]  }
   0x8   :  { %1368 = vmatpush3.bf16.msra.mxu0 %v1586_v7  ;;  %v1595_v16 = vld [vmem:[%s2120_s0 + $0x98] sm:$0xff]   ;;  %v1599_v20 = vld [vmem:[%s2120_s0 + $0xa0] sm:$0xff]   ;;  %v1603_v24 = vld [vmem:[%s2120_s0 + $0xa8] sm:$0xff]  }
   0x9   :  { %1408 = vmatpush3.bf16.msra.mxu1 %v1587_v8  ;;  %1369 = vmatprep.subr.bf16.mxu0 %v1588_v9  ;;  %v1604_v25 = vld [vmem:[%s2120_s0 + $0x70] sm:$0xff]   ;;  %v1608_v29 = vld [vmem:[%s2120_s0 + $0x78] sm:$0xff]   ;;  %v1612_v33 = vld [vmem:[%s2121_s1] ss:$36 sps:$4 sm:$0xff]  }
   0xa   :  { %1409 = vmatprep.subr.bf16.mxu1 %v1589_v10  ;;  %v1605_v26 = vld [vmem:[%s2120_s0 + $0xf0] sm:$0xff]   ;;  %v1609_v30 = vld [vmem:[%s2120_s0 + $0xf8] sm:$0xff]   ;;  %v1614_v34 = vld [vmem:[%s2121_s1 + $0x4] ss:$36 sps:$4 sm:$0xff]  }
   0xb   :  { %v1606_v27 = vld [vmem:[%s2120_s0 + $0x30] sm:$0xff]   ;;  %v1610_v31 = vld [vmem:[%s2120_s0 + $0x38] sm:$0xff]   ;;  %v1615_v35 = vld [vmem:[%s2121_s1 + $0x8] ss:$36 sps:$4 sm:$0xff]   ;;  %895 = vmatprep.mubr.bf16.mxu0 %v1614_v34 }
   0xc   :  { %1370 = vmatpush3.bf16.msra.mxu0 %v1590_v11  ;;  %v1607_v28 = vld [vmem:[%s2120_s0 + $0xb0] sm:$0xff]   ;;  %v1611_v32 = vld [vmem:[%s2120_s0 + $0xb8] sm:$0xff]   ;;  %v1618_v37 = vld [vmem:[%s2120_s0 + $0x140] sm:$0xff]  }
   0xd   :  { %1410 = vmatpush3.bf16.msra.mxu1 %v1591_v12  ;;  %1371 = vmatprep.subr.bf16.mxu0 %v1592_v13  ;;  %v1617_v36 = vld [vmem:[%s2121_s1 + $0xc] ss:$36 sps:$4 sm:$0xff]   ;;  %v1619_v38 = vld [vmem:[%s2120_s0 + $0x1c0] sm:$0xff]   ;;  %v1628_v46 = vld [vmem:[%s2121_s1 + $0x54] ss:$36 sps:$4 sm:$0xff]  }
   0xe   :  { %1411 = vmatprep.subr.bf16.mxu1 %v1593_v14  ;;  %960 = vmatprep.mubr.bf16.mxu1 %v1617_v36  ;;  %v1620_v39 = vld [vmem:[%s2120_s0 + $0x100] sm:$0xff]   ;;  %v1622_v41 = vld [vmem:[%s2120_s0 + $0x148] sm:$0xff]   ;;  %v1631_v48 = vld [vmem:[%s2121_s1 + $0x50] ss:$36 sps:$4 sm:$0xff]  }
   0xf   :  { %v1621_v40 = vld [vmem:[%s2120_s0 + $0x180] sm:$0xff]   ;;  %v1623_v42 = vld [vmem:[%s2120_s0 + $0x1c8] sm:$0xff]   ;;  %v1632_v49 = vld [vmem:[%s2120_s0 + $0x150] sm:$0xff]  }
  0x10   :  { %1372 = vmatpush3.bf16.msra.mxu0 %v1594_v15  ;;  %v1624_v43 = vld [vmem:[%s2120_s0 + $0x108] sm:$0xff]   ;;  %v1633_v50 = vld [vmem:[%s2120_s0 + $0x1d0] sm:$0xff]   ;;  %v1636_v53 = vld [vmem:[%s2120_s0 + $0x158] sm:$0xff]  }
  0x11   :  { %1412 = vmatpush3.bf16.msra.mxu1 %v1595_v16  ;;  %1373 = vmatprep.subr.bf16.mxu0 %v1596_v17  ;;  %v1625_v44 = vld [vmem:[%s2120_s0 + $0x188] sm:$0xff]   ;;  %v1634_v51 = vld [vmem:[%s2120_s0 + $0x110] sm:$0xff]   ;;  %v1637_v54 = vld [vmem:[%s2120_s0 + $0x1d8] sm:$0xff]  }
  0x12   :  { %1413 = vmatprep.subr.bf16.mxu1 %v1597_v18  ;;  %v1626_v45 = vld [vmem:[%s2121_s1 + $0x4c] ss:$36 sps:$4 sm:$0xff]   ;;  %v1638_v55 = vld [vmem:[%s2120_s0 + $0x118] sm:$0xff]   ;;  %v1646_v61 = vld [vmem:[%s2120_s0 + $0x160] sm:$0xff]  }
  0x13   :  { %v1630_v47 = vld [vmem:[%s2121_s1 + $0x48] ss:$36 sps:$4 sm:$0xff]   ;;  %v1635_v52 = vld [vmem:[%s2120_s0 + $0x190] sm:$0xff]   ;;  %v1639_v56 = vld [vmem:[%s2120_s0 + $0x198] sm:$0xff]  }
  0x14   :  { %1374 = vmatpush3.bf16.msra.mxu0 %v1598_v19  ;;  %v1640_v57 = vld [vmem:[%s2121_s1 + $0x94] ss:$36 sps:$4 sm:$0xff]   ;;  %v1642_v58 = vld [vmem:[%s2121_s1 + $0x9c] ss:$36 sps:$4 sm:$0xff]   ;;  %v1650_v1 = vld [vmem:[%s2120_s0 + $0x168] sm:$0xff]  }
  0x15   :  { %1414 = vmatpush3.bf16.msra.mxu1 %v1599_v20  ;;  %1375 = vmatprep.subr.bf16.mxu0 %v1600_v21  ;;  %v1644_v59 = vld [vmem:[%s2121_s1 + $0x90] ss:$36 sps:$4 sm:$0xff]   ;;  %v1645_v60 = vld [vmem:[%s2121_s1 + $0x98] ss:$36 sps:$4 sm:$0xff]   ;;  %v1647_v62 = vld [vmem:[%s2120_s0 + $0x1e0] sm:$0xff]  }
  0x16   :  { %1415 = vmatprep.subr.bf16.mxu1 %v1601_v22  ;;  %v1648_v63 = vld [vmem:[%s2120_s0 + $0x120] sm:$0xff]   ;;  %v1651_v2 = vld [vmem:[%s2120_s0 + $0x1e8] sm:$0xff]   ;;  %v1658_v7 = vld [vmem:[%s2121_s1 + $0xd8] ss:$36 sps:$4 sm:$0xff]  }
  0x17   :  { %v1649_v0 = vld [vmem:[%s2120_s0 + $0x1a0] sm:$0xff]   ;;  %v1652_v3 = vld [vmem:[%s2120_s0 + $0x128] sm:$0xff]   ;;  %v1660_v9 = vld [vmem:[%s2120_s0 + $0x170] sm:$0xff]  }
  0x18   :  { %1376 = vmatpush3.bf16.msra.mxu0 %v1602_v23  ;;  %v1653_v4 = vld [vmem:[%s2120_s0 + $0x1a8] sm:$0xff]   ;;  %v1654_v5 = vld [vmem:[%s2121_s1 + $0xdc] ss:$36 sps:$4 sm:$0xff]   ;;  %v1661_v10 = vld [vmem:[%s2120_s0 + $0x1f0] sm:$0xff]  }
  0x19   :  { %1416 = vmatpush3.bf16.msra.mxu1 %v1603_v24  ;;  %1377 = vmatprep.subr.bf16.mxu0 %v1604_v25  ;;  %v1656_v6 = vld [vmem:[%s2121_s1 + $0xe4] ss:$36 sps:$4 sm:$0xff]   ;;  %v1662_v11 = vld [vmem:[%s2120_s0 + $0x130] sm:$0xff]   ;;  %v1664_v13 = vld [vmem:[%s2120_s0 + $0x178] sm:$0xff]  }
  0x1a   :  { %1417 = vmatprep.subr.bf16.mxu1 %v1605_v26  ;;  %v1659_v8 = vld [vmem:[%s2121_s1 + $0xe0] ss:$36 sps:$4 sm:$0xff]   ;;  %v1663_v12 = vld [vmem:[%s2120_s0 + $0x1b0] sm:$0xff]   ;;  %v1665_v14 = vld [vmem:[%s2120_s0 + $0x1f8] sm:$0xff]  }
  0x1b   :  { %v1666_v15 = vld [vmem:[%s2120_s0 + $0x138] sm:$0xff]   ;;  %v1668_v17 = vld [vmem:[%s2121_s1 + $0x10] ss:$36 sps:$4 sm:$0xff]   ;;  %v1674_v21 = vld [vmem:[%s2120_s0 + $0x200] sm:$0xff]  }
  0x1c   :  { %1378 = vmatpush3.bf16.msra.mxu0 %v1606_v27  ;;  %v1667_v16 = vld [vmem:[%s2120_s0 + $0x1b8] sm:$0xff]   ;;  %v1675_v22 = vld [vmem:[%s2120_s0 + $0x208] sm:$0xff]   ;;  %v1681_v26 = vld [vmem:[%s2121_s1 + $0x60] ss:$36 sps:$4 sm:$0xff]  }
  0x1d   :  { %1418 = vmatpush3.bf16.msra.mxu1 %v1607_v28  ;;  %1379 = vmatprep.subr.bf16.mxu0 %v1608_v29  ;;  %v1670_v18 = vld [vmem:[%s2121_s1 + $0x14] ss:$36 sps:$4 sm:$0xff]   ;;  %v1673_v20 = vld [vmem:[%s2121_s1 + $0x1c] ss:$36 sps:$4 sm:$0xff]   ;;  %v1678_v24 = vld [vmem:[%s2121_s1 + $0x64] ss:$36 sps:$4 sm:$0xff]  }
  0x1e   :  { %1419 = vmatprep.subr.bf16.mxu1 %v1609_v30  ;;  %v1671_v19 = vld [vmem:[%s2121_s1 + $0x18] ss:$36 sps:$4 sm:$0xff]   ;;  %v1682_v27 = vld [vmem:[%s2120_s0 + $0x210] sm:$0xff]   ;;  %v1684_v28 = vld [vmem:[%s2121_s1 + $0xa4] ss:$36 sps:$4 sm:$0xff]  }
  0x1f   :  { %v1676_v23 = vld [vmem:[%s2121_s1 + $0x5c] ss:$36 sps:$4 sm:$0xff]   ;;  %v1686_v29 = vld [vmem:[%s2121_s1 + $0xac] ss:$36 sps:$4 sm:$0xff]  }
  0x20   :  { %1380 = vmatpush3.bf16.msra.mxu0 %v1610_v31  ;;  %v1680_v25 = vld [vmem:[%s2121_s1 + $0x58] ss:$36 sps:$4 sm:$0xff]   ;;  %v1688_v31 = vld [vmem:[%s2121_s1 + $0xa0] ss:$36 sps:$4 sm:$0xff]   ;;  %v1692_v34 = vld [vmem:[%s2121_s1 + $0xec] ss:$36 sps:$4 sm:$0xff]  }
  0x21   :  { %1420 = vmatpush3.bf16.msra.mxu1 %v1611_v32  ;;  %1445 = vmatprep.subr.bf16.mxu0 %v1618_v37  ;;  %v1683_v30 = vld [vmem:[%s2120_s0 + $0x218] sm:$0xff]   ;;  %v1689_v32 = vld [vmem:[%s2121_s1 + $0xa8] ss:$36 sps:$4 sm:$0xff]   ;;  %v199_v37 = vld [vmem:[%s2122_s2] sm:$0xff] }
  0x22   :  { %1485 = vmatprep.subr.bf16.mxu1 %v1619_v38  ;;  %v1691_v36 = vld [vmem:[%s2120_s0 + $0x228] sm:$0xff]   ;;  %209 = vperm.xlu0 %1578, %v199_v37  }
  0x23   :  { %896 = vmatmul.mubr.bf16.vlgmr.msra.gmra.mrb[0].mxu0 %v1612_v33  ;;  %v1690_v33 = vld [vmem:[%s2120_s0 + $0x220] sm:$0xff]   ;;  %v1696_v38 = vld [vmem:[%s2121_s1 + $0xe8] ss:$36 sps:$4 sm:$0xff]  }
  0x24   :  { %961 = vmatmul.mubr.bf16.vlgmr.msra.gmra.mrb[0].mxu1 %v1615_v35  ;;  %1446 = vmatpush3.bf16.msra.mxu0 %v1620_v39  ;;  %v1694_v35 = vld [vmem:[%s2121_s1 + $0xf4] ss:$36 sps:$4 sm:$0xff]  }
  0x25   :  { %1486 = vmatpush3.bf16.msra.mxu1 %v1621_v40  ;;  %1447 = vmatprep.subr.bf16.mxu0 %v1622_v41  ;;  %v201_v39 = vld [vmem:[%s2122_s2 + $0x10] sm:$0xff] }
  0x26   :  { %1487 = vmatprep.subr.bf16.mxu1 %v1623_v42  ;;  %903 = vmatprep.mubr.bf16.mxu0 %v1626_v45  ;;  %v1698_v40 = vld [vmem:[%s2120_s0 + $0x230] sm:$0xff]   ;;  %v1700_v42 = vld [vmem:[%s2121_s1 + $0x20] ss:$36 sps:$4 sm:$0xff]   ;;  %v200_v45 = vld [vmem:[%s2122_s2 + $0x8] sm:$0xff] }
  0x27   :  { %968 = vmatprep.mubr.bf16.mxu1 %v1628_v46  ;;  %v1697_v41 = vld [vmem:[%s2121_s1 + $0xf0] ss:$36 sps:$4 sm:$0xff]   ;;  %219 = vperm.xlu1 %1579, %v201_v39   ;;  %v202_v46 = vld [vmem:[%s2122_s2 + $0x18] sm:$0xff] }
  0x28   :  { %1448 = vmatpush3.bf16.msra.mxu0 %v1624_v43  ;;  %v1701_v43 = vld [vmem:[%s2121_s1 + $0xb0] ss:$36 sps:$4 sm:$0xff]   ;;  %214 = vperm.xlu0 %1578, %v200_v45  }
  0x29   :  { %1488 = vmatpush3.bf16.msra.mxu1 %v1625_v44  ;;  %1449 = vmatprep.subr.bf16.mxu0 %v1632_v49  ;;  %v1699_v44 = vld [vmem:[%s2120_s0 + $0x238] sm:$0xff]  }
  0x2a   :  { %1489 = vmatprep.subr.bf16.mxu1 %v1633_v50  ;;  %v1703_v49 = vld [vmem:[%s2121_s1 + $0xf8] ss:$36 sps:$4 sm:$0xff]   ;;  %v204_v50 = vld [vmem:[%s2122_s2 + $0x28] sm:$0xff] }
  0x2b   :  { %904 = vmatmul.mubr.bf16.gmra.mrb[4].mxu0 %v1630_v47  ;;  %v1702_v47 = vld [vmem:[%s2121_s1 + $0x68] ss:$36 sps:$4 sm:$0xff]   ;;  %224 = vperm.xlu1 %1579, %v202_v46  }
  0x2c   :  { %969 = vmatmul.mubr.bf16.gmra.mrb[4].mxu1 %v1631_v48  ;;  %1450 = vmatpush3.bf16.msra.mxu0 %v1634_v51  ;;  %v203_v48 = vld [vmem:[%s2122_s2 + $0x20] sm:$0xff]  ;;  %v205_v51 = vld [vmem:[%s2122_s2 + $0x30] sm:$0xff] }
  0x2d   :  { %1490 = vmatpush3.bf16.msra.mxu1 %v1635_v52  ;;  %1451 = vmatprep.subr.bf16.mxu0 %v1636_v53  ;;  %v206_v52 = vld [vmem:[%s2122_s2 + $0x38] sm:$0xff] }
  0x2e   :  { %1491 = vmatprep.subr.bf16.mxu1 %v1637_v54  ;;  %911 = vmatprep.mubr.bf16.mxu0 %v1640_v57 }
  0x2f   :  { %976 = vmatprep.mubr.bf16.mxu1 %v1642_v58  ;;  %229 = vperm.xlu0 %1578, %v203_v48  }
  0x30   :  { %1452 = vmatpush3.bf16.msra.mxu0 %v1638_v55  ;;  %234 = vperm.xlu1 %1579, %v204_v50  }
  0x31   :  { %1492 = vmatpush3.bf16.msra.mxu1 %v1639_v56  ;;  %1453 = vmatprep.subr.bf16.mxu0 %v1646_v61 }
  0x32   :  { %1493 = vmatprep.subr.bf16.mxu1 %v1647_v62 }
  0x33   :  { %912 = vmatmul.mubr.bf16.gmra.mrb[8].mxu0 %v1644_v59  ;;  %239 = vperm.xlu0 %1578, %v205_v51  }
  0x34   :  { %977 = vmatmul.mubr.bf16.gmra.mrb[8].mxu1 %v1645_v60  ;;  %1454 = vmatpush3.bf16.msra.mxu0 %v1648_v63 }
  0x35   :  { %1494 = vmatpush3.bf16.msra.mxu1 %v1649_v0  ;;  %1455 = vmatprep.subr.bf16.mxu0 %v1650_v1 }
  0x36   :  { %1495 = vmatprep.subr.bf16.mxu1 %v1651_v2  ;;  %919 = vmatprep.mubr.bf16.mxu0 %v1654_v5 }
  0x37   :  { %984 = vmatprep.mubr.bf16.mxu1 %v1656_v6  ;;  %244 = vperm.xlu1 %1579, %v206_v52  }
  0x38   :  { %1456 = vmatpush3.bf16.msra.mxu0 %v1652_v3 }
  0x39   :  { %1496 = vmatpush3.bf16.msra.mxu1 %v1653_v4  ;;  %1457 = vmatprep.subr.bf16.mxu0 %v1660_v9 }
  0x3a   :  { %1497 = vmatprep.subr.bf16.mxu1 %v1661_v10 }
  0x3b   :  { %920 = vmatmul.mubr.bf16.gmra.mrb[12].mxu0 %v1658_v7 }
  0x3c   :  { %985 = vmatmul.mubr.bf16.gmra.mrb[12].mxu1 %v1659_v8  ;;  %1458 = vmatpush3.bf16.msra.mxu0 %v1662_v11 }
  0x3d   :  { %1498 = vmatpush3.bf16.msra.mxu1 %v1663_v12  ;;  %1459 = vmatprep.subr.bf16.mxu0 %v1664_v13 }
  0x3e   :  { %1499 = vmatprep.subr.bf16.mxu1 %v1665_v14  ;;  %1025 = vmatprep.mubr.bf16.mxu0 %v1670_v18 }
  0x3f   :  { %1090 = vmatprep.mubr.bf16.mxu1 %v1673_v20 }
  0x40   :  { %1460 = vmatpush3.bf16.msra.mxu0 %v1666_v15 }
  0x41   :  { %1500 = vmatpush3.bf16.msra.mxu1 %v1667_v16  ;;  %1537 = vmatprep.subr.bf16.mxu0 %v1674_v21 }
  0x42   :  { %1561 = vmatprep.subr.bf16.mxu1 %v1674_v21 }
  0x43   :  { %1026 = vmatmul.mubr.bf16.vlgmr.msra.gmra.mrb[16].mxu0 %v1668_v17 }
  0x44   :  { %1091 = vmatmul.mubr.bf16.vlgmr.msra.gmra.mrb[16].mxu1 %v1671_v19  ;;  %1538 = vmatpush3.bf16.msra.mxu0 %v1674_v21 }
  0x45   :  { %1569 = vmatpush3.bf16.msra.mxu1 %v1674_v21  ;;  %1539 = vmatprep.subr.bf16.mxu0 %v1675_v22 }
  0x46   :  { %1562 = vmatprep.subr.bf16.mxu1 %v1675_v22  ;;  %1033 = vmatprep.mubr.bf16.mxu0 %v1676_v23 }
  0x47   :  { %1098 = vmatprep.mubr.bf16.mxu1 %v1678_v24 }
  0x48   :  { %1540 = vmatpush3.bf16.msra.mxu0 %v1675_v22 }
  0x49   :  { %1570 = vmatpush3.bf16.msra.mxu1 %v1675_v22  ;;  %1541 = vmatprep.subr.bf16.mxu0 %v1682_v27 }
  0x4a   :  { %1563 = vmatprep.subr.bf16.mxu1 %v1682_v27 }
  0x4b   :  { %1034 = vmatmul.mubr.bf16.gmra.mrb[20].mxu0 %v1680_v25 }
  0x4c   :  { %1099 = vmatmul.mubr.bf16.gmra.mrb[20].mxu1 %v1681_v26  ;;  %1041 = vmatprep.mubr.bf16.mxu0 %v1684_v28 }
  0x4d   :  { %1542 = vmatpush3.bf16.msra.mxu0 %v1682_v27  ;;  %1106 = vmatprep.mubr.bf16.mxu1 %v1686_v29 }
  0x4e   :  { %1571 = vmatpush3.bf16.msra.mxu1 %v1682_v27  ;;  %1543 = vmatprep.subr.bf16.mxu0 %v1683_v30 }
  0x4f   :  { %1564 = vmatprep.subr.bf16.mxu1 %v1683_v30 }
  0x51   :  { %1544 = vmatpush3.bf16.msra.mxu0 %v1683_v30 }
  0x52   :  { %1572 = vmatpush3.bf16.msra.mxu1 %v1683_v30  ;;  %1545 = vmatprep.subr.bf16.mxu0 %v1690_v33 }
  0x53   :  { %1042 = vmatmul.mubr.bf16.gmra.mrb[24].mxu0 %v1688_v31  ;;  %1565 = vmatprep.subr.bf16.mxu1 %v1690_v33 }
  0x54   :  { %1107 = vmatmul.mubr.bf16.gmra.mrb[24].mxu1 %v1689_v32  ;;  %1049 = vmatprep.mubr.bf16.mxu0 %v1692_v34 }
  0x55   :  { %1546 = vmatpush3.bf16.msra.mxu0 %v1690_v33  ;;  %1114 = vmatprep.mubr.bf16.mxu1 %v1694_v35 }
  0x56   :  { %1573 = vmatpush3.bf16.msra.mxu1 %v1690_v33  ;;  %1547 = vmatprep.subr.bf16.mxu0 %v1691_v36 }
  0x57   :  { %1566 = vmatprep.subr.bf16.mxu1 %v1691_v36 }
  0x59   :  { %1548 = vmatpush3.bf16.msra.mxu0 %v1691_v36 }
  0x5a   :  { %1574 = vmatpush3.bf16.msra.mxu1 %v1691_v36  ;;  %1549 = vmatprep.subr.bf16.mxu0 %v1698_v40 }
  0x5b   :  { %1050 = vmatmul.mubr.bf16.gmra.mrb[28].mxu0 %v1696_v38  ;;  %1567 = vmatprep.subr.bf16.mxu1 %v1698_v40 }
  0x5c   :  { %1115 = vmatmul.mubr.bf16.gmra.mrb[28].mxu1 %v1697_v41  ;;  %1553 = vmatprep.mubr.bf16.mxu0 %v1700_v42 }
  0x5d   :  { %1550 = vmatpush3.bf16.msra.mxu0 %v1698_v40  ;;  %1557 = vmatprep.mubr.bf16.mxu1 %v1701_v43 }
  0x5e   :  { %1575 = vmatpush3.bf16.msra.mxu1 %v1698_v40  ;;  %1551 = vmatprep.subr.bf16.mxu0 %v1699_v44 }
  0x5f   :  { %1568 = vmatprep.subr.bf16.mxu1 %v1699_v44 }
  0x61   :  { %1552 = vmatpush3.bf16.msra.mxu0 %v1699_v44 }
  0x62   :  { %1576 = vmatpush3.bf16.msra.mxu1 %v1699_v44 }
  0x64   :  { %1554 = vmatmul.mubr.bf16.vlgmr.msra.gmra.mrb[32].mxu0 %v1702_v47 }
  0x65   :  { %1558 = vmatmul.mubr.bf16.vlgmr.msra.gmra.mrb[32].mxu1 %v1703_v49 }
  0xa1   :  { %v210_v53 = vpop.permute.xlu0 %209 }
  0xa6   :  { %v220_v3 = vpop.permute.xlu1 %219 }
  0xa7   :  { %v215_v55 = vpop.permute.xlu0 %214 }
  0xaa   :  { %v225_v9 = vpop.permute.xlu1 %224 }
  0xae   :  { %v230_v25 = vpop.permute.xlu0 %229 }
  0xaf   :  { %v235_v27 = vpop.permute.xlu1 %234 }
  0xb2   :  { %v240_v43 = vpop.permute.xlu0 %239 }
  0xb6   :  { %v245_v44 = vpop.permute.xlu1 %244 }
  0xf6   :  { %v1381_v54 = vpop.f32.mrb[0].mxu0 }
  0xf7   :  { %v1421_v56 = vpop.f32.mrb[0].mxu1  ;;  %v1382_v57 = vpop.f32.mrb[1].mxu0 }
  0xf8   :  { %v1383_v58 = vadd.f32 %v1382_v57, %v1381_v54  ;;  %v1422_v59 = vpop.f32.mrb[1].mxu1  ;;  %v1384_v60 = vpop.f32.mrb[2].mxu0 }
  0xf9   :  { %v1423_v61 = vadd.f32 %v1422_v59, %v1421_v56  ;;  %v1424_v62 = vpop.f32.mrb[2].mxu1  ;;  %v1385_v63 = vpop.f32.mrb[3].mxu0 }
  0xfa   :  { %v898_v0 = vadd.f32 %v1383_v58, %v210_v53  ;;  %v1386_v1 = vadd.f32 %v1385_v63, %v1384_v60  ;;  %v1425_v2 = vpop.f32.mrb[3].mxu1 }
  0xfb   :  { %v1426_v4 = vadd.f32 %v1425_v2, %v1424_v62 }
  0xfc   :  { %v2073_v5 = vadd.f32 %v1423_v61, %v898_v0  ;;  %v901_v6 = vadd.f32 %v1386_v1, %v215_v55 }
  0xfe   :  { %v2075_v7 = vadd.f32 %v1426_v4, %v901_v6  ;;  %v1387_v8 = vpop.f32.mrb[4].mxu0 }
  0xff   :  { %v1427_v10 = vpop.f32.mrb[4].mxu1  ;;  %v1388_v11 = vpop.f32.mrb[5].mxu0 }
 0x100   :  { %v1389_v12 = vadd.f32 %v1388_v11, %v1387_v8  ;;  %v1428_v13 = vpop.f32.mrb[5].mxu1  ;;  %v1390_v14 = vpop.f32.mrb[6].mxu0 }
 0x101   :  { %v1429_v15 = vadd.f32 %v1428_v13, %v1427_v10  ;;  %v1430_v16 = vpop.f32.mrb[6].mxu1  ;;  %v1391_v17 = vpop.f32.mrb[7].mxu0 }
 0x102   :  { %v906_v18 = vadd.f32 %v1389_v12, %v220_v3  ;;  %v1392_v19 = vadd.f32 %v1391_v17, %v1390_v14  ;;  %v1431_v20 = vpop.f32.mrb[7].mxu1 }
 0x103   :  { %v1432_v21 = vadd.f32 %v1431_v20, %v1430_v16 }
 0x104   :  { %v971_v22 = vadd.f32 %v1429_v15, %v906_v18  ;;  %v909_v23 = vadd.f32 %v1392_v19, %v225_v9 }
 0x106   :  { %v2077_v24 = vadd.f32 %v1432_v21, %v909_v23  ;;  %v1393_v26 = vpop.f32.mrb[8].mxu0 }
 0x107   :  { %v1433_v28 = vpop.f32.mrb[8].mxu1  ;;  %v1394_v29 = vpop.f32.mrb[9].mxu0 }
 0x108   :  { %v1395_v30 = vadd.f32 %v1394_v29, %v1393_v26  ;;  %v1434_v31 = vpop.f32.mrb[9].mxu1  ;;  %v1396_v32 = vpop.f32.mrb[10].mxu0 }
 0x109   :  { %v1435_v33 = vadd.f32 %v1434_v31, %v1433_v28  ;;  %v1436_v34 = vpop.f32.mrb[10].mxu1  ;;  %v1397_v35 = vpop.f32.mrb[11].mxu0 }
 0x10a   :  { %v914_v36 = vadd.f32 %v1395_v30, %v230_v25  ;;  %v1398_v37 = vadd.f32 %v1397_v35, %v1396_v32  ;;  %v1437_v38 = vpop.f32.mrb[11].mxu1 }
 0x10b   :  { %v1438_v39 = vadd.f32 %v1437_v38, %v1436_v34 }
 0x10c   :  { %v979_v40 = vadd.f32 %v1435_v33, %v914_v36  ;;  %v917_v41 = vadd.f32 %v1398_v37, %v235_v27 }
 0x10e   :  { %v2079_v42 = vadd.f32 %v1438_v39, %v917_v41  ;;  %v1399_v45 = vpop.f32.mrb[12].mxu0 }
 0x10f   :  { %v1439_v46 = vpop.f32.mrb[12].mxu1  ;;  %v1400_v47 = vpop.f32.mrb[13].mxu0 }
 0x110   :  { %v1440_v48 = vpop.f32.mrb[13].mxu1  ;;  %v1401_v49 = vadd.f32 %v1400_v47, %v1399_v45  ;;  %v1402_v51 = vpop.f32.mrb[14].mxu0 }
 0x111   :  { %v1441_v50 = vadd.f32 %v1440_v48, %v1439_v46  ;;  %v1442_v52 = vpop.f32.mrb[14].mxu1  ;;  %v1403_v53 = vpop.f32.mrb[15].mxu0 }
 0x112   :  { %v1443_v54 = vpop.f32.mrb[15].mxu1  ;;  %v922_v55 = vadd.f32 %v1401_v49, %v240_v43  ;;  %v1404_v56 = vadd.f32 %v1403_v53, %v1402_v51 }
 0x113   :  { %v1444_v57 = vadd.f32 %v1443_v54, %v1442_v52 }
 0x114   :  { %v987_v58 = vadd.f32 %v1441_v50, %v922_v55  ;;  %v925_v59 = vadd.f32 %v1404_v56, %v245_v44 }
 0x116   :  { %v990_v60 = vadd.f32 %v1444_v57, %v925_v59  ;;  %v1461_v61 = vpop.f32.mrb[16].mxu0 }
 0x117   :  { %v1462_v62 = vpop.f32.mrb[17].mxu0  ;;  %v1501_v63 = vpop.f32.mrb[16].mxu1 }
 0x118   :  { %v1463_v0 = vadd.f32 %v1462_v62, %v1461_v61  ;;  %v1464_v1 = vpop.f32.mrb[18].mxu0  ;;  %v1502_v2 = vpop.f32.mrb[17].mxu1 }
 0x119   :  { %v1465_v3 = vpop.f32.mrb[19].mxu0  ;;  %v1503_v6 = vadd.f32 %v1502_v2, %v1501_v63  ;;  %v1504_v8 = vpop.f32.mrb[18].mxu1 }
 0x11a   :  { %v1028_v4 = vadd.f32 %v1463_v0, %v2073_v5  ;;  %v1466_v9 = vadd.f32 %v1465_v3, %v1464_v1  ;;  %v1505_v10 = vpop.f32.mrb[19].mxu1 }
 0x11b   :  { %v1506_v12 = vadd.f32 %v1505_v10, %v1504_v8 }
 0x11c   :  { %v1031_v11 = vadd.f32 %v1466_v9, %v2075_v7  ;;  %v1093_v13 = vadd.f32 %v1503_v6, %v1028_v4 }
 0x11e   :  { %v1467_v14 = vpop.f32.mrb[20].mxu0  ;;  %v2083_v15 = vadd.f32 %v1506_v12, %v1031_v11 }
 0x11f   :  { %v1468_v16 = vpop.f32.mrb[21].mxu0  ;;  %v1507_v17 = vpop.f32.mrb[20].mxu1 }
 0x120   :  { %v1469_v18 = vadd.f32 %v1468_v16, %v1467_v14  ;;  %v1470_v19 = vpop.f32.mrb[22].mxu0  ;;  %v1508_v20 = vpop.f32.mrb[21].mxu1 }
 0x121   :  { %v1471_v21 = vpop.f32.mrb[23].mxu0  ;;  %v1509_v25 = vadd.f32 %v1508_v20, %v1507_v17  ;;  %v1510_v5 = vpop.f32.mrb[22].mxu1 }
 0x122   :  { %v1036_v23 = vadd.f32 %v1469_v18, %v971_v22  ;;  %v1472_v26 = vadd.f32 %v1471_v21, %v1470_v19  ;;  %v1511_v27 = vpop.f32.mrb[23].mxu1 }
 0x123   :  { %v1512_v29 = vadd.f32 %v1511_v27, %v1510_v5 }
 0x124   :  { %v1039_v28 = vadd.f32 %v1472_v26, %v2077_v24  ;;  %v1101_v7 = vadd.f32 %v1509_v25, %v1036_v23 }
 0x126   :  { %v1473_v30 = vpop.f32.mrb[24].mxu0  ;;  %v1104_v31 = vadd.f32 %v1512_v29, %v1039_v28 }
 0x127   :  { %v1474_v32 = vpop.f32.mrb[25].mxu0  ;;  %v1513_v33 = vpop.f32.mrb[24].mxu1 }
 0x128   :  { %v1475_v34 = vadd.f32 %v1474_v32, %v1473_v30  ;;  %v1476_v35 = vpop.f32.mrb[26].mxu0  ;;  %v1514_v36 = vpop.f32.mrb[25].mxu1 }
 0x129   :  { %v1477_v37 = vpop.f32.mrb[27].mxu0  ;;  %v1515_v39 = vadd.f32 %v1514_v36, %v1513_v33  ;;  %v1516_v41 = vpop.f32.mrb[26].mxu1 }
 0x12a   :  { %v1044_v38 = vadd.f32 %v1475_v34, %v979_v40  ;;  %v1478_v22 = vadd.f32 %v1477_v37, %v1476_v35  ;;  %v1517_v43 = vpop.f32.mrb[27].mxu1 }
 0x12b   :  { %v1518_v45 = vadd.f32 %v1517_v43, %v1516_v41 }
 0x12c   :  { %v1047_v44 = vadd.f32 %v1478_v22, %v2079_v42  ;;  %v1109_v46 = vadd.f32 %v1515_v39, %v1044_v38 }
 0x12e   :  { %v1479_v24 = vpop.f32.mrb[28].mxu0  ;;  %v1112_v47 = vadd.f32 %v1518_v45, %v1047_v44 }
 0x12f   :  { %v1480_v48 = vpop.f32.mrb[29].mxu0  ;;  %v1519_v49 = vpop.f32.mrb[28].mxu1 }
 0x130   :  { %v1481_v50 = vadd.f32 %v1480_v48, %v1479_v24  ;;  %v1482_v51 = vpop.f32.mrb[30].mxu0  ;;  %v1520_v52 = vpop.f32.mrb[29].mxu1 }
 0x131   :  { %v1483_v53 = vpop.f32.mrb[31].mxu0  ;;  %v1521_v55 = vadd.f32 %v1520_v52, %v1519_v49  ;;  %v1522_v56 = vpop.f32.mrb[30].mxu1 }
 0x132   :  { %v1052_v54 = vadd.f32 %v1481_v50, %v987_v58  ;;  %v1484_v40 = vadd.f32 %v1483_v53, %v1482_v51  ;;  %v1523_v57 = vpop.f32.mrb[31].mxu1 }
 0x133   :  { %v1524_v61 = vadd.f32 %v1523_v57, %v1522_v56 }
 0x134   :  { %v1055_v59 = vadd.f32 %v1484_v40, %v990_v60  ;;  %v1117_v62 = vadd.f32 %v1521_v55, %v1052_v54 }
 0x136   :  { %v1120_v63 = vadd.f32 %v1524_v61, %v1055_v59 }
 0x137   :  { %v1555_v42 = vpop.f32.mrb[32].mxu0 }
 0x138   :  { %v1166_v0 = vadd.f32 %v1555_v42, %v1101_v7  ;;  %v1559_v1 = vpop.f32.mrb[32].mxu1  ;;  %v1157_v2 = vpop.f32.mrb[33].mxu0 }
 0x139   :  { %v1182_v3 = vadd.f32 %v1559_v1, %v1117_v62  ;;  %v1158_v4 = vadd.f32 %v1157_v2, %v1093_v13  ;;  %v1173_v6 = vpop.f32.mrb[33].mxu1  ;;  %v1556_v8 = vpop.f32.mrb[34].mxu0 }
 0x13a   :  { %v1190_v9 = vmax.f32 %v1166_v0, 0.0  ;;  %v1174_v10 = vadd.f32 %v1173_v6, %v1109_v46  ;;  %v1169_v58 = vadd.f32 %v1556_v8, %v1104_v31  ;;  %v1560_v11 = vpop.f32.mrb[34].mxu1  ;;  %v1160_v12 = vpop.f32.mrb[35].mxu0 }
 0x13b   :  { %v1194_v14 = vmax.f32 %v1182_v3, 0.0  ;;  %v1188_v16 = vmax.f32 %v1158_v4, 0.0  ;;  %v1185_v60 = vadd.f32 %v1560_v11, %v1120_v63  ;;  %v1161_v17 = vadd.f32 %v1160_v12, %v2083_v15  ;;  %v1176_v18 = vpop.f32.mrb[35].mxu1 }
 0x13c   :  { %v1359_v19 = vpack.c.bf16 %v1190_v9, %v1190_v9  ;;  %v1192_v20 = vmax.f32 %v1174_v10, 0.0  ;;  %v1191_v21 = vmax.f32 %v1169_v58, 0.0  ;;  %v1177_v23 = vadd.f32 %v1176_v18, %v1112_v47 }
 0x13d   :  { %v1363_v25 = vpack.c.bf16 %v1194_v14, %v1194_v14  ;;  %v1357_v13 = vpack.c.bf16 %v1188_v16, %v1188_v16  ;;  %v1195_v5 = vmax.f32 %v1185_v60, 0.0  ;;  %v1189_v26 = vmax.f32 %v1161_v17, 0.0 }
 0x13e   :  { %1231 = vst.msk [vmem:[%s2123_s3 + $0x8] sm:$0xf] %vm1228_vm0, %v1359_v19  ;;  %v1361_v27 = vpack.c.bf16 %v1192_v20, %v1192_v20  ;;  %v1360_v28 = vpack.c.bf16 %v1191_v21, %v1191_v21  ;;  %v1193_v29 = vmax.f32 %v1177_v23, 0.0 }
 0x13f   :  { %1235 = vst.msk [vmem:[%s2123_s3 + $0x18] sm:$0xf] %vm1228_vm0, %v1363_v25  ;;  %1229 = vst.msk [vmem:[%s2123_s3] sm:$0xf] %vm1228_vm0, %v1357_v13  ;;  %v1364_v15 = vpack.c.bf16 %v1195_v5, %v1195_v5  ;;  %v1358_v7 = vpack.c.bf16 %v1189_v26, %v1189_v26 }
 0x140   :  { %1233 = vst.msk [vmem:[%s2123_s3 + $0x10] sm:$0xf] %vm1228_vm0, %v1361_v27  ;;  %1232 = vst.msk [vmem:[%s2123_s3 + $0xc] sm:$0xf] %vm1228_vm0, %v1360_v28  ;;  %v1362_v30 = vpack.c.bf16 %v1193_v29, %v1193_v29 }
 0x141   :  { %1236 = vst.msk [vmem:[%s2123_s3 + $0x1c] sm:$0xf] %vm1228_vm0, %v1364_v15  ;;  %1230 = vst.msk [vmem:[%s2123_s3 + $0x4] sm:$0xf] %vm1228_vm0, %v1358_v7 }
 0x142   :  { %1234 = vst.msk [vmem:[%s2123_s3 + $0x14] sm:$0xf] %vm1228_vm0, %v1362_v30 }

// kernel: encoder_forward.11
= control target key start
LH: loop header
LB: loop body
LE: loop exit
PB: predicated region body
PF: predicated region fallthrough
CT: control target
= control target key end

     0   :  { %12 = vsyncpa [#allocation3], 0  ;;  %v434_v27 = vlaneseq  ;;  %v3142_v35 = vmov 1966171168   ;;  %s3866_s0 = inlined_call_operand.vmem [shape: bf16[2,3136], index: 0, kind: input, shape index: {}]   ;;  %s3867_s1 = inlined_call_operand.vmem [shape: bf16[3136,64], index: 1, kind: input, shape index: {}]   ;;  %s3868_s2 = inlined_call_operand.vmem [shape: f32[1,64], index: 2, kind: input, shape index: {}]   ;;  %s3869_s3 = inlined_call_operand.vmem [shape: f32[1,32], index: 3, kind: input, shape index: {}]   ;;  %s3870_s4 = inlined_call_operand.hbm [shape: f32[2,32], index: 4, kind: output, shape index: {0}]   ;;  %s3871_s5 = inlined_call_operand.hbm [shape: f32[2,32], index: 5, kind: output, shape index: {1}]   ;;  %s3872_s6 = inlined_call_operand.hbm [shape: f32[2,32], index: 6, kind: output, shape index: {2}]  }
   0x1   :  { %v2871_v0 = vld [vmem:[%s3867_s1 + $0x40] sm:$0xff]   ;;  %v2875_v4 = vld [vmem:[%s3867_s1 + $0x48] sm:$0xff]   ;;  %v2879_v8 = vld [vmem:[%s3867_s1 + $0x50] sm:$0xff]   ;;  %v432_v36 = vunpack.c.l.s4 %v3142_v35 }
   0x2   :  { %v2872_v1 = vld [vmem:[%s3867_s1] sm:$0xff]   ;;  %2582 = vmatprep.subr.bf16.mxu0 %v2871_v0  ;;  %v2876_v5 = vld [vmem:[%s3867_s1 + $0x8] sm:$0xff]   ;;  %v2880_v9 = vld [vmem:[%s3867_s1 + $0x10] sm:$0xff]   ;;  %v435_v32 = vshrl.u32 %v434_v27, 7 }
   0x3   :  { %v2873_v2 = vld [vmem:[%s3867_s1 + $0xc0] sm:$0xff]   ;;  %2583 = vmatpush3.bf16.msra.mxu0 %v2872_v1  ;;  %v2877_v6 = vld [vmem:[%s3867_s1 + $0xc8] sm:$0xff]   ;;  %v2881_v10 = vld [vmem:[%s3867_s1 + $0xd0] sm:$0xff]   ;;  %v433_v39 = vunpack.c.0.s8 %v432_v36 }
   0x4   :  { %v2874_v3 = vld [vmem:[%s3867_s1 + $0x80] sm:$0xff]   ;;  %2604 = vmatprep.subr.bf16.mxu1 %v2873_v2  ;;  %2584 = vmatprep.subr.bf16.mxu0 %v2875_v4  ;;  %v2878_v7 = vld [vmem:[%s3867_s1 + $0x88] sm:$0xff]   ;;  %v2882_v11 = vld [vmem:[%s3867_s1 + $0x90] sm:$0xff]  }
   0x5   :  { %2605 = vmatpush3.bf16.msra.mxu1 %v2874_v3  ;;  %v2883_v12 = vld [vmem:[%s3867_s1 + $0x58] sm:$0xff]   ;;  %v2887_v16 = vld [vmem:[%s3867_s1 + $0x60] sm:$0xff]   ;;  %v2891_v20 = vld [vmem:[%s3867_s1 + $0x68] sm:$0xff]   ;;  %v3290_v41 = vsub.s32 %v433_v39, %v435_v32 }
   0x6   :  { %2606 = vmatprep.subr.bf16.mxu1 %v2877_v6  ;;  %v2884_v13 = vld [vmem:[%s3867_s1 + $0x18] sm:$0xff]   ;;  %v2888_v17 = vld [vmem:[%s3867_s1 + $0x20] sm:$0xff]   ;;  %v2892_v21 = vld [vmem:[%s3867_s1 + $0x28] sm:$0xff]  }
   0x7   :  { %2585 = vmatpush3.bf16.msra.mxu0 %v2876_v5  ;;  %v2885_v14 = vld [vmem:[%s3867_s1 + $0xd8] sm:$0xff]   ;;  %v2889_v18 = vld [vmem:[%s3867_s1 + $0xe0] sm:$0xff]   ;;  %v2893_v22 = vld [vmem:[%s3867_s1 + $0xe8] sm:$0xff]  }
   0x8   :  { %2586 = vmatprep.subr.bf16.mxu0 %v2879_v8  ;;  %v2886_v15 = vld [vmem:[%s3867_s1 + $0x98] sm:$0xff]   ;;  %v2890_v19 = vld [vmem:[%s3867_s1 + $0xa0] sm:$0xff]   ;;  %v2894_v23 = vld [vmem:[%s3867_s1 + $0xa8] sm:$0xff]  }
   0x9   :  { %2607 = vmatpush3.bf16.msra.mxu1 %v2878_v7  ;;  %v2895_v24 = vld [vmem:[%s3867_s1 + $0x70] sm:$0xff]   ;;  %v2899_v29 = vld [vmem:[%s3867_s1 + $0x78] sm:$0xff]   ;;  %v23_v33 = vld [vmem:[%s3866_s0] sm:$0xff] }
   0xa   :  { %2608 = vmatprep.subr.bf16.mxu1 %v2881_v10  ;;  %v2896_v25 = vld [vmem:[%s3867_s1 + $0x30] sm:$0xff]   ;;  %v2900_v30 = vld [vmem:[%s3867_s1 + $0x38] sm:$0xff]   ;;  %v2904_v37 = vld [vmem:[%s3867_s1 + $0x140] sm:$0xff]   ;;  %v430_v38 = vcombine.high %v23_v33, %v23_v33  ;;  %v437_v42 = vrot.slane %v23_v33, %v3290_v41 }
   0xb   :  { %2587 = vmatpush3.bf16.msra.mxu0 %v2880_v9  ;;  %v2897_v26 = vld [vmem:[%s3867_s1 + $0xf0] sm:$0xff]   ;;  %v2901_v31 = vld [vmem:[%s3867_s1 + $0xf8] sm:$0xff]   ;;  %v2906_v40 = vld [vmem:[%s3867_s1 + $0x1c0] sm:$0xff]  }
   0xc   :  { %2588 = vmatprep.subr.bf16.mxu0 %v2883_v12  ;;  %v2898_v28 = vld [vmem:[%s3867_s1 + $0xb0] sm:$0xff]   ;;  %v2903_v34 = vld [vmem:[%s3867_s1 + $0xb8] sm:$0xff]   ;;  %v3294_v43 = vrot.slane %v430_v38, %v3290_v41  ;;  %v445_v44 = vcombine.high %v437_v42, %v437_v42  ;;  %v453_v45 = vrot.slane %v437_v42, %v3290_v41  ;;  %v2905_v48 = vld [vmem:[%s3867_s1 + $0x100] sm:$0xff]  }
   0xd   :  { %2609 = vmatpush3.bf16.msra.mxu1 %v2882_v11  ;;  %v2908_v51 = vld [vmem:[%s3867_s1 + $0x148] sm:$0xff]   ;;  %v2907_v53 = vld [vmem:[%s3867_s1 + $0x180] sm:$0xff]   ;;  %v2912_v57 = vld [vmem:[%s3867_s1 + $0x150] sm:$0xff]  }
   0xe   :  { %2610 = vmatprep.subr.bf16.mxu1 %v2885_v14  ;;  %v446_v46 = vcombine.high %v3294_v43, %v3294_v43  ;;  %v467_v47 = vrot.slane %v445_v44, %v3290_v41  ;;  %v475_v50 = vcombine.high %v453_v45, %v453_v45  ;;  %v2910_v54 = vld [vmem:[%s3867_s1 + $0x1c8] sm:$0xff]   ;;  %v2914_v59 = vld [vmem:[%s3867_s1 + $0x1d0] sm:$0xff]   ;;  %v2916_v61 = vld [vmem:[%s3867_s1 + $0x158] sm:$0xff]  }
   0xf   :  { %2589 = vmatpush3.bf16.msra.mxu0 %v2884_v13  ;;  %v2909_v56 = vld [vmem:[%s3867_s1 + $0x108] sm:$0xff]   ;;  %v2913_v60 = vld [vmem:[%s3867_s1 + $0x110] sm:$0xff]   ;;  %v2918_v63 = vld [vmem:[%s3867_s1 + $0x1d8] sm:$0xff]  }
  0x10   :  { %2590 = vmatprep.subr.bf16.mxu0 %v2887_v16  ;;  %v474_v49 = vrot.slane %v446_v46, %v3290_v41  ;;  %1827 = vmatprep.mubr.bf16.mxu0 %v467_v47  ;;  %v477_v52 = vcombine.high %v467_v47, %v467_v47  ;;  %v2911_v58 = vld [vmem:[%s3867_s1 + $0x188] sm:$0xff]   ;;  %v2915_v62 = vld [vmem:[%s3867_s1 + $0x190] sm:$0xff]   ;;  %v2917_v0 = vld [vmem:[%s3867_s1 + $0x118] sm:$0xff]  }
  0x11   :  { %2611 = vmatpush3.bf16.msra.mxu1 %v2886_v15  ;;  %v2920_v1 = vld [vmem:[%s3867_s1 + $0x160] sm:$0xff]   ;;  %v2919_v2 = vld [vmem:[%s3867_s1 + $0x198] sm:$0xff]   ;;  %v2924_v5 = vld [vmem:[%s3867_s1 + $0x168] sm:$0xff]  }
  0x12   :  { %2612 = vmatprep.subr.bf16.mxu1 %v2889_v18  ;;  %v478_v55 = vcombine.high %v474_v49, %v474_v49  ;;  %1867 = vmatprep.mubr.bf16.mxu1 %v477_v52  ;;  %v2922_v3 = vld [vmem:[%s3867_s1 + $0x1e0] sm:$0xff]   ;;  %v2926_v7 = vld [vmem:[%s3867_s1 + $0x1e8] sm:$0xff]   ;;  %v2928_v9 = vld [vmem:[%s3867_s1 + $0x170] sm:$0xff]  }
  0x13   :  { %2591 = vmatpush3.bf16.msra.mxu0 %v2888_v17  ;;  %v2921_v4 = vld [vmem:[%s3867_s1 + $0x120] sm:$0xff]   ;;  %v2925_v8 = vld [vmem:[%s3867_s1 + $0x128] sm:$0xff]   ;;  %v2930_v11 = vld [vmem:[%s3867_s1 + $0x1f0] sm:$0xff]   ;;  %v460_v17 = vrot.slane %v3294_v43, %v3290_v41 }
  0x14   :  { %2592 = vmatprep.subr.bf16.mxu0 %v2891_v20  ;;  %v2923_v6 = vld [vmem:[%s3867_s1 + $0x1a0] sm:$0xff]   ;;  %v2927_v10 = vld [vmem:[%s3867_s1 + $0x1a8] sm:$0xff]   ;;  %v2929_v12 = vld [vmem:[%s3867_s1 + $0x130] sm:$0xff]  }
  0x15   :  { %2613 = vmatpush3.bf16.msra.mxu1 %v2890_v19  ;;  %v2932_v13 = vld [vmem:[%s3867_s1 + $0x178] sm:$0xff]   ;;  %v2931_v14 = vld [vmem:[%s3867_s1 + $0x1b0] sm:$0xff]   ;;  %v2936_v18 = vld [vmem:[%s3867_s1 + $0x240] sm:$0xff]  }
  0x16   :  { %2614 = vmatprep.subr.bf16.mxu1 %v2893_v22  ;;  %v2934_v15 = vld [vmem:[%s3867_s1 + $0x1f8] sm:$0xff]   ;;  %v2938_v20 = vld [vmem:[%s3867_s1 + $0x2c0] sm:$0xff]   ;;  %v476_v22 = vcombine.high %v460_v17, %v460_v17  ;;  %v2944_v27 = vld [vmem:[%s3867_s1 + $0x250] sm:$0xff]  }
  0x17   :  { %2593 = vmatpush3.bf16.msra.mxu0 %v2892_v21  ;;  %v2933_v16 = vld [vmem:[%s3867_s1 + $0x138] sm:$0xff]   ;;  %v2937_v21 = vld [vmem:[%s3867_s1 + $0x200] sm:$0xff]   ;;  %v2947_v32 = vld [vmem:[%s3867_s1 + $0x290] sm:$0xff]  }
  0x18   :  { %2594 = vmatprep.subr.bf16.mxu0 %v2895_v24  ;;  %v2935_v19 = vld [vmem:[%s3867_s1 + $0x1b8] sm:$0xff]   ;;  %v2939_v24 = vld [vmem:[%s3867_s1 + $0x280] sm:$0xff]   ;;  %v2956_v39 = vld [vmem:[%s3867_s1 + $0x268] sm:$0xff]  }
  0x19   :  { %2615 = vmatpush3.bf16.msra.mxu1 %v2894_v23  ;;  %v2940_v23 = vld [vmem:[%s3867_s1 + $0x248] sm:$0xff]   ;;  %v2950_v33 = vld [vmem:[%s3867_s1 + $0x2d8] sm:$0xff]   ;;  %v2952_v35 = vld [vmem:[%s3867_s1 + $0x260] sm:$0xff]  }
  0x1a   :  { %2616 = vmatprep.subr.bf16.mxu1 %v2897_v26  ;;  %v2941_v26 = vld [vmem:[%s3867_s1 + $0x208] sm:$0xff]   ;;  %v2951_v36 = vld [vmem:[%s3867_s1 + $0x298] sm:$0xff]   ;;  %v2953_v38 = vld [vmem:[%s3867_s1 + $0x220] sm:$0xff]  }
  0x1b   :  { %2595 = vmatpush3.bf16.msra.mxu0 %v2896_v25  ;;  %v2942_v25 = vld [vmem:[%s3867_s1 + $0x2c8] sm:$0xff]   ;;  %v2960_v44 = vld [vmem:[%s3867_s1 + $0x270] sm:$0xff]  }
  0x1c   :  { %2596 = vmatprep.subr.bf16.mxu0 %v2899_v29  ;;  %v2946_v29 = vld [vmem:[%s3867_s1 + $0x2d0] sm:$0xff]   ;;  %v2958_v42 = vld [vmem:[%s3867_s1 + $0x2e8] sm:$0xff]  }
  0x1d   :  { %2617 = vmatpush3.bf16.msra.mxu1 %v2898_v28  ;;  %v2943_v28 = vld [vmem:[%s3867_s1 + $0x288] sm:$0xff]  }
  0x1e   :  { %2618 = vmatprep.subr.bf16.mxu1 %v2901_v31  ;;  %v2948_v31 = vld [vmem:[%s3867_s1 + $0x258] sm:$0xff]   ;;  %v2957_v43 = vld [vmem:[%s3867_s1 + $0x228] sm:$0xff]  }
  0x1f   :  { %2597 = vmatpush3.bf16.msra.mxu0 %v2900_v30  ;;  %v2945_v30 = vld [vmem:[%s3867_s1 + $0x210] sm:$0xff]   ;;  %v2959_v46 = vld [vmem:[%s3867_s1 + $0x2a8] sm:$0xff]  }
  0x20   :  { %2626 = vmatprep.subr.bf16.mxu0 %v2904_v37  ;;  %v2954_v37 = vld [vmem:[%s3867_s1 + $0x2e0] sm:$0xff]  }
  0x21   :  { %2619 = vmatpush3.bf16.msra.mxu1 %v2903_v34  ;;  %v2949_v34 = vld [vmem:[%s3867_s1 + $0x218] sm:$0xff]  }
  0x22   :  { %2648 = vmatprep.subr.bf16.mxu1 %v2906_v40  ;;  %1828 = vmatmul.mubr.bf16.vlgmr.msra.gmra.mrb[0].mxu0 %v453_v45  ;;  %v2955_v40 = vld [vmem:[%s3867_s1 + $0x2a0] sm:$0xff]   ;;  %v24_v45 = vld [vmem:[%s3866_s0 + $0x8] sm:$0xff] }
  0x23   :  { %2627 = vmatpush3.bf16.msra.mxu0 %v2905_v48  ;;  %1907 = vmatprep.mubr.bf16.mxu0 %v474_v49  ;;  %v486_v47 = vrot.slane %v24_v45, %v3290_v41  ;;  %v479_v48 = vcombine.high %v24_v45, %v24_v45  ;;  %v2962_v49 = vld [vmem:[%s3867_s1 + $0x2f0] sm:$0xff]  }
  0x24   :  { %1868 = vmatmul.mubr.bf16.vlgmr.msra.gmra.mrb[0].mxu1 %v475_v50  ;;  %2628 = vmatprep.subr.bf16.mxu0 %v2908_v51  ;;  %v2961_v50 = vld [vmem:[%s3867_s1 + $0x230] sm:$0xff]  }
  0x25   :  { %2649 = vmatpush3.bf16.msra.mxu1 %v2907_v53  ;;  %1947 = vmatprep.mubr.bf16.mxu1 %v478_v55  ;;  %v494_v51 = vcombine.high %v486_v47, %v486_v47  ;;  %v3479_v52 = vrot.slane %v479_v48, %v3290_v41  ;;  %v2964_v53 = vld [vmem:[%s3867_s1 + $0x278] sm:$0xff]   ;;  %v3011_v45 = vld [vmem:[%s3867_s1 + $0x4d0] sm:$0xff]  }
  0x26   :  { %2650 = vmatprep.subr.bf16.mxu1 %v2910_v54  ;;  %v2963_v54 = vld [vmem:[%s3867_s1 + $0x2b0] sm:$0xff]  }
  0x27   :  { %2629 = vmatpush3.bf16.msra.mxu0 %v2909_v56  ;;  %v516_v55 = vrot.slane %v494_v51, %v3290_v41  ;;  %v495_v56 = vcombine.high %v3479_v52, %v3479_v52  ;;  %v3012_v48 = vld [vmem:[%s3867_s1 + $0x490] sm:$0xff]   ;;  %v3017_v51 = vld [vmem:[%s3867_s1 + $0x460] sm:$0xff]  }
  0x28   :  { %2630 = vmatprep.subr.bf16.mxu0 %v2912_v57  ;;  %v2966_v57 = vld [vmem:[%s3867_s1 + $0x2f8] sm:$0xff]  }
  0x29   :  { %2651 = vmatpush3.bf16.msra.mxu1 %v2911_v58  ;;  %v2965_v58 = vld [vmem:[%s3867_s1 + $0x238] sm:$0xff]  }
  0x2a   :  { %2652 = vmatprep.subr.bf16.mxu1 %v2914_v59  ;;  %v526_v59 = vcombine.high %v516_v55, %v516_v55 }
  0x2b   :  { %2631 = vmatpush3.bf16.msra.mxu0 %v2913_v60  ;;  %v502_v60 = vrot.slane %v486_v47, %v3290_v41  ;;  %v3013_v47 = vld [vmem:[%s3867_s1 + $0x458] sm:$0xff]  }
  0x2c   :  { %2632 = vmatprep.subr.bf16.mxu0 %v2916_v61  ;;  %v2968_v61 = vld [vmem:[%s3867_s1 + $0x340] sm:$0xff]  }
  0x2d   :  { %2653 = vmatpush3.bf16.msra.mxu1 %v2915_v62  ;;  %v2967_v62 = vld [vmem:[%s3867_s1 + $0x2b8] sm:$0xff]  }
  0x2e   :  { %2654 = vmatprep.subr.bf16.mxu1 %v2918_v63  ;;  %v523_v63 = vrot.slane %v495_v56, %v3290_v41  ;;  %v3020_v56 = vld [vmem:[%s3867_s1 + $0x4a0] sm:$0xff]  }
  0x2f   :  { %2633 = vmatpush3.bf16.msra.mxu0 %v2917_v0  ;;  %v2970_v0 = vld [vmem:[%s3867_s1 + $0x3c0] sm:$0xff]  }
  0x30   :  { %2634 = vmatprep.subr.bf16.mxu0 %v2920_v1  ;;  %v2969_v1 = vld [vmem:[%s3867_s1 + $0x300] sm:$0xff]  }
  0x31   :  { %2655 = vmatpush3.bf16.msra.mxu1 %v2919_v2  ;;  %v524_v2 = vcombine.high %v502_v60, %v502_v60 }
  0x32   :  { %2656 = vmatprep.subr.bf16.mxu1 %v2922_v3  ;;  %v2972_v3 = vld [vmem:[%s3867_s1 + $0x348] sm:$0xff]  }
  0x33   :  { %2635 = vmatpush3.bf16.msra.mxu0 %v2921_v4  ;;  %v2971_v4 = vld [vmem:[%s3867_s1 + $0x380] sm:$0xff]  }
  0x34   :  { %2636 = vmatprep.subr.bf16.mxu0 %v2924_v5  ;;  %v527_v5 = vcombine.high %v523_v63, %v523_v63 }
  0x35   :  { %2657 = vmatpush3.bf16.msra.mxu1 %v2923_v6  ;;  %v2974_v6 = vld [vmem:[%s3867_s1 + $0x3c8] sm:$0xff]  }
  0x36   :  { %2658 = vmatprep.subr.bf16.mxu1 %v2926_v7  ;;  %v2973_v7 = vld [vmem:[%s3867_s1 + $0x308] sm:$0xff]  }
  0x37   :  { %2637 = vmatpush3.bf16.msra.mxu0 %v2925_v8  ;;  %v2976_v8 = vld [vmem:[%s3867_s1 + $0x350] sm:$0xff]  }
  0x38   :  { %2638 = vmatprep.subr.bf16.mxu0 %v2928_v9  ;;  %v2975_v9 = vld [vmem:[%s3867_s1 + $0x388] sm:$0xff]  }
  0x39   :  { %2659 = vmatpush3.bf16.msra.mxu1 %v2927_v10  ;;  %v2978_v10 = vld [vmem:[%s3867_s1 + $0x3d0] sm:$0xff]  }
  0x3a   :  { %2660 = vmatprep.subr.bf16.mxu1 %v2930_v11  ;;  %v2977_v11 = vld [vmem:[%s3867_s1 + $0x310] sm:$0xff]  }
  0x3b   :  { %2639 = vmatpush3.bf16.msra.mxu0 %v2929_v12  ;;  %v2980_v12 = vld [vmem:[%s3867_s1 + $0x358] sm:$0xff]  }
  0x3c   :  { %2640 = vmatprep.subr.bf16.mxu0 %v2932_v13  ;;  %v2979_v13 = vld [vmem:[%s3867_s1 + $0x390] sm:$0xff]  }
  0x3d   :  { %2661 = vmatpush3.bf16.msra.mxu1 %v2931_v14  ;;  %v2982_v14 = vld [vmem:[%s3867_s1 + $0x3d8] sm:$0xff]  }
  0x3e   :  { %2662 = vmatprep.subr.bf16.mxu1 %v2934_v15  ;;  %v2981_v15 = vld [vmem:[%s3867_s1 + $0x318] sm:$0xff]  }
  0x3f   :  { %2641 = vmatpush3.bf16.msra.mxu0 %v2933_v16  ;;  %v2984_v16 = vld [vmem:[%s3867_s1 + $0x360] sm:$0xff]  }
  0x40   :  { %2670 = vmatprep.subr.bf16.mxu0 %v2936_v18  ;;  %v2986_v18 = vld [vmem:[%s3867_s1 + $0x3e0] sm:$0xff]  }
  0x41   :  { %2663 = vmatpush3.bf16.msra.mxu1 %v2935_v19  ;;  %v2985_v19 = vld [vmem:[%s3867_s1 + $0x320] sm:$0xff]  }
  0x42   :  { %1908 = vmatmul.mubr.bf16.vlgmr.msra.gmra.mrb[4].mxu0 %v460_v17  ;;  %2692 = vmatprep.subr.bf16.mxu1 %v2938_v20  ;;  %v2983_v17 = vld [vmem:[%s3867_s1 + $0x398] sm:$0xff]   ;;  %v2988_v20 = vld [vmem:[%s3867_s1 + $0x368] sm:$0xff]  }
  0x43   :  { %2671 = vmatpush3.bf16.msra.mxu0 %v2937_v21  ;;  %1987 = vmatprep.mubr.bf16.mxu0 %v516_v55  ;;  %v2987_v21 = vld [vmem:[%s3867_s1 + $0x3a0] sm:$0xff]   ;;  %v3021_v55 = vld [vmem:[%s3867_s1 + $0x468] sm:$0xff]  }
  0x44   :  { %1948 = vmatmul.mubr.bf16.vlgmr.msra.gmra.mrb[4].mxu1 %v476_v22  ;;  %2672 = vmatprep.subr.bf16.mxu0 %v2940_v23  ;;  %v2990_v22 = vld [vmem:[%s3867_s1 + $0x3e8] sm:$0xff]  }
  0x45   :  { %2693 = vmatpush3.bf16.msra.mxu1 %v2939_v24  ;;  %2027 = vmatprep.mubr.bf16.mxu1 %v526_v59  ;;  %v2989_v23 = vld [vmem:[%s3867_s1 + $0x328] sm:$0xff]   ;;  %v2992_v24 = vld [vmem:[%s3867_s1 + $0x370] sm:$0xff]  }
  0x46   :  { %2694 = vmatprep.subr.bf16.mxu1 %v2942_v25  ;;  %v2991_v25 = vld [vmem:[%s3867_s1 + $0x3a8] sm:$0xff]   ;;  %v3025_v59 = vld [vmem:[%s3867_s1 + $0x470] sm:$0xff]  }
  0x47   :  { %2673 = vmatpush3.bf16.msra.mxu0 %v2941_v26  ;;  %v2994_v26 = vld [vmem:[%s3867_s1 + $0x3f0] sm:$0xff]  }
  0x48   :  { %2674 = vmatprep.subr.bf16.mxu0 %v2944_v27  ;;  %v2993_v27 = vld [vmem:[%s3867_s1 + $0x330] sm:$0xff]  }
  0x49   :  { %2695 = vmatpush3.bf16.msra.mxu1 %v2943_v28  ;;  %v2996_v28 = vld [vmem:[%s3867_s1 + $0x378] sm:$0xff]  }
  0x4a   :  { %2696 = vmatprep.subr.bf16.mxu1 %v2946_v29  ;;  %v2995_v29 = vld [vmem:[%s3867_s1 + $0x3b0] sm:$0xff]  }
  0x4b   :  { %2675 = vmatpush3.bf16.msra.mxu0 %v2945_v30  ;;  %v2998_v30 = vld [vmem:[%s3867_s1 + $0x3f8] sm:$0xff]  }
  0x4c   :  { %2676 = vmatprep.subr.bf16.mxu0 %v2948_v31  ;;  %v2997_v31 = vld [vmem:[%s3867_s1 + $0x338] sm:$0xff]  }
  0x4d   :  { %2697 = vmatpush3.bf16.msra.mxu1 %v2947_v32  ;;  %v509_v32 = vrot.slane %v3479_v52, %v3290_v41  ;;  %v3016_v52 = vld [vmem:[%s3867_s1 + $0x498] sm:$0xff]  }
  0x4e   :  { %2698 = vmatprep.subr.bf16.mxu1 %v2950_v33  ;;  %v3001_v33 = vld [vmem:[%s3867_s1 + $0x440] sm:$0xff]  }
  0x4f   :  { %2677 = vmatpush3.bf16.msra.mxu0 %v2949_v34  ;;  %v3000_v34 = vld [vmem:[%s3867_s1 + $0x3b8] sm:$0xff]  }
  0x50   :  { %2678 = vmatprep.subr.bf16.mxu0 %v2952_v35  ;;  %v3003_v35 = vld [vmem:[%s3867_s1 + $0x4c0] sm:$0xff]  }
  0x51   :  { %2699 = vmatpush3.bf16.msra.mxu1 %v2951_v36  ;;  %v3002_v36 = vld [vmem:[%s3867_s1 + $0x400] sm:$0xff]  }
  0x52   :  { %2700 = vmatprep.subr.bf16.mxu1 %v2954_v37  ;;  %v525_v37 = vcombine.high %v509_v32, %v509_v32 }
  0x53   :  { %2679 = vmatpush3.bf16.msra.mxu0 %v2953_v38  ;;  %v3005_v38 = vld [vmem:[%s3867_s1 + $0x448] sm:$0xff]  }
  0x54   :  { %2680 = vmatprep.subr.bf16.mxu0 %v2956_v39  ;;  %v3004_v39 = vld [vmem:[%s3867_s1 + $0x480] sm:$0xff]  }
  0x55   :  { %2701 = vmatpush3.bf16.msra.mxu1 %v2955_v40  ;;  %v3007_v40 = vld [vmem:[%s3867_s1 + $0x4c8] sm:$0xff]  }
  0x56   :  { %2702 = vmatprep.subr.bf16.mxu1 %v2958_v42  ;;  %v3006_v42 = vld [vmem:[%s3867_s1 + $0x408] sm:$0xff]  }
  0x57   :  { %2681 = vmatpush3.bf16.msra.mxu0 %v2957_v43  ;;  %v3009_v43 = vld [vmem:[%s3867_s1 + $0x450] sm:$0xff]  }
  0x58   :  { %2682 = vmatprep.subr.bf16.mxu0 %v2960_v44  ;;  %v3008_v44 = vld [vmem:[%s3867_s1 + $0x488] sm:$0xff]  }
  0x59   :  { %2703 = vmatpush3.bf16.msra.mxu1 %v2959_v46  ;;  %v3010_v46 = vld [vmem:[%s3867_s1 + $0x410] sm:$0xff]  }
  0x5a   :  { %2704 = vmatprep.subr.bf16.mxu1 %v2962_v49  ;;  %v3015_v49 = vld [vmem:[%s3867_s1 + $0x4d8] sm:$0xff]  }
  0x5b   :  { %2683 = vmatpush3.bf16.msra.mxu0 %v2961_v50  ;;  %v3014_v50 = vld [vmem:[%s3867_s1 + $0x418] sm:$0xff]  }
  0x5c   :  { %2684 = vmatprep.subr.bf16.mxu0 %v2964_v53  ;;  %v3019_v53 = vld [vmem:[%s3867_s1 + $0x4e0] sm:$0xff]  }
  0x5d   :  { %2705 = vmatpush3.bf16.msra.mxu1 %v2963_v54  ;;  %v3018_v54 = vld [vmem:[%s3867_s1 + $0x420] sm:$0xff]  }
  0x5e   :  { %2706 = vmatprep.subr.bf16.mxu1 %v2966_v57  ;;  %v3023_v57 = vld [vmem:[%s3867_s1 + $0x4e8] sm:$0xff]  }
  0x5f   :  { %2685 = vmatpush3.bf16.msra.mxu0 %v2965_v58  ;;  %v3022_v58 = vld [vmem:[%s3867_s1 + $0x428] sm:$0xff]  }
  0x60   :  { %2714 = vmatprep.subr.bf16.mxu0 %v2968_v61  ;;  %v3024_v61 = vld [vmem:[%s3867_s1 + $0x4a8] sm:$0xff]  }
  0x61   :  { %2707 = vmatpush3.bf16.msra.mxu1 %v2967_v62 }
  0x62   :  { %1988 = vmatmul.mubr.bf16.vlgmr.msra.gmra.mrb[8].mxu0 %v502_v60  ;;  %2736 = vmatprep.subr.bf16.mxu1 %v2970_v0  ;;  %v25_v60 = vld [vmem:[%s3866_s0 + $0x10] sm:$0xff] }
  0x63   :  { %2715 = vmatpush3.bf16.msra.mxu0 %v2969_v1  ;;  %2067 = vmatprep.mubr.bf16.mxu0 %v523_v63  ;;  %v535_v62 = vrot.slane %v25_v60, %v3290_v41  ;;  %v528_v63 = vcombine.high %v25_v60, %v25_v60  ;;  %v3027_v0 = vld [vmem:[%s3867_s1 + $0x4f0] sm:$0xff]  }
  0x64   :  { %2028 = vmatmul.mubr.bf16.vlgmr.msra.gmra.mrb[8].mxu1 %v524_v2  ;;  %2716 = vmatprep.subr.bf16.mxu0 %v2972_v3  ;;  %v3026_v1 = vld [vmem:[%s3867_s1 + $0x430] sm:$0xff]  }
  0x65   :  { %2737 = vmatpush3.bf16.msra.mxu1 %v2971_v4  ;;  %2107 = vmatprep.mubr.bf16.mxu1 %v527_v5  ;;  %v543_v2 = vcombine.high %v535_v62, %v535_v62  ;;  %v3685_v3 = vrot.slane %v528_v63, %v3290_v41  ;;  %v3029_v4 = vld [vmem:[%s3867_s1 + $0x478] sm:$0xff]   ;;  %v3028_v5 = vld [vmem:[%s3867_s1 + $0x4b0] sm:$0xff]  }
  0x66   :  { %2738 = vmatprep.subr.bf16.mxu1 %v2974_v6 }
  0x67   :  { %2717 = vmatpush3.bf16.msra.mxu0 %v2973_v7  ;;  %v565_v6 = vrot.slane %v543_v2, %v3290_v41  ;;  %v544_v7 = vcombine.high %v3685_v3, %v3685_v3 }
  0x68   :  { %2718 = vmatprep.subr.bf16.mxu0 %v2976_v8  ;;  %v3031_v8 = vld [vmem:[%s3867_s1 + $0x4f8] sm:$0xff]  }
  0x69   :  { %2739 = vmatpush3.bf16.msra.mxu1 %v2975_v9  ;;  %v3030_v9 = vld [vmem:[%s3867_s1 + $0x438] sm:$0xff]  }
  0x6a   :  { %2740 = vmatprep.subr.bf16.mxu1 %v2978_v10  ;;  %v575_v10 = vcombine.high %v565_v6, %v565_v6 }
  0x6b   :  { %2719 = vmatpush3.bf16.msra.mxu0 %v2977_v11  ;;  %v551_v11 = vrot.slane %v535_v62, %v3290_v41 }
  0x6c   :  { %2720 = vmatprep.subr.bf16.mxu0 %v2980_v12  ;;  %v3033_v12 = vld [vmem:[%s3867_s1 + $0x540] sm:$0xff]  }
  0x6d   :  { %2741 = vmatpush3.bf16.msra.mxu1 %v2979_v13  ;;  %v3032_v13 = vld [vmem:[%s3867_s1 + $0x4b8] sm:$0xff]  }
  0x6e   :  { %2742 = vmatprep.subr.bf16.mxu1 %v2982_v14  ;;  %v572_v14 = vrot.slane %v544_v7, %v3290_v41 }
  0x6f   :  { %2721 = vmatpush3.bf16.msra.mxu0 %v2981_v15  ;;  %v3035_v15 = vld [vmem:[%s3867_s1 + $0x5c0] sm:$0xff]  }
  0x70   :  { %2722 = vmatprep.subr.bf16.mxu0 %v2984_v16  ;;  %v3034_v16 = vld [vmem:[%s3867_s1 + $0x500] sm:$0xff]  }
  0x71   :  { %2743 = vmatpush3.bf16.msra.mxu1 %v2983_v17  ;;  %v573_v17 = vcombine.high %v551_v11, %v551_v11 }
  0x72   :  { %2744 = vmatprep.subr.bf16.mxu1 %v2986_v18  ;;  %v3037_v18 = vld [vmem:[%s3867_s1 + $0x548] sm:$0xff]  }
  0x73   :  { %2723 = vmatpush3.bf16.msra.mxu0 %v2985_v19  ;;  %v3036_v19 = vld [vmem:[%s3867_s1 + $0x580] sm:$0xff]  }
  0x74   :  { %2724 = vmatprep.subr.bf16.mxu0 %v2988_v20  ;;  %v576_v20 = vcombine.high %v572_v14, %v572_v14 }
  0x75   :  { %2745 = vmatpush3.bf16.msra.mxu1 %v2987_v21  ;;  %v3039_v21 = vld [vmem:[%s3867_s1 + $0x5c8] sm:$0xff]  }
  0x76   :  { %2746 = vmatprep.subr.bf16.mxu1 %v2990_v22  ;;  %v3038_v22 = vld [vmem:[%s3867_s1 + $0x508] sm:$0xff]  }
  0x77   :  { %2725 = vmatpush3.bf16.msra.mxu0 %v2989_v23  ;;  %v3041_v23 = vld [vmem:[%s3867_s1 + $0x550] sm:$0xff]  }
  0x78   :  { %2726 = vmatprep.subr.bf16.mxu0 %v2992_v24  ;;  %v3040_v24 = vld [vmem:[%s3867_s1 + $0x588] sm:$0xff]  }
  0x79   :  { %2747 = vmatpush3.bf16.msra.mxu1 %v2991_v25  ;;  %v3043_v25 = vld [vmem:[%s3867_s1 + $0x5d0] sm:$0xff]  }
  0x7a   :  { %2748 = vmatprep.subr.bf16.mxu1 %v2994_v26  ;;  %v3042_v26 = vld [vmem:[%s3867_s1 + $0x510] sm:$0xff]  }
  0x7b   :  { %2727 = vmatpush3.bf16.msra.mxu0 %v2993_v27  ;;  %v3045_v27 = vld [vmem:[%s3867_s1 + $0x558] sm:$0xff]  }
  0x7c   :  { %2728 = vmatprep.subr.bf16.mxu0 %v2996_v28  ;;  %v3044_v28 = vld [vmem:[%s3867_s1 + $0x590] sm:$0xff]  }
  0x7d   :  { %2749 = vmatpush3.bf16.msra.mxu1 %v2995_v29  ;;  %v3047_v29 = vld [vmem:[%s3867_s1 + $0x5d8] sm:$0xff]  }
  0x7e   :  { %2750 = vmatprep.subr.bf16.mxu1 %v2998_v30  ;;  %v3046_v30 = vld [vmem:[%s3867_s1 + $0x518] sm:$0xff]  }
  0x7f   :  { %2729 = vmatpush3.bf16.msra.mxu0 %v2997_v31  ;;  %v3049_v31 = vld [vmem:[%s3867_s1 + $0x560] sm:$0xff]  }
  0x80   :  { %2758 = vmatprep.subr.bf16.mxu0 %v3001_v33  ;;  %v3051_v33 = vld [vmem:[%s3867_s1 + $0x5e0] sm:$0xff]  }
  0x81   :  { %2751 = vmatpush3.bf16.msra.mxu1 %v3000_v34  ;;  %v3050_v34 = vld [vmem:[%s3867_s1 + $0x520] sm:$0xff]  }
  0x82   :  { %2068 = vmatmul.mubr.bf16.vlgmr.msra.gmra.mrb[12].mxu0 %v509_v32  ;;  %2780 = vmatprep.subr.bf16.mxu1 %v3003_v35  ;;  %v3048_v32 = vld [vmem:[%s3867_s1 + $0x598] sm:$0xff]   ;;  %v3053_v35 = vld [vmem:[%s3867_s1 + $0x568] sm:$0xff]  }
  0x83   :  { %2759 = vmatpush3.bf16.msra.mxu0 %v3002_v36  ;;  %2147 = vmatprep.mubr.bf16.mxu0 %v565_v6  ;;  %v3052_v36 = vld [vmem:[%s3867_s1 + $0x5a0] sm:$0xff]  }
  0x84   :  { %2108 = vmatmul.mubr.bf16.vlgmr.msra.gmra.mrb[12].mxu1 %v525_v37  ;;  %2760 = vmatprep.subr.bf16.mxu0 %v3005_v38  ;;  %v3055_v37 = vld [vmem:[%s3867_s1 + $0x5e8] sm:$0xff]  }
  0x85   :  { %2781 = vmatpush3.bf16.msra.mxu1 %v3004_v39  ;;  %2187 = vmatprep.mubr.bf16.mxu1 %v575_v10  ;;  %v3054_v38 = vld [vmem:[%s3867_s1 + $0x528] sm:$0xff]   ;;  %v3057_v39 = vld [vmem:[%s3867_s1 + $0x570] sm:$0xff]  }
  0x86   :  { %2782 = vmatprep.subr.bf16.mxu1 %v3007_v40  ;;  %v3056_v40 = vld [vmem:[%s3867_s1 + $0x5a8] sm:$0xff]  }
  0x87   :  { %2761 = vmatpush3.bf16.msra.mxu0 %v3006_v42  ;;  %v3059_v42 = vld [vmem:[%s3867_s1 + $0x5f0] sm:$0xff]  }
  0x88   :  { %2762 = vmatprep.subr.bf16.mxu0 %v3009_v43  ;;  %v3058_v43 = vld [vmem:[%s3867_s1 + $0x530] sm:$0xff]  }
  0x89   :  { %2783 = vmatpush3.bf16.msra.mxu1 %v3008_v44  ;;  %v3061_v44 = vld [vmem:[%s3867_s1 + $0x578] sm:$0xff]  }
  0x8a   :  { %2784 = vmatprep.subr.bf16.mxu1 %v3011_v45  ;;  %v3060_v45 = vld [vmem:[%s3867_s1 + $0x5b0] sm:$0xff]  }
  0x8b   :  { %2763 = vmatpush3.bf16.msra.mxu0 %v3010_v46  ;;  %v3063_v46 = vld [vmem:[%s3867_s1 + $0x5f8] sm:$0xff]  }
  0x8c   :  { %2764 = vmatprep.subr.bf16.mxu0 %v3013_v47  ;;  %v3062_v47 = vld [vmem:[%s3867_s1 + $0x538] sm:$0xff]  }
  0x8d   :  { %2785 = vmatpush3.bf16.msra.mxu1 %v3012_v48  ;;  %v2581_v48 = vld [vmem:[%s3869_s3] ss:$0 sm:$0xff] }
  0x8e   :  { %2786 = vmatprep.subr.bf16.mxu1 %v3015_v49 }
  0x8f   :  { %2765 = vmatpush3.bf16.msra.mxu0 %v3014_v50 }
  0x90   :  { %2766 = vmatprep.subr.bf16.mxu0 %v3017_v51 }
  0x91   :  { %2787 = vmatpush3.bf16.msra.mxu1 %v3016_v52 }
  0x92   :  { %2788 = vmatprep.subr.bf16.mxu1 %v3019_v53 }
  0x93   :  { %2767 = vmatpush3.bf16.msra.mxu0 %v3018_v54 }
  0x94   :  { %2768 = vmatprep.subr.bf16.mxu0 %v3021_v55 }
  0x95   :  { %2789 = vmatpush3.bf16.msra.mxu1 %v3020_v56 }
  0x96   :  { %2790 = vmatprep.subr.bf16.mxu1 %v3023_v57 }
  0x97   :  { %2769 = vmatpush3.bf16.msra.mxu0 %v3022_v58 }
  0x98   :  { %2770 = vmatprep.subr.bf16.mxu0 %v3025_v59 }
  0x99   :  { %2791 = vmatpush3.bf16.msra.mxu1 %v3024_v61 }
  0x9a   :  { %2792 = vmatprep.subr.bf16.mxu1 %v3027_v0 }
  0x9b   :  { %2771 = vmatpush3.bf16.msra.mxu0 %v3026_v1 }
  0x9c   :  { %2772 = vmatprep.subr.bf16.mxu0 %v3029_v4 }
  0x9d   :  { %2793 = vmatpush3.bf16.msra.mxu1 %v3028_v5 }
  0x9e   :  { %2794 = vmatprep.subr.bf16.mxu1 %v3031_v8 }
  0x9f   :  { %2773 = vmatpush3.bf16.msra.mxu0 %v3030_v9 }
  0xa0   :  { %2802 = vmatprep.subr.bf16.mxu0 %v3033_v12 }
  0xa1   :  { %2795 = vmatpush3.bf16.msra.mxu1 %v3032_v13 }
  0xa2   :  { %2148 = vmatmul.mubr.bf16.vlgmr.msra.gmra.mrb[16].mxu0 %v551_v11  ;;  %2824 = vmatprep.subr.bf16.mxu1 %v3035_v15 }
  0xa3   :  { %2803 = vmatpush3.bf16.msra.mxu0 %v3034_v16  ;;  %2227 = vmatprep.mubr.bf16.mxu0 %v572_v14 }
  0xa4   :  { %2188 = vmatmul.mubr.bf16.vlgmr.msra.gmra.mrb[16].mxu1 %v573_v17  ;;  %2804 = vmatprep.subr.bf16.mxu0 %v3037_v18 }
  0xa5   :  { %2825 = vmatpush3.bf16.msra.mxu1 %v3036_v19  ;;  %2267 = vmatprep.mubr.bf16.mxu1 %v576_v20 }
  0xa6   :  { %2826 = vmatprep.subr.bf16.mxu1 %v3039_v21 }
  0xa7   :  { %2805 = vmatpush3.bf16.msra.mxu0 %v3038_v22 }
  0xa8   :  { %2806 = vmatprep.subr.bf16.mxu0 %v3041_v23 }
  0xa9   :  { %2827 = vmatpush3.bf16.msra.mxu1 %v3040_v24 }
  0xaa   :  { %2828 = vmatprep.subr.bf16.mxu1 %v3043_v25 }
  0xab   :  { %2807 = vmatpush3.bf16.msra.mxu0 %v3042_v26 }
  0xac   :  { %2808 = vmatprep.subr.bf16.mxu0 %v3045_v27 }
  0xad   :  { %2829 = vmatpush3.bf16.msra.mxu1 %v3044_v28 }
  0xae   :  { %2830 = vmatprep.subr.bf16.mxu1 %v3047_v29 }
  0xaf   :  { %2809 = vmatpush3.bf16.msra.mxu0 %v3046_v30 }
  0xb0   :  { %2810 = vmatprep.subr.bf16.mxu0 %v3049_v31 }
  0xb1   :  { %2831 = vmatpush3.bf16.msra.mxu1 %v3048_v32 }
  0xb2   :  { %2832 = vmatprep.subr.bf16.mxu1 %v3051_v33 }
  0xb3   :  { %2811 = vmatpush3.bf16.msra.mxu0 %v3050_v34 }
  0xb4   :  { %2812 = vmatprep.subr.bf16.mxu0 %v3053_v35 }
  0xb5   :  { %2833 = vmatpush3.bf16.msra.mxu1 %v3052_v36 }
  0xb6   :  { %2834 = vmatprep.subr.bf16.mxu1 %v3055_v37 }
  0xb7   :  { %2813 = vmatpush3.bf16.msra.mxu0 %v3054_v38 }
  0xb8   :  { %2814 = vmatprep.subr.bf16.mxu0 %v3057_v39 }
  0xb9   :  { %2835 = vmatpush3.bf16.msra.mxu1 %v3056_v40 }
  0xba   :  { %2836 = vmatprep.subr.bf16.mxu1 %v3059_v42 }
  0xbb   :  { %2815 = vmatpush3.bf16.msra.mxu0 %v3058_v43 }
  0xbc   :  { %13 = vsyncpa [#allocation5], 0  ;;  %2816 = vmatprep.subr.bf16.mxu0 %v3061_v44  ;;  %v558_v49 = vrot.slane %v3685_v3, %v3290_v41  ;;  %s3143_s27 = smov 32   ;;  %v3065_v50 = vld [vmem:[%s3867_s1 + $0x5b8] sm:$0xff]   ;;  %v3066_v51 = vld [vmem:[%s3867_s1 + $0x600] sm:$0xff]   ;;  %v3144_v52 = vmov 0.0  }
  0xbd   :  { %2331 = vrot.lane.b32.xlu0 %v2581_v48, %s3143_s27  ;;  %2837 = vmatpush3.bf16.msra.mxu1 %v3060_v45  ;;  %v3067_v54 = vld [vmem:[%s3867_s1 + $0x608] sm:$0xff]   ;;  %vm3145_vm0 = vmmov 0   ;;  %v3068_v55 = vld [vmem:[%s3867_s1 + $0x610] sm:$0xff]   ;;  %v3069_v56 = vld [vmem:[%s3867_s1 + $0x618] sm:$0xff]   ;;  %vm1791_vm1 = vcmask 523264   ;;  %vm2315_vm2 = vcmask 254976  }
  0xbe   :  { %2838 = vmatprep.subr.bf16.mxu1 %v3063_v46  ;;  %v574_v53 = vcombine.high %v558_v49, %v558_v49  ;;  %v2383_v57 = vld.sshfl [vmem:[%s3866_s0 + $0x18] sm:$0x1 pattern:$0x75316420]  ;;  %v2382_v60 = vld [vmem:[%s3868_s2] ss:$0 sm:$0xff] }
  0xbf   :  { %2817 = vmatpush3.bf16.msra.mxu0 %v3062_v47  ;;  %v590_v58 = vrot.slane %v2383_v57, %v3290_v41  ;;  %s3146_s0 = smov 96   ;;  %s3147_s1 = smov [#allocation2]  }
  0xc0   :  { %2851 = vmatprep.subr.bf16.mxu0 %v3144_v52  ;;  %s2347_s2 = sshll.u32 %s3147_s1, 4  ;;  %s2348_s2 = int_to_ptr.vmem [resolvable:$true] %s2347_s2 }
  0xc1   :  { %2839 = vmatpush3.bf16.msra.mxu1 %v3065_v50  ;;  %s3072_s17 = scalar_lea.vmem %s2348_s2, 32  ;;  %p3077_p1 = scmp.lt.s32.totalorder %s2348_s2, %s2348_s2 }
  0xc2   :  { %2228 = vmatmul.mubr.bf16.vlgmr.msra.gmra.mrb[20].mxu0 %v558_v49  ;;  %p3073_p0 = scmp.ne.s32.totalorder %s2348_s2, %s3072_s17  ;;  %p3078_p2 = scmp.lt.s32.totalorder %s3072_s17, %s3072_s17 }
  0xc3   :  { %2852 = vmatpush3.bf16.msra.mxu0 %v3066_v51  ;;  %2859 = vmatprep.mubr.msk.bf16.mxu0 %vm3145_vm0, %v3144_v52 }
  0xc4   :  { %2268 = vmatmul.mubr.bf16.vlgmr.msra.gmra.mrb[20].mxu1 %v574_v53  ;;  %2853 = vmatprep.subr.bf16.mxu0 %v3144_v52  ;;  %p3079_p3 = por %p3078_p2, %p3077_p1 }
  0xc6   :  { %p3080_p4 = pnand %p3079_p3, %p3073_p0 }
  0xc7   :  { %2854 = vmatpush3.bf16.msra.mxu0 %v3067_v54 }
  0xc8   :  { %2855 = vmatprep.subr.bf16.mxu0 %v3144_v52 }
  0xcb   :  { %2856 = vmatpush3.bf16.msra.mxu0 %v3068_v55 }
  0xcc   :  { %2857 = vmatprep.subr.bf16.mxu0 %v3144_v52 }
  0xcf   :  { %2858 = vmatpush3.bf16.msra.mxu0 %v3069_v56 }
  0xd2   :  { %2860 = vmatmul.mubr.msk.bf16.vlgmr.msra.gmra.mrb[24].mxu0 %vm1791_vm1, %v590_v58 }
  0xf5   :  { %v2598_v59 = vpop.f32.mrb[0].mxu0 }
  0xf6   :  { %v2599_v61 = vpop.f32.mrb[1].mxu0 }
  0xf7   :  { %v2600_v62 = vadd.f32 %v2599_v61, %v2598_v59  ;;  %v2601_v63 = vpop.f32.mrb[2].mxu0  ;;  %v2620_v0 = vpop.f32.mrb[0].mxu1 }
  0xf8   :  { %v2602_v1 = vpop.f32.mrb[3].mxu0  ;;  %v2621_v2 = vpop.f32.mrb[1].mxu1 }
  0xf9   :  { %v1830_v3 = vadd.f32 %v2600_v62, %v2382_v60  ;;  %v2622_v4 = vadd.f32 %v2621_v2, %v2620_v0  ;;  %v2623_v5 = vpop.f32.mrb[2].mxu1 }
  0xfa   :  { %v2624_v6 = vpop.f32.mrb[3].mxu1 }
  0xfb   :  { %v1870_v7 = vadd.f32 %v2622_v4, %v1830_v3 }
 0x115   :  { %v2642_v41 = vpop.f32.mrb[4].mxu0 }
 0x116   :  { %v2643_v8 = vpop.f32.mrb[5].mxu0 }
 0x117   :  { %v2644_v9 = vadd.f32 %v2643_v8, %v2642_v41  ;;  %v2645_v10 = vpop.f32.mrb[6].mxu0  ;;  %v2664_v11 = vpop.f32.mrb[4].mxu1 }
 0x118   :  { %v2646_v12 = vpop.f32.mrb[7].mxu0  ;;  %v2665_v13 = vpop.f32.mrb[5].mxu1 }
 0x119   :  { %v1910_v14 = vadd.f32 %v2644_v9, %v1870_v7  ;;  %v2666_v15 = vadd.f32 %v2665_v13, %v2664_v11  ;;  %v2667_v16 = vpop.f32.mrb[6].mxu1 }
 0x11a   :  { %v2668_v17 = vpop.f32.mrb[7].mxu1 }
 0x11b   :  { %v1950_v18 = vadd.f32 %v2666_v15, %v1910_v14 }
 0x135   :  { %v2686_v19 = vpop.f32.mrb[8].mxu0 }
 0x136   :  { %v2687_v20 = vpop.f32.mrb[9].mxu0 }
 0x137   :  { %v2688_v21 = vadd.f32 %v2687_v20, %v2686_v19  ;;  %v2689_v22 = vpop.f32.mrb[10].mxu0  ;;  %v2708_v23 = vpop.f32.mrb[8].mxu1 }
 0x138   :  { %v2690_v24 = vpop.f32.mrb[11].mxu0  ;;  %v2709_v25 = vpop.f32.mrb[9].mxu1 }
 0x139   :  { %v1990_v26 = vadd.f32 %v2688_v21, %v1950_v18  ;;  %v2710_v27 = vadd.f32 %v2709_v25, %v2708_v23  ;;  %v2711_v28 = vpop.f32.mrb[10].mxu1 }
 0x13a   :  { %v2712_v29 = vpop.f32.mrb[11].mxu1 }
 0x13b   :  { %v2030_v30 = vadd.f32 %v2710_v27, %v1990_v26 }
 0x155   :  { %v2730_v31 = vpop.f32.mrb[12].mxu0 }
 0x156   :  { %v2731_v32 = vpop.f32.mrb[13].mxu0 }
 0x157   :  { %v2732_v33 = vadd.f32 %v2731_v32, %v2730_v31  ;;  %v2733_v34 = vpop.f32.mrb[14].mxu0  ;;  %v2752_v35 = vpop.f32.mrb[12].mxu1 }
 0x158   :  { %v2734_v36 = vpop.f32.mrb[15].mxu0  ;;  %v2753_v37 = vpop.f32.mrb[13].mxu1 }
 0x159   :  { %v2070_v38 = vadd.f32 %v2732_v33, %v2030_v30  ;;  %v2754_v39 = vadd.f32 %v2753_v37, %v2752_v35  ;;  %v2755_v40 = vpop.f32.mrb[14].mxu1 }
 0x15a   :  { %v2756_v42 = vpop.f32.mrb[15].mxu1 }
 0x15b   :  { %v2110_v43 = vadd.f32 %v2754_v39, %v2070_v38 }
 0x175   :  { %v2774_v44 = vpop.f32.mrb[16].mxu0 }
 0x176   :  { %v2775_v45 = vpop.f32.mrb[17].mxu0 }
 0x177   :  { %v2776_v46 = vadd.f32 %v2775_v45, %v2774_v44  ;;  %v2777_v47 = vpop.f32.mrb[18].mxu0  ;;  %v2796_v48 = vpop.f32.mrb[16].mxu1 }
 0x178   :  { %v2778_v49 = vpop.f32.mrb[19].mxu0  ;;  %v2797_v50 = vpop.f32.mrb[17].mxu1 }
 0x179   :  { %v2150_v51 = vadd.f32 %v2776_v46, %v2110_v43  ;;  %v2798_v52 = vadd.f32 %v2797_v50, %v2796_v48  ;;  %v2799_v53 = vpop.f32.mrb[18].mxu1 }
 0x17a   :  { %v2800_v54 = vpop.f32.mrb[19].mxu1 }
 0x17b   :  { %v2190_v55 = vadd.f32 %v2798_v52, %v2150_v51 }
 0x195   :  { %v2818_v56 = vpop.f32.mrb[20].mxu0 }
 0x196   :  { %v2819_v57 = vpop.f32.mrb[21].mxu0 }
 0x197   :  { %v2820_v58 = vadd.f32 %v2819_v57, %v2818_v56  ;;  %v2821_v59 = vpop.f32.mrb[22].mxu0  ;;  %v2840_v60 = vpop.f32.mrb[20].mxu1 }
 0x198   :  { %v2822_v61 = vpop.f32.mrb[23].mxu0  ;;  %v2841_v62 = vpop.f32.mrb[21].mxu1 }
 0x199   :  { %v2230_v63 = vadd.f32 %v2820_v58, %v2190_v55  ;;  %v2842_v0 = vadd.f32 %v2841_v62, %v2840_v60  ;;  %v2843_v1 = vpop.f32.mrb[22].mxu1 }
 0x19a   :  { %v2844_v2 = vpop.f32.mrb[23].mxu1 }
 0x19b   :  { %v2270_v3 = vadd.f32 %v2842_v0, %v2230_v63 }
 0x1a5   :  { %v2309_v4 = vpop.f32.mrb[24].mxu0 }
 0x1a6   :  { %v2310_v5 = vadd.f32 %v2309_v4, %v2270_v3  ;;  %v2861_v6 = vpop.f32.mrb[25].mxu0 }
 0x1a7   :  { %v2312_v7 = vpop.f32.mrb[26].mxu0 }
 0x1a8   :  { %v2322_v41 = vmul.f32 0.5, %v2310_v5  ;;  %v2862_v8 = vpop.f32.mrb[27].mxu0  ;;  %2318 = vrot.lane.b32.xlu1 %v2310_v5, %s3146_s0  ;;  %2316 = vst.msk [vmem:[#allocation2] sm:$0x3] %vm2315_vm2, %v2310_v5 }
 0x1aa   :  { %v2323_v9 = vmul.f32 1.442695, %v2322_v41 }
 0x1ac   :  { %3070 = vpow2.f32 %v2323_v9 }
 0x1ad   :  { %3083 = shalt.err (!%p3080_p4)
}
 0x1ae   :  { %s3084_s20 = scalar_lea.hbm %s3870_s4, 32 }
 0x1af   :  { %p3085_p5 = scmp.ne.s32.totalorder %s3870_s4, %s3084_s20  ;;  %p3088_p6 = scmp.lt.u32.totalorder %s3084_s20, %s3870_s4 }
 0x1b1   :  { %p3090_p7 = pnand %p3088_p6, %p3085_p5 }
 0x1b3   :  { %3093 = shalt.err (!%p3090_p7)
}
 0x1b4   :  { %2350 = dma.vmem_to_hbm [thread:$0]  %s2348_s2, 32, %s3870_s4, [#allocation3]   ;;  %v2332_v10 = vpop.permute.xlu0 %2331 }
 0x1b5   :  { %s3148_s27 = smov [#allocation4]  }
 0x1b6   :  { %v3071_v11 = vpop.eup %3070  ;;  %s2357_s28 = sshll.u32 %s3148_s27, 4  ;;  %s2358_s28 = int_to_ptr.vmem [resolvable:$true] %s2357_s28 }
 0x1b7   :  { %v2334_v12 = vmul.f32 %v3071_v11, %v2332_v10  ;;  %s3094_s29 = scalar_lea.vmem %s2358_s28, 32  ;;  %p3099_p9 = scmp.lt.s32.totalorder %s2358_s28, %s2358_s28 }
 0x1b8   :  { %p3095_p8 = scmp.ne.s32.totalorder %s2358_s28, %s3094_s29  ;;  %p3100_p10 = scmp.lt.s32.totalorder %s3094_s29, %s3094_s29 }
 0x1b9   :  { %2336 = vrot.lane.b32.xlu0 %v2334_v12, %s3146_s0 }
 0x1ba   :  { %p3101_p11 = por %p3100_p10, %p3099_p9 }
 0x1bc   :  { %p3102_p12 = pnand %p3101_p11, %p3095_p8 }
 0x21a   :  { %v2319_v13 = vpop.permute.xlu1 %2318 }
 0x21b   :  { %2321 = vst.msk [vmem:[#allocation4] sm:$0x3] %vm2315_vm2, %v2319_v13 }
 0x21c   :  { %3105 = shalt.err (!%p3102_p12)
}
 0x21d   :  { %s3106_s4 = scalar_lea.hbm %s3871_s5, 32 }
 0x21e   :  { %p3107_p13 = scmp.ne.s32.totalorder %s3871_s5, %s3106_s4  ;;  %p3110_p0 = scmp.lt.u32.totalorder %s3106_s4, %s3871_s5 }
 0x220   :  { %p3112_p1 = pnand %p3110_p0, %p3107_p13 }
 0x222   :  { %3115 = shalt.err (!%p3112_p1)
}
 0x223   :  { %2360 = dma.vmem_to_hbm [thread:$0]  %s2358_s28, 32, %s3871_s5, [#allocation5]  }
 0x224   :  { %s3149_s13 = smov [#allocation6]  }
 0x225   :  { %s2367_s14 = sshll.u32 %s3149_s13, 4  ;;  %s2368_s14 = int_to_ptr.vmem [resolvable:$true] %s2367_s14 }
 0x226   :  { %s3116_s15 = scalar_lea.vmem %s2368_s14, 32  ;;  %p3121_p3 = scmp.lt.s32.totalorder %s2368_s14, %s2368_s14 }
 0x227   :  { %p3117_p2 = scmp.ne.s32.totalorder %s2368_s14, %s3116_s15  ;;  %p3122_p4 = scmp.lt.s32.totalorder %s3116_s15, %s3116_s15 }
 0x229   :  { %p3123_p5 = por %p3122_p4, %p3121_p3 }
 0x22b   :  { %v2337_v14 = vpop.permute.xlu0 %2336  ;;  %p3124_p6 = pnand %p3123_p5, %p3117_p2 }
 0x22c   :  { %v2339_v15 = vadd.f32 %v2337_v14, %v2310_v5 }
 0x22e   :  { %2340 = vst.msk [vmem:[#allocation6] sm:$0x3] %vm2315_vm2, %v2339_v15 }
 0x22f   :  { %3127 = shalt.err (!%p3124_p6)
}
 0x230   :  { %s3128_s1 = scalar_lea.hbm %s3872_s6, 32 }
 0x231   :  { %p3129_p7 = scmp.ne.s32.totalorder %s3872_s6, %s3128_s1  ;;  %p3132_p8 = scmp.lt.u32.totalorder %s3128_s1, %s3872_s6 }
 0x233   :  { %p3134_p9 = pnand %p3132_p8, %p3129_p7 }
 0x235   :  { %3137 = shalt.err (!%p3134_p9)
}
 0x236   :  { %2370 = dma.vmem_to_hbm [thread:$0]  %s2368_s14, 32, %s3872_s6, [#allocation5]  }
 0x237   :  { %3138 = dma.done.wait [#allocation3], 32  }
 0x238   :  { %3139 = vsyncadd [#allocation3], 4294967264 }
 0x239   :  { %3140 = dma.done.wait [#allocation5], 64  }
 0x23a   :  { %3141 = vsyncadd [#allocation5], 4294967232 }
 0x23b   :  { %2380 = vsyncpa [#allocation3], 1 }
 0x23c   :  { %2381 = vsyncpa [#allocation5], 1 }

</bundles_post_ra>
